<compile_context>
chip_gen: v5e
topology: v5e:2x2
jax: 0.10.0
libtpu: 0.0.40
codegen_flags: <defaults>
</compile_context>

<pallas_src>
import jax
import jax.numpy as jnp
from jax import lax
from jax.experimental import pallas as pl
from jax.experimental.pallas import tpu as pltpu  # noqa: F401  (TPU backend)

D_MODEL = 32
NHEAD = 4
HEAD_DIM = D_MODEL // NHEAD
DIM_FF = 64
NUM_LAYERS = 2
SEQ = 16
BATCH = 2
ROWS = SEQ * BATCH
LN_EPS = 1e-5

# --- weight-slab column offsets (slab shape (L, D_MODEL, W_COLS), bf16) ---
C_QSW1 = 0 * D_MODEL            # query_scale linear1        (D, D)
C_QSW2 = 1 * D_MODEL            # query_scale linear2        (D, D)
C_WQK = 2 * D_MODEL             # fused Wq|Wk (Q pre-scaled)  (D, 2D)
C_WV = 4 * D_MODEL              # Wv                          (D, D)
C_WO = 5 * D_MODEL              # Wo                          (D, D)
C_W1 = 6 * D_MODEL              # FFN linear1                 (D, FF)
W_COLS = 6 * D_MODEL + DIM_FF   # = 256

# --- vector-slab row indices (slab shape (L, N_VEC, VEC_W), f32) ---
V_QSB1, V_QSB2, V_BQK, V_BV, V_BO, V_B1, V_B2, V_G1, V_BE1, V_G2, V_BE2 = range(11)
N_VEC = 11
VEC_W = max(2 * D_MODEL, DIM_FF)  # = 64


# ---------------------------------------------------------------------------
# Fused kernel: shared query_scale MLP + NUM_LAYERS post-norm encoder layers.
# Activations live as (ROWS, D) f32 in the native (s, b) row order; the batch
# separation of self-attention is enforced by a same-batch score mask.
# ---------------------------------------------------------------------------
def fused_encoder_kernel(x_ref, pos_ref, w_ref, w2_ref, vec_ref, o_ref):
    x = x_ref[...]        # (ROWS, D) f32, rows ordered (s, b)
    pos = pos_ref[...]    # (ROWS, D) f32

    # Same-batch attention mask (b = row % BATCH); computed once, reused per layer.
    r_id = lax.broadcasted_iota(jnp.int32, (ROWS, ROWS), 0)
    c_id = lax.broadcasted_iota(jnp.int32, (ROWS, ROWS), 1)
    same_batch = (r_id % BATCH) == (c_id % BATCH)
    neg_big = jnp.float32(-1e30)

    for l in range(NUM_LAYERS):                     # static loop, fully VMEM-resident
        w = w_ref[l]                                # (D, W_COLS)  bf16
        w2 = w2_ref[l]                              # (FF, D)     bf16
        vec = vec_ref[l]                            # (N_VEC, VEC_W) f32

        qs_w1 = w[:, C_QSW1:C_QSW1 + D_MODEL]
        qs_w2 = w[:, C_QSW2:C_QSW2 + D_MODEL]
        wqk = w[:, C_WQK:C_WQK + 2 * D_MODEL]
        wv = w[:, C_WV:C_WV + D_MODEL]
        wo = w[:, C_WO:C_WO + D_MODEL]
        w1 = w[:, C_W1:C_W1 + DIM_FF]

        qs_b1 = vec[V_QSB1:V_QSB1 + 1, :D_MODEL]
        qs_b2 = vec[V_QSB2:V_QSB2 + 1, :D_MODEL]
        bqk = vec[V_BQK:V_BQK + 1, :2 * D_MODEL]
        bv = vec[V_BV:V_BV + 1, :D_MODEL]
        bo = vec[V_BO:V_BO + 1, :D_MODEL]
        b1 = vec[V_B1:V_B1 + 1, :DIM_FF]
        b2 = vec[V_B2:V_B2 + 1, :D_MODEL]
        g1 = vec[V_G1:V_G1 + 1, :D_MODEL]
        be1 = vec[V_BE1:V_BE1 + 1, :D_MODEL]
        g2 = vec[V_G2:V_G2 + 1, :D_MODEL]
        be2 = vec[V_BE2:V_BE2 + 1, :D_MODEL]

        xb = x.astype(jnp.bfloat16)

        # ---- shared query_scale MLP (bf16 matmuls, f32 elementwise) ----
        h = jnp.dot(xb, qs_w1, preferred_element_type=jnp.float32) + qs_b1
        h = jnp.maximum(h, 0.0)
        pos_scales = jnp.dot(h.astype(jnp.bfloat16), qs_w2,
                             preferred_element_type=jnp.float32) + qs_b2

        qk_in = x + pos * pos_scales                # with_pos_embed(src, pos*scales)

        # ---- fused Q|K projection (scale folded into Q weights), separate V ----
        qk = jnp.dot(qk_in.astype(jnp.bfloat16), wqk,
                     preferred_element_type=jnp.float32) + bqk
        q = qk[:, :D_MODEL].astype(jnp.bfloat16)
        k = qk[:, D_MODEL:].astype(jnp.bfloat16)
        v = jnp.dot(xb, wv, preferred_element_type=jnp.float32) + bv
        vb = v.astype(jnp.bfloat16)

        # ---- multi-head self-attention: masked full (ROWS, ROWS) scores,
        #      head concat folded into per-head row blocks of Wo ----
        attn = jnp.zeros((ROWS, D_MODEL), jnp.float32)
        for hh in range(NHEAD):
            hs = slice(hh * HEAD_DIM, (hh + 1) * HEAD_DIM)
            s = lax.dot_general(q[:, hs], k[:, hs],
                                (((1,), (1,)), ((), ())),
                                preferred_element_type=jnp.float32)   # (ROWS, ROWS)
            s = jnp.where(same_batch, s, neg_big)
            s = s - jnp.max(s, axis=-1, keepdims=True)
            p = jnp.exp(s)
            p = p * pl.reciprocal(jnp.sum(p, axis=-1, keepdims=True), approx=True)
            ctx = jnp.dot(p.astype(jnp.bfloat16), vb[:, hs],
                          preferred_element_type=jnp.float32)         # (ROWS, HD)
            attn = attn + jnp.dot(ctx.astype(jnp.bfloat16), wo[hs, :],
                                  preferred_element_type=jnp.float32)
        attn = attn + bo

        # ---- residual + LayerNorm1 (dropout = identity in eval) ----
        y = x + attn
        mu = jnp.mean(y, axis=-1, keepdims=True)
        var = jnp.mean((y - mu) ** 2, axis=-1, keepdims=True)
        y = (y - mu) * lax.rsqrt(var + LN_EPS) * g1 + be1

        # ---- FFN: linear1 -> relu -> linear2 ----
        h1 = jnp.dot(y.astype(jnp.bfloat16), w1,
                     preferred_element_type=jnp.float32) + b1
        h1 = jnp.maximum(h1, 0.0)
        ff = jnp.dot(h1.astype(jnp.bfloat16), w2,
                     preferred_element_type=jnp.float32) + b2

        # ---- residual + LayerNorm2 ----
        z = y + ff
        mu2 = jnp.mean(z, axis=-1, keepdims=True)
        var2 = jnp.mean((z - mu2) ** 2, axis=-1, keepdims=True)
        x = (z - mu2) * lax.rsqrt(var2 + LN_EPS) * g2 + be2

    o_ref[...] = x
    # TODO(synk): lane-dense output store skipped on purpose -- the 4 KiB masked
    # store is noise at this size (perf-review item 10).


# ---------------------------------------------------------------------------
# One-time parameter prep (hoisted out of the per-call path): pack everything
# into 3 slabs, fold the attention scale into Wq / bq, cast weights to bf16.
# ---------------------------------------------------------------------------
def prepare_params(params):
    qs = params["query_scale"]
    layers = params["layers"]
    scale = 1.0 / (HEAD_DIM ** 0.5)

    def pad_vec(v):  # (1, n) -> (1, VEC_W)
        return jnp.pad(v, ((0, 0), (0, VEC_W - v.shape[1])))

    w_slabs, w2_slabs, vec_slabs = [], [], []
    for lp in layers:
        wq_s = lp["wq"] * scale
        bq_s = lp["bq"] * scale
        wqk = jnp.concatenate([wq_s, lp["wk"]], axis=1)            # (D, 2D)
        bqk = jnp.concatenate([bq_s, lp["bk"]], axis=1)            # (1, 2D)

        w_slab = jnp.concatenate(
            [qs["w1"], qs["w2"], wqk, lp["wv"], lp["wo"], lp["w1"]], axis=1)
        assert w_slab.shape == (D_MODEL, W_COLS)
        w_slabs.append(w_slab.astype(jnp.bfloat16))
        w2_slabs.append(lp["w2"].astype(jnp.bfloat16))             # (FF, D)

        vec = jnp.concatenate(
            [pad_vec(qs["b1"]), pad_vec(qs["b2"]), bqk, pad_vec(lp["bv"]),
             pad_vec(lp["bo"]), lp["b1"], pad_vec(lp["b2"]), pad_vec(lp["g1"]),
             pad_vec(lp["be1"]), pad_vec(lp["g2"]), pad_vec(lp["be2"])], axis=0)
        assert vec.shape == (N_VEC, VEC_W)
        vec_slabs.append(vec)

    return dict(w=jnp.stack(w_slabs, 0),     # (L, D, W_COLS)   bf16
                w2=jnp.stack(w2_slabs, 0),   # (L, FF, D)       bf16
                vec=jnp.stack(vec_slabs, 0)) # (L, N_VEC, VEC_W) f32


# ---------------------------------------------------------------------------
# Full TransformerEncoder forward: one grid-less pallas_call, everything VMEM
# resident, no wrapper-side transposes (reshapes are metadata-only).
# ---------------------------------------------------------------------------
@jax.jit
def transformer_encoder(src, pos, packed):
    # TODO(synk): mask / src_key_padding_mask are not supported (None path only).
    S, B, D = src.shape
    x = src.reshape(S * B, D)      # native (s, b) row order, free reshape
    p = pos.reshape(S * B, D)

    out = pl.pallas_call(
        fused_encoder_kernel,
        out_shape=jax.ShapeDtypeStruct((S * B, D), src.dtype),
    )(x, p, packed["w"], packed["w2"], packed["vec"])

    return out.reshape(S, B, D)
    # self.norm is None (post-norm config)
    # TODO(synk): on v7x, batched independent calls could add a leading parallel
    # grid axis to shard across the two TensorCores; single-call path keeps 1 TC.


# ---------------------------------------------------------------------------
# Pure-JAX fp32 reference (same math) for a sanity check
# ---------------------------------------------------------------------------
def ref_encoder(src, pos, params):
    qs = params["query_scale"]
    out = src
    for p in params["layers"]:
        ps = jnp.maximum(out @ qs["w1"] + qs["b1"][0], 0.0) @ qs["w2"] + qs["b2"][0]
        posq = pos * ps
        qk = out + posq
        S, B, D = out.shape
        q = (qk @ p["wq"] + p["bq"][0]).reshape(S, B, NHEAD, HEAD_DIM)
        k = (qk @ p["wk"] + p["bk"][0]).reshape(S, B, NHEAD, HEAD_DIM)
        v = (out @ p["wv"] + p["bv"][0]).reshape(S, B, NHEAD, HEAD_DIM)
        scores = jnp.einsum("sbhd,tbhd->bhst", q, k) / (HEAD_DIM ** 0.5)
        w = jax.nn.softmax(scores, axis=-1)
        attn = jnp.einsum("bhst,tbhd->sbhd", w, v).reshape(S, B, D)
        attn = attn @ p["wo"] + p["bo"][0]
        x = out + attn
        mu = x.mean(-1, keepdims=True)
        var = ((x - mu) ** 2).mean(-1, keepdims=True)
        x = (x - mu) * lax.rsqrt(var + LN_EPS) * p["g1"][0] + p["be1"][0]
        ff = jnp.maximum(x @ p["w1"] + p["b1"][0], 0.0) @ p["w2"] + p["b2"][0]
        y = x + ff
        mu2 = y.mean(-1, keepdims=True)
        var2 = ((y - mu2) ** 2).mean(-1, keepdims=True)
        out = (y - mu2) * lax.rsqrt(var2 + LN_EPS) * p["g2"][0] + p["be2"][0]
    return out


# ---------------------------------------------------------------------------
# Deterministic parameter init  (weights stored as (in, out) for x @ W)
# ---------------------------------------------------------------------------
def init_params(key):
    keys = iter(jax.random.split(key, 128))

    def w(shape, scale=0.05):
        return scale * jax.random.normal(next(keys), shape, dtype=jnp.float32)

    params = {
        "query_scale": dict(
            w1=w((D_MODEL, D_MODEL)), b1=w((1, D_MODEL)),
            w2=w((D_MODEL, D_MODEL)), b2=w((1, D_MODEL)),
        ),
        "layers": [],
    }
    for _ in range(NUM_LAYERS):
        params["layers"].append(dict(
            wq=w((D_MODEL, D_MODEL)), bq=w((1, D_MODEL)),
            wk=w((D_MODEL, D_MODEL)), bk=w((1, D_MODEL)),
            wv=w((D_MODEL, D_MODEL)), bv=w((1, D_MODEL)),
            wo=w((D_MODEL, D_MODEL)), bo=w((1, D_MODEL)),
            g1=jnp.ones((1, D_MODEL), jnp.float32),
            be1=jnp.zeros((1, D_MODEL), jnp.float32),
            w1=w((D_MODEL, DIM_FF)), b1=w((1, DIM_FF)),
            w2=w((DIM_FF, D_MODEL)), b2=w((1, D_MODEL)),
            g2=jnp.ones((1, D_MODEL), jnp.float32),
            be2=jnp.zeros((1, D_MODEL), jnp.float32),
        ))
    return params


if __name__ == "__main__":
    key = jax.random.PRNGKey(0)
    k_src, k_pos, k_param = jax.random.split(key, 3)
    src = jax.random.normal(k_src, (SEQ, BATCH, D_MODEL), dtype=jnp.float32)
    pos = jax.random.normal(k_pos, (SEQ, BATCH, D_MODEL), dtype=jnp.float32)
    params = init_params(k_param)

    packed = prepare_params(params)   # hoisted: built once, outside the forward path

    out = jax.block_until_ready(transformer_encoder(src, pos, packed))
    ref = jax.block_until_ready(ref_encoder(src, pos, params))

    assert out.shape == (SEQ, BATCH, D_MODEL)
    # Tolerance accounts for bf16 MXU inputs + approx reciprocal (fp32 reference).
    assert jnp.allclose(out, ref, atol=3e-2, rtol=3e-2), "mismatch vs reference"

    print("KERNEL_OK")
</pallas_src>

<mosaic_0001>
module attributes {stable_mosaic.version = 11 : i64} {
  func.func @fused_encoder_kernel(%arg0: memref<32x32xf32, #tpu.memory_space<vmem>>, %arg1: memref<32x32xf32, #tpu.memory_space<vmem>>, %arg2: memref<2x32x256xbf16, #tpu.memory_space<vmem>>, %arg3: memref<2x64x32xbf16, #tpu.memory_space<vmem>>, %arg4: memref<2x11x64xf32, #tpu.memory_space<vmem>>, %arg5: memref<32x32xf32, #tpu.memory_space<vmem>>) attributes {dimension_semantics = [], scalar_prefetch = 0 : i64, scratch_operands = 0 : i64, tpu.core_type = #tpu.core_type<tc>} {
    %c0 = arith.constant 0 : index
    %c0_0 = arith.constant 0 : index
    %0 = vector.load %arg0[%c0, %c0_0] : memref<32x32xf32, #tpu.memory_space<vmem>>, vector<32x32xf32>
    %c0_1 = arith.constant 0 : index
    %c0_2 = arith.constant 0 : index
    %1 = vector.load %arg1[%c0_1, %c0_2] : memref<32x32xf32, #tpu.memory_space<vmem>>, vector<32x32xf32>
    %2 = tpu.iota {dimensions = array<i32: 0>} : vector<32x32xi32>
    %3 = tpu.iota {dimensions = array<i32: 1>} : vector<32x32xi32>
    %c2_i32 = arith.constant 2 : i32
    %c0_i32 = arith.constant 0 : i32
    %4 = arith.cmpi eq, %c2_i32, %c0_i32 : i32
    %c1_i32 = arith.constant 1 : i32
    %5 = arith.select %4, %c1_i32, %c2_i32 : i32
    %6 = vector.broadcast %5 : i32 to vector<32x32xi32>
    %7 = arith.remsi %2, %6 : vector<32x32xi32>
    %c0_i32_3 = arith.constant 0 : i32
    %8 = vector.broadcast %c0_i32_3 : i32 to vector<32x32xi32>
    %9 = arith.cmpi ne, %7, %8 : vector<32x32xi32>
    %c0_i32_4 = arith.constant 0 : i32
    %10 = vector.broadcast %c0_i32_4 : i32 to vector<32x32xi32>
    %11 = arith.cmpi slt, %7, %10 : vector<32x32xi32>
    %c0_i32_5 = arith.constant 0 : i32
    %12 = arith.cmpi slt, %5, %c0_i32_5 : i32
    %13 = vector.broadcast %12 : i1 to vector<32x32xi1>
    %14 = vector.broadcast %13 : vector<32x32xi1> to vector<32x32xi1>
    %15 = arith.xori %11, %14 : vector<32x32xi1>
    %16 = arith.andi %15, %9 : vector<32x32xi1>
    %17 = vector.broadcast %5 : i32 to vector<32x32xi32>
    %18 = arith.addi %7, %17 : vector<32x32xi32>
    %19 = arith.select %16, %18, %7 : vector<32x32xi1>, vector<32x32xi32>
    %c2_i32_6 = arith.constant 2 : i32
    %c0_i32_7 = arith.constant 0 : i32
    %20 = arith.cmpi eq, %c2_i32_6, %c0_i32_7 : i32
    %c1_i32_8 = arith.constant 1 : i32
    %21 = arith.select %20, %c1_i32_8, %c2_i32_6 : i32
    %22 = vector.broadcast %21 : i32 to vector<32x32xi32>
    %23 = arith.remsi %3, %22 : vector<32x32xi32>
    %c0_i32_9 = arith.constant 0 : i32
    %24 = vector.broadcast %c0_i32_9 : i32 to vector<32x32xi32>
    %25 = arith.cmpi ne, %23, %24 : vector<32x32xi32>
    %c0_i32_10 = arith.constant 0 : i32
    %26 = vector.broadcast %c0_i32_10 : i32 to vector<32x32xi32>
    %27 = arith.cmpi slt, %23, %26 : vector<32x32xi32>
    %c0_i32_11 = arith.constant 0 : i32
    %28 = arith.cmpi slt, %21, %c0_i32_11 : i32
    %29 = vector.broadcast %28 : i1 to vector<32x32xi1>
    %30 = vector.broadcast %29 : vector<32x32xi1> to vector<32x32xi1>
    %31 = arith.xori %27, %30 : vector<32x32xi1>
    %32 = arith.andi %31, %25 : vector<32x32xi1>
    %33 = vector.broadcast %21 : i32 to vector<32x32xi32>
    %34 = arith.addi %23, %33 : vector<32x32xi32>
    %35 = arith.select %32, %34, %23 : vector<32x32xi1>, vector<32x32xi32>
    %36 = arith.cmpi eq, %19, %35 : vector<32x32xi32>
    %c0_12 = arith.constant 0 : index
    %c0_13 = arith.constant 0 : index
    %c0_14 = arith.constant 0 : index
    %37 = vector.load %arg2[%c0_12, %c0_13, %c0_14] : memref<2x32x256xbf16, #tpu.memory_space<vmem>>, vector<1x32x256xbf16>
    %38 = vector.shape_cast %37 : vector<1x32x256xbf16> to vector<32x256xbf16>
    %c0_15 = arith.constant 0 : index
    %c0_16 = arith.constant 0 : index
    %c0_17 = arith.constant 0 : index
    %39 = vector.load %arg3[%c0_15, %c0_16, %c0_17] : memref<2x64x32xbf16, #tpu.memory_space<vmem>>, vector<1x64x32xbf16>
    %40 = vector.shape_cast %39 : vector<1x64x32xbf16> to vector<64x32xbf16>
    %c0_18 = arith.constant 0 : index
    %c0_19 = arith.constant 0 : index
    %c0_20 = arith.constant 0 : index
    %41 = vector.load %arg4[%c0_18, %c0_19, %c0_20] : memref<2x11x64xf32, #tpu.memory_space<vmem>>, vector<1x11x64xf32>
    %42 = vector.shape_cast %41 : vector<1x11x64xf32> to vector<11x64xf32>
    %43 = vector.extract_strided_slice %38 {offsets = [0, 0], sizes = [32, 32], strides = [1, 1]} : vector<32x256xbf16> to vector<32x32xbf16>
    %44 = vector.extract_strided_slice %38 {offsets = [0, 32], sizes = [32, 32], strides = [1, 1]} : vector<32x256xbf16> to vector<32x32xbf16>
    %45 = vector.extract_strided_slice %38 {offsets = [0, 64], sizes = [32, 64], strides = [1, 1]} : vector<32x256xbf16> to vector<32x64xbf16>
    %46 = vector.extract_strided_slice %38 {offsets = [0, 128], sizes = [32, 32], strides = [1, 1]} : vector<32x256xbf16> to vector<32x32xbf16>
    %47 = vector.extract_strided_slice %38 {offsets = [0, 160], sizes = [32, 32], strides = [1, 1]} : vector<32x256xbf16> to vector<32x32xbf16>
    %48 = vector.extract_strided_slice %38 {offsets = [0, 192], sizes = [32, 64], strides = [1, 1]} : vector<32x256xbf16> to vector<32x64xbf16>
    %49 = vector.extract_strided_slice %42 {offsets = [0, 0], sizes = [1, 32], strides = [1, 1]} : vector<11x64xf32> to vector<1x32xf32>
    %50 = vector.extract_strided_slice %42 {offsets = [1, 0], sizes = [1, 32], strides = [1, 1]} : vector<11x64xf32> to vector<1x32xf32>
    %51 = vector.extract_strided_slice %42 {offsets = [2, 0], sizes = [1, 64], strides = [1, 1]} : vector<11x64xf32> to vector<1x64xf32>
    %52 = vector.extract_strided_slice %42 {offsets = [3, 0], sizes = [1, 32], strides = [1, 1]} : vector<11x64xf32> to vector<1x32xf32>
    %53 = vector.extract_strided_slice %42 {offsets = [4, 0], sizes = [1, 32], strides = [1, 1]} : vector<11x64xf32> to vector<1x32xf32>
    %54 = vector.extract_strided_slice %42 {offsets = [5, 0], sizes = [1, 64], strides = [1, 1]} : vector<11x64xf32> to vector<1x64xf32>
    %55 = vector.extract_strided_slice %42 {offsets = [6, 0], sizes = [1, 32], strides = [1, 1]} : vector<11x64xf32> to vector<1x32xf32>
    %56 = vector.extract_strided_slice %42 {offsets = [7, 0], sizes = [1, 32], strides = [1, 1]} : vector<11x64xf32> to vector<1x32xf32>
    %57 = vector.extract_strided_slice %42 {offsets = [8, 0], sizes = [1, 32], strides = [1, 1]} : vector<11x64xf32> to vector<1x32xf32>
    %58 = vector.extract_strided_slice %42 {offsets = [9, 0], sizes = [1, 32], strides = [1, 1]} : vector<11x64xf32> to vector<1x32xf32>
    %59 = vector.extract_strided_slice %42 {offsets = [10, 0], sizes = [1, 32], strides = [1, 1]} : vector<11x64xf32> to vector<1x32xf32>
    %60 = arith.truncf %0 : vector<32x32xf32> to vector<32x32xbf16>
    %cst = arith.constant dense<0.000000e+00> : vector<32x32xf32>
    %61 = tpu.matmul %60, %43, %cst {dimension_numbers = #tpu.dot_dimension_numbers<[1], [0], [0], [1], [0, 0, 1, 1], [], []>} : vector<32x32xbf16>, vector<32x32xbf16>, vector<32x32xf32> -> vector<32x32xf32>
    %62 = vector.broadcast %49 : vector<1x32xf32> to vector<32x32xf32>
    %63 = arith.addf %61, %62 : vector<32x32xf32>
    %cst_21 = arith.constant 0.000000e+00 : f32
    %64 = vector.broadcast %cst_21 : f32 to vector<32x32xf32>
    %65 = arith.maximumf %63, %64 : vector<32x32xf32>
    %66 = arith.truncf %65 : vector<32x32xf32> to vector<32x32xbf16>
    %cst_22 = arith.constant dense<0.000000e+00> : vector<32x32xf32>
    %67 = tpu.matmul %66, %44, %cst_22 {dimension_numbers = #tpu.dot_dimension_numbers<[1], [0], [0], [1], [0, 0, 1, 1], [], []>} : vector<32x32xbf16>, vector<32x32xbf16>, vector<32x32xf32> -> vector<32x32xf32>
    %68 = vector.broadcast %50 : vector<1x32xf32> to vector<32x32xf32>
    %69 = arith.addf %67, %68 : vector<32x32xf32>
    %70 = arith.mulf %1, %69 : vector<32x32xf32>
    %71 = arith.addf %0, %70 : vector<32x32xf32>
    %72 = arith.truncf %71 : vector<32x32xf32> to vector<32x32xbf16>
    %cst_23 = arith.constant dense<0.000000e+00> : vector<32x64xf32>
    %73 = tpu.matmul %72, %45, %cst_23 {dimension_numbers = #tpu.dot_dimension_numbers<[1], [0], [0], [1], [0, 0, 1, 1], [], []>} : vector<32x32xbf16>, vector<32x64xbf16>, vector<32x64xf32> -> vector<32x64xf32>
    %74 = vector.broadcast %51 : vector<1x64xf32> to vector<32x64xf32>
    %75 = arith.addf %73, %74 : vector<32x64xf32>
    %76 = vector.extract_strided_slice %75 {offsets = [0, 0], sizes = [32, 32], strides = [1, 1]} : vector<32x64xf32> to vector<32x32xf32>
    %77 = arith.truncf %76 : vector<32x32xf32> to vector<32x32xbf16>
    %78 = vector.extract_strided_slice %75 {offsets = [0, 32], sizes = [32, 32], strides = [1, 1]} : vector<32x64xf32> to vector<32x32xf32>
    %79 = arith.truncf %78 : vector<32x32xf32> to vector<32x32xbf16>
    %cst_24 = arith.constant dense<0.000000e+00> : vector<32x32xf32>
    %80 = tpu.matmul %60, %46, %cst_24 {dimension_numbers = #tpu.dot_dimension_numbers<[1], [0], [0], [1], [0, 0, 1, 1], [], []>} : vector<32x32xbf16>, vector<32x32xbf16>, vector<32x32xf32> -> vector<32x32xf32>
    %81 = vector.broadcast %52 : vector<1x32xf32> to vector<32x32xf32>
    %82 = arith.addf %80, %81 : vector<32x32xf32>
    %83 = arith.truncf %82 : vector<32x32xf32> to vector<32x32xbf16>
    %cst_25 = arith.constant 0.000000e+00 : f32
    %84 = vector.broadcast %cst_25 : f32 to vector<32x32xf32>
    %85 = vector.extract_strided_slice %77 {offsets = [0, 0], sizes = [32, 8], strides = [1, 1]} : vector<32x32xbf16> to vector<32x8xbf16>
    %86 = vector.extract_strided_slice %79 {offsets = [0, 0], sizes = [32, 8], strides = [1, 1]} : vector<32x32xbf16> to vector<32x8xbf16>
    %cst_26 = arith.constant dense<0.000000e+00> : vector<32x32xf32>
    %87 = tpu.matmul %85, %86, %cst_26 {dimension_numbers = #tpu.dot_dimension_numbers<[1], [1], [0], [0], [0, 0, 1, 0], [], []>} : vector<32x8xbf16>, vector<32x8xbf16>, vector<32x32xf32> -> vector<32x32xf32>
    %cst_27 = arith.constant -1.000000e+30 : f32
    %88 = vector.broadcast %cst_27 : f32 to vector<32x32xf32>
    %89 = arith.select %36, %87, %88 : vector<32x32xi1>, vector<32x32xf32>
    %cst_28 = arith.constant dense<0xFF800000> : vector<32xf32>
    %90 = vector.multi_reduction <maximumf>, %89, %cst_28 [1] : vector<32x32xf32> to vector<32xf32>
    %91 = vector.shape_cast %90 : vector<32xf32> to vector<32x1xf32>
    %92 = vector.broadcast %91 : vector<32x1xf32> to vector<32x32xf32>
    %93 = arith.subf %89, %92 : vector<32x32xf32>
    %94 = math.exp %93 : vector<32x32xf32>
    %cst_29 = arith.constant dense<0.000000e+00> : vector<32xf32>
    %95 = vector.multi_reduction <add>, %94, %cst_29 [1] : vector<32x32xf32> to vector<32xf32>
    %96 = vector.shape_cast %95 : vector<32xf32> to vector<32x1xf32>
    %97 = tpu.reciprocal %96 {approx = true} : vector<32x1xf32> -> vector<32x1xf32>
    %98 = vector.broadcast %97 : vector<32x1xf32> to vector<32x32xf32>
    %99 = arith.mulf %94, %98 : vector<32x32xf32>
    %100 = arith.truncf %99 : vector<32x32xf32> to vector<32x32xbf16>
    %101 = vector.extract_strided_slice %83 {offsets = [0, 0], sizes = [32, 8], strides = [1, 1]} : vector<32x32xbf16> to vector<32x8xbf16>
    %cst_30 = arith.constant dense<0.000000e+00> : vector<32x8xf32>
    %102 = tpu.matmul %100, %101, %cst_30 {dimension_numbers = #tpu.dot_dimension_numbers<[1], [0], [0], [1], [0, 0, 1, 1], [], []>} : vector<32x32xbf16>, vector<32x8xbf16>, vector<32x8xf32> -> vector<32x8xf32>
    %103 = arith.truncf %102 : vector<32x8xf32> to vector<32x8xbf16>
    %104 = vector.extract_strided_slice %47 {offsets = [0, 0], sizes = [8, 32], strides = [1, 1]} : vector<32x32xbf16> to vector<8x32xbf16>
    %cst_31 = arith.constant dense<0.000000e+00> : vector<32x32xf32>
    %105 = tpu.matmul %103, %104, %cst_31 {dimension_numbers = #tpu.dot_dimension_numbers<[1], [0], [0], [1], [0, 0, 1, 1], [], []>} : vector<32x8xbf16>, vector<8x32xbf16>, vector<32x32xf32> -> vector<32x32xf32>
    %106 = arith.addf %84, %105 : vector<32x32xf32>
    %107 = vector.extract_strided_slice %77 {offsets = [0, 8], sizes = [32, 8], strides = [1, 1]} : vector<32x32xbf16> to vector<32x8xbf16>
    %108 = vector.extract_strided_slice %79 {offsets = [0, 8], sizes = [32, 8], strides = [1, 1]} : vector<32x32xbf16> to vector<32x8xbf16>
    %cst_32 = arith.constant dense<0.000000e+00> : vector<32x32xf32>
    %109 = tpu.matmul %107, %108, %cst_32 {dimension_numbers = #tpu.dot_dimension_numbers<[1], [1], [0], [0], [0, 0, 1, 0], [], []>} : vector<32x8xbf16>, vector<32x8xbf16>, vector<32x32xf32> -> vector<32x32xf32>
    %cst_33 = arith.constant -1.000000e+30 : f32
    %110 = vector.broadcast %cst_33 : f32 to vector<32x32xf32>
    %111 = arith.select %36, %109, %110 : vector<32x32xi1>, vector<32x32xf32>
    %cst_34 = arith.constant dense<0xFF800000> : vector<32xf32>
    %112 = vector.multi_reduction <maximumf>, %111, %cst_34 [1] : vector<32x32xf32> to vector<32xf32>
    %113 = vector.shape_cast %112 : vector<32xf32> to vector<32x1xf32>
    %114 = vector.broadcast %113 : vector<32x1xf32> to vector<32x32xf32>
    %115 = arith.subf %111, %114 : vector<32x32xf32>
    %116 = math.exp %115 : vector<32x32xf32>
    %cst_35 = arith.constant dense<0.000000e+00> : vector<32xf32>
    %117 = vector.multi_reduction <add>, %116, %cst_35 [1] : vector<32x32xf32> to vector<32xf32>
    %118 = vector.shape_cast %117 : vector<32xf32> to vector<32x1xf32>
    %119 = tpu.reciprocal %118 {approx = true} : vector<32x1xf32> -> vector<32x1xf32>
    %120 = vector.broadcast %119 : vector<32x1xf32> to vector<32x32xf32>
    %121 = arith.mulf %116, %120 : vector<32x32xf32>
    %122 = arith.truncf %121 : vector<32x32xf32> to vector<32x32xbf16>
    %123 = vector.extract_strided_slice %83 {offsets = [0, 8], sizes = [32, 8], strides = [1, 1]} : vector<32x32xbf16> to vector<32x8xbf16>
    %cst_36 = arith.constant dense<0.000000e+00> : vector<32x8xf32>
    %124 = tpu.matmul %122, %123, %cst_36 {dimension_numbers = #tpu.dot_dimension_numbers<[1], [0], [0], [1], [0, 0, 1, 1], [], []>} : vector<32x32xbf16>, vector<32x8xbf16>, vector<32x8xf32> -> vector<32x8xf32>
    %125 = arith.truncf %124 : vector<32x8xf32> to vector<32x8xbf16>
    %126 = vector.extract_strided_slice %47 {offsets = [8, 0], sizes = [8, 32], strides = [1, 1]} : vector<32x32xbf16> to vector<8x32xbf16>
    %cst_37 = arith.constant dense<0.000000e+00> : vector<32x32xf32>
    %127 = tpu.matmul %125, %126, %cst_37 {dimension_numbers = #tpu.dot_dimension_numbers<[1], [0], [0], [1], [0, 0, 1, 1], [], []>} : vector<32x8xbf16>, vector<8x32xbf16>, vector<32x32xf32> -> vector<32x32xf32>
    %128 = arith.addf %106, %127 : vector<32x32xf32>
    %129 = vector.extract_strided_slice %77 {offsets = [0, 16], sizes = [32, 8], strides = [1, 1]} : vector<32x32xbf16> to vector<32x8xbf16>
    %130 = vector.extract_strided_slice %79 {offsets = [0, 16], sizes = [32, 8], strides = [1, 1]} : vector<32x32xbf16> to vector<32x8xbf16>
    %cst_38 = arith.constant dense<0.000000e+00> : vector<32x32xf32>
    %131 = tpu.matmul %129, %130, %cst_38 {dimension_numbers = #tpu.dot_dimension_numbers<[1], [1], [0], [0], [0, 0, 1, 0], [], []>} : vector<32x8xbf16>, vector<32x8xbf16>, vector<32x32xf32> -> vector<32x32xf32>
    %cst_39 = arith.constant -1.000000e+30 : f32
    %132 = vector.broadcast %cst_39 : f32 to vector<32x32xf32>
    %133 = arith.select %36, %131, %132 : vector<32x32xi1>, vector<32x32xf32>
    %cst_40 = arith.constant dense<0xFF800000> : vector<32xf32>
    %134 = vector.multi_reduction <maximumf>, %133, %cst_40 [1] : vector<32x32xf32> to vector<32xf32>
    %135 = vector.shape_cast %134 : vector<32xf32> to vector<32x1xf32>
    %136 = vector.broadcast %135 : vector<32x1xf32> to vector<32x32xf32>
    %137 = arith.subf %133, %136 : vector<32x32xf32>
    %138 = math.exp %137 : vector<32x32xf32>
    %cst_41 = arith.constant dense<0.000000e+00> : vector<32xf32>
    %139 = vector.multi_reduction <add>, %138, %cst_41 [1] : vector<32x32xf32> to vector<32xf32>
    %140 = vector.shape_cast %139 : vector<32xf32> to vector<32x1xf32>
    %141 = tpu.reciprocal %140 {approx = true} : vector<32x1xf32> -> vector<32x1xf32>
    %142 = vector.broadcast %141 : vector<32x1xf32> to vector<32x32xf32>
    %143 = arith.mulf %138, %142 : vector<32x32xf32>
    %144 = arith.truncf %143 : vector<32x32xf32> to vector<32x32xbf16>
    %145 = vector.extract_strided_slice %83 {offsets = [0, 16], sizes = [32, 8], strides = [1, 1]} : vector<32x32xbf16> to vector<32x8xbf16>
    %cst_42 = arith.constant dense<0.000000e+00> : vector<32x8xf32>
    %146 = tpu.matmul %144, %145, %cst_42 {dimension_numbers = #tpu.dot_dimension_numbers<[1], [0], [0], [1], [0, 0, 1, 1], [], []>} : vector<32x32xbf16>, vector<32x8xbf16>, vector<32x8xf32> -> vector<32x8xf32>
    %147 = arith.truncf %146 : vector<32x8xf32> to vector<32x8xbf16>
    %148 = vector.extract_strided_slice %47 {offsets = [16, 0], sizes = [8, 32], strides = [1, 1]} : vector<32x32xbf16> to vector<8x32xbf16>
    %cst_43 = arith.constant dense<0.000000e+00> : vector<32x32xf32>
    %149 = tpu.matmul %147, %148, %cst_43 {dimension_numbers = #tpu.dot_dimension_numbers<[1], [0], [0], [1], [0, 0, 1, 1], [], []>} : vector<32x8xbf16>, vector<8x32xbf16>, vector<32x32xf32> -> vector<32x32xf32>
    %150 = arith.addf %128, %149 : vector<32x32xf32>
    %151 = vector.extract_strided_slice %77 {offsets = [0, 24], sizes = [32, 8], strides = [1, 1]} : vector<32x32xbf16> to vector<32x8xbf16>
    %152 = vector.extract_strided_slice %79 {offsets = [0, 24], sizes = [32, 8], strides = [1, 1]} : vector<32x32xbf16> to vector<32x8xbf16>
    %cst_44 = arith.constant dense<0.000000e+00> : vector<32x32xf32>
    %153 = tpu.matmul %151, %152, %cst_44 {dimension_numbers = #tpu.dot_dimension_numbers<[1], [1], [0], [0], [0, 0, 1, 0], [], []>} : vector<32x8xbf16>, vector<32x8xbf16>, vector<32x32xf32> -> vector<32x32xf32>
    %cst_45 = arith.constant -1.000000e+30 : f32
    %154 = vector.broadcast %cst_45 : f32 to vector<32x32xf32>
    %155 = arith.select %36, %153, %154 : vector<32x32xi1>, vector<32x32xf32>
    %cst_46 = arith.constant dense<0xFF800000> : vector<32xf32>
    %156 = vector.multi_reduction <maximumf>, %155, %cst_46 [1] : vector<32x32xf32> to vector<32xf32>
    %157 = vector.shape_cast %156 : vector<32xf32> to vector<32x1xf32>
    %158 = vector.broadcast %157 : vector<32x1xf32> to vector<32x32xf32>
    %159 = arith.subf %155, %158 : vector<32x32xf32>
    %160 = math.exp %159 : vector<32x32xf32>
    %cst_47 = arith.constant dense<0.000000e+00> : vector<32xf32>
    %161 = vector.multi_reduction <add>, %160, %cst_47 [1] : vector<32x32xf32> to vector<32xf32>
    %162 = vector.shape_cast %161 : vector<32xf32> to vector<32x1xf32>
    %163 = tpu.reciprocal %162 {approx = true} : vector<32x1xf32> -> vector<32x1xf32>
    %164 = vector.broadcast %163 : vector<32x1xf32> to vector<32x32xf32>
    %165 = arith.mulf %160, %164 : vector<32x32xf32>
    %166 = arith.truncf %165 : vector<32x32xf32> to vector<32x32xbf16>
    %167 = vector.extract_strided_slice %83 {offsets = [0, 24], sizes = [32, 8], strides = [1, 1]} : vector<32x32xbf16> to vector<32x8xbf16>
    %cst_48 = arith.constant dense<0.000000e+00> : vector<32x8xf32>
    %168 = tpu.matmul %166, %167, %cst_48 {dimension_numbers = #tpu.dot_dimension_numbers<[1], [0], [0], [1], [0, 0, 1, 1], [], []>} : vector<32x32xbf16>, vector<32x8xbf16>, vector<32x8xf32> -> vector<32x8xf32>
    %169 = arith.truncf %168 : vector<32x8xf32> to vector<32x8xbf16>
    %170 = vector.extract_strided_slice %47 {offsets = [24, 0], sizes = [8, 32], strides = [1, 1]} : vector<32x32xbf16> to vector<8x32xbf16>
    %cst_49 = arith.constant dense<0.000000e+00> : vector<32x32xf32>
    %171 = tpu.matmul %169, %170, %cst_49 {dimension_numbers = #tpu.dot_dimension_numbers<[1], [0], [0], [1], [0, 0, 1, 1], [], []>} : vector<32x8xbf16>, vector<8x32xbf16>, vector<32x32xf32> -> vector<32x32xf32>
    %172 = arith.addf %150, %171 : vector<32x32xf32>
    %173 = vector.broadcast %53 : vector<1x32xf32> to vector<32x32xf32>
    %174 = arith.addf %172, %173 : vector<32x32xf32>
    %175 = arith.addf %0, %174 : vector<32x32xf32>
    %cst_50 = arith.constant dense<0.000000e+00> : vector<32xf32>
    %176 = vector.multi_reduction <add>, %175, %cst_50 [1] : vector<32x32xf32> to vector<32xf32>
    %177 = vector.shape_cast %176 : vector<32xf32> to vector<32x1xf32>
    %cst_51 = arith.constant 3.200000e+01 : f32
    %178 = vector.broadcast %cst_51 : f32 to vector<32x1xf32>
    %179 = arith.divf %177, %178 : vector<32x1xf32>
    %180 = vector.broadcast %179 : vector<32x1xf32> to vector<32x32xf32>
    %181 = arith.subf %175, %180 : vector<32x32xf32>
    %182 = arith.mulf %181, %181 : vector<32x32xf32>
    %cst_52 = arith.constant dense<0.000000e+00> : vector<32xf32>
    %183 = vector.multi_reduction <add>, %182, %cst_52 [1] : vector<32x32xf32> to vector<32xf32>
    %184 = vector.shape_cast %183 : vector<32xf32> to vector<32x1xf32>
    %cst_53 = arith.constant 3.200000e+01 : f32
    %185 = vector.broadcast %cst_53 : f32 to vector<32x1xf32>
    %186 = arith.divf %184, %185 : vector<32x1xf32>
    %187 = vector.broadcast %179 : vector<32x1xf32> to vector<32x32xf32>
    %188 = arith.subf %175, %187 : vector<32x32xf32>
    %cst_54 = arith.constant 9.99999974E-6 : f32
    %189 = vector.broadcast %cst_54 : f32 to vector<32x1xf32>
    %190 = arith.addf %186, %189 : vector<32x1xf32>
    %191 = math.rsqrt %190 : vector<32x1xf32>
    %192 = vector.broadcast %191 : vector<32x1xf32> to vector<32x32xf32>
    %193 = arith.mulf %188, %192 : vector<32x32xf32>
    %194 = vector.broadcast %56 : vector<1x32xf32> to vector<32x32xf32>
    %195 = arith.mulf %193, %194 : vector<32x32xf32>
    %196 = vector.broadcast %57 : vector<1x32xf32> to vector<32x32xf32>
    %197 = arith.addf %195, %196 : vector<32x32xf32>
    %198 = arith.truncf %197 : vector<32x32xf32> to vector<32x32xbf16>
    %cst_55 = arith.constant dense<0.000000e+00> : vector<32x64xf32>
    %199 = tpu.matmul %198, %48, %cst_55 {dimension_numbers = #tpu.dot_dimension_numbers<[1], [0], [0], [1], [0, 0, 1, 1], [], []>} : vector<32x32xbf16>, vector<32x64xbf16>, vector<32x64xf32> -> vector<32x64xf32>
    %200 = vector.broadcast %54 : vector<1x64xf32> to vector<32x64xf32>
    %201 = arith.addf %199, %200 : vector<32x64xf32>
    %cst_56 = arith.constant 0.000000e+00 : f32
    %202 = vector.broadcast %cst_56 : f32 to vector<32x64xf32>
    %203 = arith.maximumf %201, %202 : vector<32x64xf32>
    %204 = arith.truncf %203 : vector<32x64xf32> to vector<32x64xbf16>
    %cst_57 = arith.constant dense<0.000000e+00> : vector<32x32xf32>
    %205 = tpu.matmul %204, %40, %cst_57 {dimension_numbers = #tpu.dot_dimension_numbers<[1], [0], [0], [1], [0, 0, 1, 1], [], []>} : vector<32x64xbf16>, vector<64x32xbf16>, vector<32x32xf32> -> vector<32x32xf32>
    %206 = vector.broadcast %55 : vector<1x32xf32> to vector<32x32xf32>
    %207 = arith.addf %205, %206 : vector<32x32xf32>
    %208 = arith.addf %197, %207 : vector<32x32xf32>
    %cst_58 = arith.constant dense<0.000000e+00> : vector<32xf32>
    %209 = vector.multi_reduction <add>, %208, %cst_58 [1] : vector<32x32xf32> to vector<32xf32>
    %210 = vector.shape_cast %209 : vector<32xf32> to vector<32x1xf32>
    %cst_59 = arith.constant 3.200000e+01 : f32
    %211 = vector.broadcast %cst_59 : f32 to vector<32x1xf32>
    %212 = arith.divf %210, %211 : vector<32x1xf32>
    %213 = vector.broadcast %212 : vector<32x1xf32> to vector<32x32xf32>
    %214 = arith.subf %208, %213 : vector<32x32xf32>
    %215 = arith.mulf %214, %214 : vector<32x32xf32>
    %cst_60 = arith.constant dense<0.000000e+00> : vector<32xf32>
    %216 = vector.multi_reduction <add>, %215, %cst_60 [1] : vector<32x32xf32> to vector<32xf32>
    %217 = vector.shape_cast %216 : vector<32xf32> to vector<32x1xf32>
    %cst_61 = arith.constant 3.200000e+01 : f32
    %218 = vector.broadcast %cst_61 : f32 to vector<32x1xf32>
    %219 = arith.divf %217, %218 : vector<32x1xf32>
    %220 = vector.broadcast %212 : vector<32x1xf32> to vector<32x32xf32>
    %221 = arith.subf %208, %220 : vector<32x32xf32>
    %cst_62 = arith.constant 9.99999974E-6 : f32
    %222 = vector.broadcast %cst_62 : f32 to vector<32x1xf32>
    %223 = arith.addf %219, %222 : vector<32x1xf32>
    %224 = math.rsqrt %223 : vector<32x1xf32>
    %225 = vector.broadcast %224 : vector<32x1xf32> to vector<32x32xf32>
    %226 = arith.mulf %221, %225 : vector<32x32xf32>
    %227 = vector.broadcast %58 : vector<1x32xf32> to vector<32x32xf32>
    %228 = arith.mulf %226, %227 : vector<32x32xf32>
    %229 = vector.broadcast %59 : vector<1x32xf32> to vector<32x32xf32>
    %230 = arith.addf %228, %229 : vector<32x32xf32>
    %c1 = arith.constant 1 : index
    %c0_63 = arith.constant 0 : index
    %c0_64 = arith.constant 0 : index
    %231 = vector.load %arg2[%c1, %c0_63, %c0_64] : memref<2x32x256xbf16, #tpu.memory_space<vmem>>, vector<1x32x256xbf16>
    %232 = vector.shape_cast %231 : vector<1x32x256xbf16> to vector<32x256xbf16>
    %c1_65 = arith.constant 1 : index
    %c0_66 = arith.constant 0 : index
    %c0_67 = arith.constant 0 : index
    %233 = vector.load %arg3[%c1_65, %c0_66, %c0_67] : memref<2x64x32xbf16, #tpu.memory_space<vmem>>, vector<1x64x32xbf16>
    %234 = vector.shape_cast %233 : vector<1x64x32xbf16> to vector<64x32xbf16>
    %c1_68 = arith.constant 1 : index
    %c0_69 = arith.constant 0 : index
    %c0_70 = arith.constant 0 : index
    %235 = vector.load %arg4[%c1_68, %c0_69, %c0_70] : memref<2x11x64xf32, #tpu.memory_space<vmem>>, vector<1x11x64xf32>
    %236 = vector.shape_cast %235 : vector<1x11x64xf32> to vector<11x64xf32>
    %237 = vector.extract_strided_slice %232 {offsets = [0, 0], sizes = [32, 32], strides = [1, 1]} : vector<32x256xbf16> to vector<32x32xbf16>
    %238 = vector.extract_strided_slice %232 {offsets = [0, 32], sizes = [32, 32], strides = [1, 1]} : vector<32x256xbf16> to vector<32x32xbf16>
    %239 = vector.extract_strided_slice %232 {offsets = [0, 64], sizes = [32, 64], strides = [1, 1]} : vector<32x256xbf16> to vector<32x64xbf16>
    %240 = vector.extract_strided_slice %232 {offsets = [0, 128], sizes = [32, 32], strides = [1, 1]} : vector<32x256xbf16> to vector<32x32xbf16>
    %241 = vector.extract_strided_slice %232 {offsets = [0, 160], sizes = [32, 32], strides = [1, 1]} : vector<32x256xbf16> to vector<32x32xbf16>
    %242 = vector.extract_strided_slice %232 {offsets = [0, 192], sizes = [32, 64], strides = [1, 1]} : vector<32x256xbf16> to vector<32x64xbf16>
    %243 = vector.extract_strided_slice %236 {offsets = [0, 0], sizes = [1, 32], strides = [1, 1]} : vector<11x64xf32> to vector<1x32xf32>
    %244 = vector.extract_strided_slice %236 {offsets = [1, 0], sizes = [1, 32], strides = [1, 1]} : vector<11x64xf32> to vector<1x32xf32>
    %245 = vector.extract_strided_slice %236 {offsets = [2, 0], sizes = [1, 64], strides = [1, 1]} : vector<11x64xf32> to vector<1x64xf32>
    %246 = vector.extract_strided_slice %236 {offsets = [3, 0], sizes = [1, 32], strides = [1, 1]} : vector<11x64xf32> to vector<1x32xf32>
    %247 = vector.extract_strided_slice %236 {offsets = [4, 0], sizes = [1, 32], strides = [1, 1]} : vector<11x64xf32> to vector<1x32xf32>
    %248 = vector.extract_strided_slice %236 {offsets = [5, 0], sizes = [1, 64], strides = [1, 1]} : vector<11x64xf32> to vector<1x64xf32>
    %249 = vector.extract_strided_slice %236 {offsets = [6, 0], sizes = [1, 32], strides = [1, 1]} : vector<11x64xf32> to vector<1x32xf32>
    %250 = vector.extract_strided_slice %236 {offsets = [7, 0], sizes = [1, 32], strides = [1, 1]} : vector<11x64xf32> to vector<1x32xf32>
    %251 = vector.extract_strided_slice %236 {offsets = [8, 0], sizes = [1, 32], strides = [1, 1]} : vector<11x64xf32> to vector<1x32xf32>
    %252 = vector.extract_strided_slice %236 {offsets = [9, 0], sizes = [1, 32], strides = [1, 1]} : vector<11x64xf32> to vector<1x32xf32>
    %253 = vector.extract_strided_slice %236 {offsets = [10, 0], sizes = [1, 32], strides = [1, 1]} : vector<11x64xf32> to vector<1x32xf32>
    %254 = arith.truncf %230 : vector<32x32xf32> to vector<32x32xbf16>
    %cst_71 = arith.constant dense<0.000000e+00> : vector<32x32xf32>
    %255 = tpu.matmul %254, %237, %cst_71 {dimension_numbers = #tpu.dot_dimension_numbers<[1], [0], [0], [1], [0, 0, 1, 1], [], []>} : vector<32x32xbf16>, vector<32x32xbf16>, vector<32x32xf32> -> vector<32x32xf32>
    %256 = vector.broadcast %243 : vector<1x32xf32> to vector<32x32xf32>
    %257 = arith.addf %255, %256 : vector<32x32xf32>
    %cst_72 = arith.constant 0.000000e+00 : f32
    %258 = vector.broadcast %cst_72 : f32 to vector<32x32xf32>
    %259 = arith.maximumf %257, %258 : vector<32x32xf32>
    %260 = arith.truncf %259 : vector<32x32xf32> to vector<32x32xbf16>
    %cst_73 = arith.constant dense<0.000000e+00> : vector<32x32xf32>
    %261 = tpu.matmul %260, %238, %cst_73 {dimension_numbers = #tpu.dot_dimension_numbers<[1], [0], [0], [1], [0, 0, 1, 1], [], []>} : vector<32x32xbf16>, vector<32x32xbf16>, vector<32x32xf32> -> vector<32x32xf32>
    %262 = vector.broadcast %244 : vector<1x32xf32> to vector<32x32xf32>
    %263 = arith.addf %261, %262 : vector<32x32xf32>
    %264 = arith.mulf %1, %263 : vector<32x32xf32>
    %265 = arith.addf %230, %264 : vector<32x32xf32>
    %266 = arith.truncf %265 : vector<32x32xf32> to vector<32x32xbf16>
    %cst_74 = arith.constant dense<0.000000e+00> : vector<32x64xf32>
    %267 = tpu.matmul %266, %239, %cst_74 {dimension_numbers = #tpu.dot_dimension_numbers<[1], [0], [0], [1], [0, 0, 1, 1], [], []>} : vector<32x32xbf16>, vector<32x64xbf16>, vector<32x64xf32> -> vector<32x64xf32>
    %268 = vector.broadcast %245 : vector<1x64xf32> to vector<32x64xf32>
    %269 = arith.addf %267, %268 : vector<32x64xf32>
    %270 = vector.extract_strided_slice %269 {offsets = [0, 0], sizes = [32, 32], strides = [1, 1]} : vector<32x64xf32> to vector<32x32xf32>
    %271 = arith.truncf %270 : vector<32x32xf32> to vector<32x32xbf16>
    %272 = vector.extract_strided_slice %269 {offsets = [0, 32], sizes = [32, 32], strides = [1, 1]} : vector<32x64xf32> to vector<32x32xf32>
    %273 = arith.truncf %272 : vector<32x32xf32> to vector<32x32xbf16>
    %cst_75 = arith.constant dense<0.000000e+00> : vector<32x32xf32>
    %274 = tpu.matmul %254, %240, %cst_75 {dimension_numbers = #tpu.dot_dimension_numbers<[1], [0], [0], [1], [0, 0, 1, 1], [], []>} : vector<32x32xbf16>, vector<32x32xbf16>, vector<32x32xf32> -> vector<32x32xf32>
    %275 = vector.broadcast %246 : vector<1x32xf32> to vector<32x32xf32>
    %276 = arith.addf %274, %275 : vector<32x32xf32>
    %277 = arith.truncf %276 : vector<32x32xf32> to vector<32x32xbf16>
    %cst_76 = arith.constant 0.000000e+00 : f32
    %278 = vector.broadcast %cst_76 : f32 to vector<32x32xf32>
    %279 = vector.extract_strided_slice %271 {offsets = [0, 0], sizes = [32, 8], strides = [1, 1]} : vector<32x32xbf16> to vector<32x8xbf16>
    %280 = vector.extract_strided_slice %273 {offsets = [0, 0], sizes = [32, 8], strides = [1, 1]} : vector<32x32xbf16> to vector<32x8xbf16>
    %cst_77 = arith.constant dense<0.000000e+00> : vector<32x32xf32>
    %281 = tpu.matmul %279, %280, %cst_77 {dimension_numbers = #tpu.dot_dimension_numbers<[1], [1], [0], [0], [0, 0, 1, 0], [], []>} : vector<32x8xbf16>, vector<32x8xbf16>, vector<32x32xf32> -> vector<32x32xf32>
    %cst_78 = arith.constant -1.000000e+30 : f32
    %282 = vector.broadcast %cst_78 : f32 to vector<32x32xf32>
    %283 = arith.select %36, %281, %282 : vector<32x32xi1>, vector<32x32xf32>
    %cst_79 = arith.constant dense<0xFF800000> : vector<32xf32>
    %284 = vector.multi_reduction <maximumf>, %283, %cst_79 [1] : vector<32x32xf32> to vector<32xf32>
    %285 = vector.shape_cast %284 : vector<32xf32> to vector<32x1xf32>
    %286 = vector.broadcast %285 : vector<32x1xf32> to vector<32x32xf32>
    %287 = arith.subf %283, %286 : vector<32x32xf32>
    %288 = math.exp %287 : vector<32x32xf32>
    %cst_80 = arith.constant dense<0.000000e+00> : vector<32xf32>
    %289 = vector.multi_reduction <add>, %288, %cst_80 [1] : vector<32x32xf32> to vector<32xf32>
    %290 = vector.shape_cast %289 : vector<32xf32> to vector<32x1xf32>
    %291 = tpu.reciprocal %290 {approx = true} : vector<32x1xf32> -> vector<32x1xf32>
    %292 = vector.broadcast %291 : vector<32x1xf32> to vector<32x32xf32>
    %293 = arith.mulf %288, %292 : vector<32x32xf32>
    %294 = arith.truncf %293 : vector<32x32xf32> to vector<32x32xbf16>
    %295 = vector.extract_strided_slice %277 {offsets = [0, 0], sizes = [32, 8], strides = [1, 1]} : vector<32x32xbf16> to vector<32x8xbf16>
    %cst_81 = arith.constant dense<0.000000e+00> : vector<32x8xf32>
    %296 = tpu.matmul %294, %295, %cst_81 {dimension_numbers = #tpu.dot_dimension_numbers<[1], [0], [0], [1], [0, 0, 1, 1], [], []>} : vector<32x32xbf16>, vector<32x8xbf16>, vector<32x8xf32> -> vector<32x8xf32>
    %297 = arith.truncf %296 : vector<32x8xf32> to vector<32x8xbf16>
    %298 = vector.extract_strided_slice %241 {offsets = [0, 0], sizes = [8, 32], strides = [1, 1]} : vector<32x32xbf16> to vector<8x32xbf16>
    %cst_82 = arith.constant dense<0.000000e+00> : vector<32x32xf32>
    %299 = tpu.matmul %297, %298, %cst_82 {dimension_numbers = #tpu.dot_dimension_numbers<[1], [0], [0], [1], [0, 0, 1, 1], [], []>} : vector<32x8xbf16>, vector<8x32xbf16>, vector<32x32xf32> -> vector<32x32xf32>
    %300 = arith.addf %278, %299 : vector<32x32xf32>
    %301 = vector.extract_strided_slice %271 {offsets = [0, 8], sizes = [32, 8], strides = [1, 1]} : vector<32x32xbf16> to vector<32x8xbf16>
    %302 = vector.extract_strided_slice %273 {offsets = [0, 8], sizes = [32, 8], strides = [1, 1]} : vector<32x32xbf16> to vector<32x8xbf16>
    %cst_83 = arith.constant dense<0.000000e+00> : vector<32x32xf32>
    %303 = tpu.matmul %301, %302, %cst_83 {dimension_numbers = #tpu.dot_dimension_numbers<[1], [1], [0], [0], [0, 0, 1, 0], [], []>} : vector<32x8xbf16>, vector<32x8xbf16>, vector<32x32xf32> -> vector<32x32xf32>
    %cst_84 = arith.constant -1.000000e+30 : f32
    %304 = vector.broadcast %cst_84 : f32 to vector<32x32xf32>
    %305 = arith.select %36, %303, %304 : vector<32x32xi1>, vector<32x32xf32>
    %cst_85 = arith.constant dense<0xFF800000> : vector<32xf32>
    %306 = vector.multi_reduction <maximumf>, %305, %cst_85 [1] : vector<32x32xf32> to vector<32xf32>
    %307 = vector.shape_cast %306 : vector<32xf32> to vector<32x1xf32>
    %308 = vector.broadcast %307 : vector<32x1xf32> to vector<32x32xf32>
    %309 = arith.subf %305, %308 : vector<32x32xf32>
    %310 = math.exp %309 : vector<32x32xf32>
    %cst_86 = arith.constant dense<0.000000e+00> : vector<32xf32>
    %311 = vector.multi_reduction <add>, %310, %cst_86 [1] : vector<32x32xf32> to vector<32xf32>
    %312 = vector.shape_cast %311 : vector<32xf32> to vector<32x1xf32>
    %313 = tpu.reciprocal %312 {approx = true} : vector<32x1xf32> -> vector<32x1xf32>
    %314 = vector.broadcast %313 : vector<32x1xf32> to vector<32x32xf32>
    %315 = arith.mulf %310, %314 : vector<32x32xf32>
    %316 = arith.truncf %315 : vector<32x32xf32> to vector<32x32xbf16>
    %317 = vector.extract_strided_slice %277 {offsets = [0, 8], sizes = [32, 8], strides = [1, 1]} : vector<32x32xbf16> to vector<32x8xbf16>
    %cst_87 = arith.constant dense<0.000000e+00> : vector<32x8xf32>
    %318 = tpu.matmul %316, %317, %cst_87 {dimension_numbers = #tpu.dot_dimension_numbers<[1], [0], [0], [1], [0, 0, 1, 1], [], []>} : vector<32x32xbf16>, vector<32x8xbf16>, vector<32x8xf32> -> vector<32x8xf32>
    %319 = arith.truncf %318 : vector<32x8xf32> to vector<32x8xbf16>
    %320 = vector.extract_strided_slice %241 {offsets = [8, 0], sizes = [8, 32], strides = [1, 1]} : vector<32x32xbf16> to vector<8x32xbf16>
    %cst_88 = arith.constant dense<0.000000e+00> : vector<32x32xf32>
    %321 = tpu.matmul %319, %320, %cst_88 {dimension_numbers = #tpu.dot_dimension_numbers<[1], [0], [0], [1], [0, 0, 1, 1], [], []>} : vector<32x8xbf16>, vector<8x32xbf16>, vector<32x32xf32> -> vector<32x32xf32>
    %322 = arith.addf %300, %321 : vector<32x32xf32>
    %323 = vector.extract_strided_slice %271 {offsets = [0, 16], sizes = [32, 8], strides = [1, 1]} : vector<32x32xbf16> to vector<32x8xbf16>
    %324 = vector.extract_strided_slice %273 {offsets = [0, 16], sizes = [32, 8], strides = [1, 1]} : vector<32x32xbf16> to vector<32x8xbf16>
    %cst_89 = arith.constant dense<0.000000e+00> : vector<32x32xf32>
    %325 = tpu.matmul %323, %324, %cst_89 {dimension_numbers = #tpu.dot_dimension_numbers<[1], [1], [0], [0], [0, 0, 1, 0], [], []>} : vector<32x8xbf16>, vector<32x8xbf16>, vector<32x32xf32> -> vector<32x32xf32>
    %cst_90 = arith.constant -1.000000e+30 : f32
    %326 = vector.broadcast %cst_90 : f32 to vector<32x32xf32>
    %327 = arith.select %36, %325, %326 : vector<32x32xi1>, vector<32x32xf32>
    %cst_91 = arith.constant dense<0xFF800000> : vector<32xf32>
    %328 = vector.multi_reduction <maximumf>, %327, %cst_91 [1] : vector<32x32xf32> to vector<32xf32>
    %329 = vector.shape_cast %328 : vector<32xf32> to vector<32x1xf32>
    %330 = vector.broadcast %329 : vector<32x1xf32> to vector<32x32xf32>
    %331 = arith.subf %327, %330 : vector<32x32xf32>
    %332 = math.exp %331 : vector<32x32xf32>
    %cst_92 = arith.constant dense<0.000000e+00> : vector<32xf32>
    %333 = vector.multi_reduction <add>, %332, %cst_92 [1] : vector<32x32xf32> to vector<32xf32>
    %334 = vector.shape_cast %333 : vector<32xf32> to vector<32x1xf32>
    %335 = tpu.reciprocal %334 {approx = true} : vector<32x1xf32> -> vector<32x1xf32>
    %336 = vector.broadcast %335 : vector<32x1xf32> to vector<32x32xf32>
    %337 = arith.mulf %332, %336 : vector<32x32xf32>
    %338 = arith.truncf %337 : vector<32x32xf32> to vector<32x32xbf16>
    %339 = vector.extract_strided_slice %277 {offsets = [0, 16], sizes = [32, 8], strides = [1, 1]} : vector<32x32xbf16> to vector<32x8xbf16>
    %cst_93 = arith.constant dense<0.000000e+00> : vector<32x8xf32>
    %340 = tpu.matmul %338, %339, %cst_93 {dimension_numbers = #tpu.dot_dimension_numbers<[1], [0], [0], [1], [0, 0, 1, 1], [], []>} : vector<32x32xbf16>, vector<32x8xbf16>, vector<32x8xf32> -> vector<32x8xf32>
    %341 = arith.truncf %340 : vector<32x8xf32> to vector<32x8xbf16>
    %342 = vector.extract_strided_slice %241 {offsets = [16, 0], sizes = [8, 32], strides = [1, 1]} : vector<32x32xbf16> to vector<8x32xbf16>
    %cst_94 = arith.constant dense<0.000000e+00> : vector<32x32xf32>
    %343 = tpu.matmul %341, %342, %cst_94 {dimension_numbers = #tpu.dot_dimension_numbers<[1], [0], [0], [1], [0, 0, 1, 1], [], []>} : vector<32x8xbf16>, vector<8x32xbf16>, vector<32x32xf32> -> vector<32x32xf32>
    %344 = arith.addf %322, %343 : vector<32x32xf32>
    %345 = vector.extract_strided_slice %271 {offsets = [0, 24], sizes = [32, 8], strides = [1, 1]} : vector<32x32xbf16> to vector<32x8xbf16>
    %346 = vector.extract_strided_slice %273 {offsets = [0, 24], sizes = [32, 8], strides = [1, 1]} : vector<32x32xbf16> to vector<32x8xbf16>
    %cst_95 = arith.constant dense<0.000000e+00> : vector<32x32xf32>
    %347 = tpu.matmul %345, %346, %cst_95 {dimension_numbers = #tpu.dot_dimension_numbers<[1], [1], [0], [0], [0, 0, 1, 0], [], []>} : vector<32x8xbf16>, vector<32x8xbf16>, vector<32x32xf32> -> vector<32x32xf32>
    %cst_96 = arith.constant -1.000000e+30 : f32
    %348 = vector.broadcast %cst_96 : f32 to vector<32x32xf32>
    %349 = arith.select %36, %347, %348 : vector<32x32xi1>, vector<32x32xf32>
    %cst_97 = arith.constant dense<0xFF800000> : vector<32xf32>
    %350 = vector.multi_reduction <maximumf>, %349, %cst_97 [1] : vector<32x32xf32> to vector<32xf32>
    %351 = vector.shape_cast %350 : vector<32xf32> to vector<32x1xf32>
    %352 = vector.broadcast %351 : vector<32x1xf32> to vector<32x32xf32>
    %353 = arith.subf %349, %352 : vector<32x32xf32>
    %354 = math.exp %353 : vector<32x32xf32>
    %cst_98 = arith.constant dense<0.000000e+00> : vector<32xf32>
    %355 = vector.multi_reduction <add>, %354, %cst_98 [1] : vector<32x32xf32> to vector<32xf32>
    %356 = vector.shape_cast %355 : vector<32xf32> to vector<32x1xf32>
    %357 = tpu.reciprocal %356 {approx = true} : vector<32x1xf32> -> vector<32x1xf32>
    %358 = vector.broadcast %357 : vector<32x1xf32> to vector<32x32xf32>
    %359 = arith.mulf %354, %358 : vector<32x32xf32>
    %360 = arith.truncf %359 : vector<32x32xf32> to vector<32x32xbf16>
    %361 = vector.extract_strided_slice %277 {offsets = [0, 24], sizes = [32, 8], strides = [1, 1]} : vector<32x32xbf16> to vector<32x8xbf16>
    %cst_99 = arith.constant dense<0.000000e+00> : vector<32x8xf32>
    %362 = tpu.matmul %360, %361, %cst_99 {dimension_numbers = #tpu.dot_dimension_numbers<[1], [0], [0], [1], [0, 0, 1, 1], [], []>} : vector<32x32xbf16>, vector<32x8xbf16>, vector<32x8xf32> -> vector<32x8xf32>
    %363 = arith.truncf %362 : vector<32x8xf32> to vector<32x8xbf16>
    %364 = vector.extract_strided_slice %241 {offsets = [24, 0], sizes = [8, 32], strides = [1, 1]} : vector<32x32xbf16> to vector<8x32xbf16>
    %cst_100 = arith.constant dense<0.000000e+00> : vector<32x32xf32>
    %365 = tpu.matmul %363, %364, %cst_100 {dimension_numbers = #tpu.dot_dimension_numbers<[1], [0], [0], [1], [0, 0, 1, 1], [], []>} : vector<32x8xbf16>, vector<8x32xbf16>, vector<32x32xf32> -> vector<32x32xf32>
    %366 = arith.addf %344, %365 : vector<32x32xf32>
    %367 = vector.broadcast %247 : vector<1x32xf32> to vector<32x32xf32>
    %368 = arith.addf %366, %367 : vector<32x32xf32>
    %369 = arith.addf %230, %368 : vector<32x32xf32>
    %cst_101 = arith.constant dense<0.000000e+00> : vector<32xf32>
    %370 = vector.multi_reduction <add>, %369, %cst_101 [1] : vector<32x32xf32> to vector<32xf32>
    %371 = vector.shape_cast %370 : vector<32xf32> to vector<32x1xf32>
    %cst_102 = arith.constant 3.200000e+01 : f32
    %372 = vector.broadcast %cst_102 : f32 to vector<32x1xf32>
    %373 = arith.divf %371, %372 : vector<32x1xf32>
    %374 = vector.broadcast %373 : vector<32x1xf32> to vector<32x32xf32>
    %375 = arith.subf %369, %374 : vector<32x32xf32>
    %376 = arith.mulf %375, %375 : vector<32x32xf32>
    %cst_103 = arith.constant dense<0.000000e+00> : vector<32xf32>
    %377 = vector.multi_reduction <add>, %376, %cst_103 [1] : vector<32x32xf32> to vector<32xf32>
    %378 = vector.shape_cast %377 : vector<32xf32> to vector<32x1xf32>
    %cst_104 = arith.constant 3.200000e+01 : f32
    %379 = vector.broadcast %cst_104 : f32 to vector<32x1xf32>
    %380 = arith.divf %378, %379 : vector<32x1xf32>
    %381 = vector.broadcast %373 : vector<32x1xf32> to vector<32x32xf32>
    %382 = arith.subf %369, %381 : vector<32x32xf32>
    %cst_105 = arith.constant 9.99999974E-6 : f32
    %383 = vector.broadcast %cst_105 : f32 to vector<32x1xf32>
    %384 = arith.addf %380, %383 : vector<32x1xf32>
    %385 = math.rsqrt %384 : vector<32x1xf32>
    %386 = vector.broadcast %385 : vector<32x1xf32> to vector<32x32xf32>
    %387 = arith.mulf %382, %386 : vector<32x32xf32>
    %388 = vector.broadcast %250 : vector<1x32xf32> to vector<32x32xf32>
    %389 = arith.mulf %387, %388 : vector<32x32xf32>
    %390 = vector.broadcast %251 : vector<1x32xf32> to vector<32x32xf32>
    %391 = arith.addf %389, %390 : vector<32x32xf32>
    %392 = arith.truncf %391 : vector<32x32xf32> to vector<32x32xbf16>
    %cst_106 = arith.constant dense<0.000000e+00> : vector<32x64xf32>
    %393 = tpu.matmul %392, %242, %cst_106 {dimension_numbers = #tpu.dot_dimension_numbers<[1], [0], [0], [1], [0, 0, 1, 1], [], []>} : vector<32x32xbf16>, vector<32x64xbf16>, vector<32x64xf32> -> vector<32x64xf32>
    %394 = vector.broadcast %248 : vector<1x64xf32> to vector<32x64xf32>
    %395 = arith.addf %393, %394 : vector<32x64xf32>
    %cst_107 = arith.constant 0.000000e+00 : f32
    %396 = vector.broadcast %cst_107 : f32 to vector<32x64xf32>
    %397 = arith.maximumf %395, %396 : vector<32x64xf32>
    %398 = arith.truncf %397 : vector<32x64xf32> to vector<32x64xbf16>
    %cst_108 = arith.constant dense<0.000000e+00> : vector<32x32xf32>
    %399 = tpu.matmul %398, %234, %cst_108 {dimension_numbers = #tpu.dot_dimension_numbers<[1], [0], [0], [1], [0, 0, 1, 1], [], []>} : vector<32x64xbf16>, vector<64x32xbf16>, vector<32x32xf32> -> vector<32x32xf32>
    %400 = vector.broadcast %249 : vector<1x32xf32> to vector<32x32xf32>
    %401 = arith.addf %399, %400 : vector<32x32xf32>
    %402 = arith.addf %391, %401 : vector<32x32xf32>
    %cst_109 = arith.constant dense<0.000000e+00> : vector<32xf32>
    %403 = vector.multi_reduction <add>, %402, %cst_109 [1] : vector<32x32xf32> to vector<32xf32>
    %404 = vector.shape_cast %403 : vector<32xf32> to vector<32x1xf32>
    %cst_110 = arith.constant 3.200000e+01 : f32
    %405 = vector.broadcast %cst_110 : f32 to vector<32x1xf32>
    %406 = arith.divf %404, %405 : vector<32x1xf32>
    %407 = vector.broadcast %406 : vector<32x1xf32> to vector<32x32xf32>
    %408 = arith.subf %402, %407 : vector<32x32xf32>
    %409 = arith.mulf %408, %408 : vector<32x32xf32>
    %cst_111 = arith.constant dense<0.000000e+00> : vector<32xf32>
    %410 = vector.multi_reduction <add>, %409, %cst_111 [1] : vector<32x32xf32> to vector<32xf32>
    %411 = vector.shape_cast %410 : vector<32xf32> to vector<32x1xf32>
    %cst_112 = arith.constant 3.200000e+01 : f32
    %412 = vector.broadcast %cst_112 : f32 to vector<32x1xf32>
    %413 = arith.divf %411, %412 : vector<32x1xf32>
    %414 = vector.broadcast %406 : vector<32x1xf32> to vector<32x32xf32>
    %415 = arith.subf %402, %414 : vector<32x32xf32>
    %cst_113 = arith.constant 9.99999974E-6 : f32
    %416 = vector.broadcast %cst_113 : f32 to vector<32x1xf32>
    %417 = arith.addf %413, %416 : vector<32x1xf32>
    %418 = math.rsqrt %417 : vector<32x1xf32>
    %419 = vector.broadcast %418 : vector<32x1xf32> to vector<32x32xf32>
    %420 = arith.mulf %415, %419 : vector<32x32xf32>
    %421 = vector.broadcast %252 : vector<1x32xf32> to vector<32x32xf32>
    %422 = arith.mulf %420, %421 : vector<32x32xf32>
    %423 = vector.broadcast %253 : vector<1x32xf32> to vector<32x32xf32>
    %424 = arith.addf %422, %423 : vector<32x32xf32>
    %c0_114 = arith.constant 0 : index
    %c0_115 = arith.constant 0 : index
    %425 = vector.load %arg5[%c0_114, %c0_115] : memref<32x32xf32, #tpu.memory_space<vmem>>, vector<32x32xf32>
    tpu.vector_store %arg5[%c0_114, %c0_115], %424 {strides = array<i32>} : memref<32x32xf32, #tpu.memory_space<vmem>>, vector<32x32xf32>,
    return
  }
}

</mosaic_0001>

<bundles_post_ra>
// kernel: transformer_encoder.1
= control target key start
LH: loop header
LB: loop body
LE: loop exit
PB: predicated region body
PF: predicated region fallthrough
CT: control target
= control target key end

     0   :  { %10 = vsyncpa [#allocation3], 0  ;;  %s3662_s0 = inlined_call_operand.vmem [shape: f32[32,32], index: 0, kind: input, shape index: {}]   ;;  %s3663_s1 = inlined_call_operand.hbm [shape: f32[32,32], index: 1, kind: input, shape index: {}]   ;;  %s3664_s2 = inlined_call_operand.vmem [shape: bf16[2,32,256], index: 2, kind: input, shape index: {}]   ;;  %s3665_s3 = inlined_call_operand.vmem [shape: bf16[2,64,32], index: 3, kind: input, shape index: {}]   ;;  %s3666_s4 = inlined_call_operand.vmem [shape: f32[2,11,64], index: 4, kind: input, shape index: {}]   ;;  %s3667_s5 = inlined_call_operand.hbm [shape: f32[32,32], index: 5, kind: output, shape index: {}]  }
   0x1   :  { %11 = vsyncpa [#allocation4], 0  ;;  %s18_s20 = sshll.u32 %s3663_s1, 4  ;;  %s2739_s21 = smov [#allocation2]   ;;  %s19_s20 = int_to_ptr.hbm [resolvable:$true] %s18_s20 }
   0x2   :  { %s20_s22 = sshll.u32 %s2739_s21, 4  ;;  %s2740_s23 = smov 128   ;;  %s21_s22 = int_to_ptr.vmem [resolvable:$true] %s20_s22 }
   0x3   :  { %s2741_s24 = smov 8  }
   0x4   :  { %26 = dma.hbm_to_vmem [thread:$0]  %s19_s20, 512, %s21_s22, [#allocation3], %s2740_s23, %s2740_s23, %s2741_s24  }
   0x5   :  { %2735 = dma.done.wait [#allocation3], 512  }
   0x6   :  { %2736 = vsyncadd [#allocation3], 4294966784  ;;  %v2362_v0 = vld [vmem:[%s3664_s2 + $0x10] sm:$0xf]  ;;  %v2491_v1 = vld [vmem:[%s3664_s2 + $0x14] sm:$0xf0] }
   0x7   :  { %v2358_v2 = vld [vmem:[%s3664_s2] sm:$0xf]  ;;  %v2363_v3 = vor.u32 %v2491_v1, %v2362_v0  ;;  %v2490_v4 = vld [vmem:[%s3664_s2 + $0x4] sm:$0xf0]  ;;  %s2742_s11 = smov 96   ;;  %vm146_vm0 = vcmask 261120  }
   0x8   :  { %v2359_v5 = vor.u32 %v2490_v4, %v2358_v2  ;;  %v38_v6 = vld [vmem:[%s3662_s0] sm:$0xff]  ;;  %v39_v7 = vld [vmem:[%s3662_s0 + $0x8] sm:$0xff]  ;;  %v40_v9 = vld [vmem:[%s3662_s0 + $0x10] sm:$0xff]  ;;  %s2743_s16 = smov 64   ;;  %vm302_vm1 = vcmask 64512   ;;  %s2744_s1 = smov 88  }
   0x9   :  { %159 = vmatpush.bf16.msra.mxu0 %v2363_v3  ;;  %181 = vrot.lane.b32.xlu0 %v2363_v3, %s2742_s11  ;;  %v2807_v8 = vpack.c.bf16 %v39_v7, %v38_v6  ;;  %v41_v10 = vld [vmem:[%s3662_s0 + $0x18] sm:$0xff]  ;;  %v2827_v14 = vld [vmem:[%s3666_s4] sm:$0xff]  ;;  %v43_v36 = vld [vmem:[#allocation2 + $0x8] sm:$0xff]  ;;  %s2745_s29 = smov 120   ;;  %s2746_s30 = smov 80   ;;  %vm554_vm6 = vcmask 1043456  }
   0xa   :  { %v2818_v11 = vpack.c.bf16 %v41_v10, %v40_v9  ;;  %223 = vrot.lane.b32.xlu1 %v2363_v3, %s2743_s16  ;;  %v133_v16 = vperm.slane %v2827_v14, 0  ;;  %v178_v33 = vperm.slane %v2827_v14, 1  ;;  %v42_v35 = vld [vmem:[#allocation2] sm:$0xff]  ;;  %v44_v46 = vld [vmem:[#allocation2 + $0x10] sm:$0xff]  ;;  %v45_v47 = vld [vmem:[#allocation2 + $0x18] sm:$0xff]  ;;  %v220_v58 = vperm.slane %v2827_v14, 2 }
   0xb   :  { %s2747_s6 = smov 72   ;;  %s2748_s7 = smov 112  }
   0xc   :  { %s2749_s8 = smov 104   ;;  %s2343_s20 = sshll.u32 %s3667_s5, 4  ;;  %s2344_s20 = int_to_ptr.hbm [resolvable:$true] %s2343_s20 }
   0xd   :  { %160 = vmatpush.bf16.msra.mxu0 %v2359_v5 }
  0x10   :  { %2364 = vmatmul.msk.bf16.vlgmr.msra.gmra.mxu0 %vm146_vm0, %v2807_v8 }
  0x11   :  { %179 = vrot.lane.b32.xlu0 %v2359_v5, %s2742_s11 }
  0x12   :  { %221 = vrot.lane.b32.xlu1 %v2359_v5, %s2743_s16 }
  0x20   :  { %2365 = vmatmul.msk.bf16.gmra.mxu0 %vm146_vm0, %v2818_v11 }
  0x7b   :  { %v182_v12 = vpop.permute.xlu0 %181 }
  0x7c   :  { %197 = vmatpush.bf16.msra.mxu1 %v182_v12  ;;  %v224_v30 = vpop.permute.xlu1 %223 }
  0x7d   :  { %239 = vmatpush.bf16.msra.mxu2 %v224_v30 }
  0x83   :  { %v180_v13 = vpop.permute.xlu0 %179 }
  0x84   :  { %198 = vmatpush.bf16.msra.mxu1 %v180_v13  ;;  %v222_v31 = vpop.permute.xlu1 %221 }
  0x85   :  { %240 = vmatpush.bf16.msra.mxu2 %v222_v31 }
  0x8d   :  { %v162_v15 = vpop.f32.mrf.mxu0 }
  0x8e   :  { %v163_v17 = vadd.f32 %v162_v15, %v133_v16 }
  0x90   :  { %v172_v20 = vmax.f32 %v163_v17, 0.0  ;;  %v46_v17 = vlaneseq }
  0x95   :  { %v164_v18 = vpop.f32.mrf.mxu0 }
  0x96   :  { %v165_v19 = vadd.f32 %v164_v18, %v133_v16  ;;  %v47_v18 = vshrl.u32 %v46_v17, 7 }
  0x98   :  { %v173_v21 = vmax.f32 %v165_v19, 0.0  ;;  %v52_v19 = vand.u32 127, %v46_v17  ;;  %v48_v31 = vadd.s32 8, %v47_v18  ;;  %v256_v17 = vperm.slane %v2827_v14, 3 }
  0x9a   :  { %v176_v22 = vpack.c.bf16 %v173_v21, %v172_v20  ;;  %v57_v20 = vand.u32 1, %v47_v18  ;;  %v105_v21 = vand.u32 1, %v52_v19 }
  0x9c   :  { %2366 = vmatmul.msk.bf16.vlgmr.msra.gmra.mxu1 %vm146_vm0, %v176_v22  ;;  %v119_v22 = vld [vmem:[%s3664_s2 + $0x10] sm:$0xff]  ;;  %vm2870_vm2 = vcmp.eq.s32.totalorder %v57_v20, %v105_v21 }
  0x9d   :  { %v167_v23 = vpop.f32.mrf.mxu0 }
  0x9e   :  { %v168_v24 = vadd.f32 %v167_v23, %v133_v16  ;;  %v120_v23 = vld [vmem:[%s3664_s2 + $0x18] sm:$0xff] }
  0xa0   :  { %v174_v27 = vmax.f32 %v168_v24, 0.0  ;;  %v117_v24 = vld [vmem:[%s3664_s2] sm:$0xff] }
  0xa5   :  { %v169_v25 = vpop.f32.mrf.mxu0 }
  0xa6   :  { %v170_v26 = vadd.f32 %v169_v25, %v133_v16  ;;  %v2859_v25 = vunpack.c.h.b16 %v119_v22 }
  0xa8   :  { %v175_v28 = vmax.f32 %v170_v26, 0.0  ;;  %v2861_v26 = vunpack.c.h.b16 %v120_v23 }
  0xaa   :  { %v177_v29 = vpack.c.bf16 %v175_v28, %v174_v27  ;;  %v118_v27 = vld [vmem:[%s3664_s2 + $0x8] sm:$0xff]  ;;  %v2866_v28 = vunpack.c.h.b16 %v117_v24 }
  0xac   :  { %2367 = vmatmul.msk.bf16.gmra.mxu1 %vm146_vm0, %v177_v29  ;;  %v2868_v29 = vunpack.c.h.b16 %v118_v27 }
 0x119   :  { %v200_v32 = vpop.f32.mrf.mxu1 }
 0x11a   :  { %v201_v34 = vadd.f32 %v200_v32, %v178_v33  ;;  %v2876_v32 = vpack.c.b16 %v2861_v26, %v2859_v25 }
 0x11c   :  { %v210_v38 = vmul.f32 %v201_v34, %v42_v35  ;;  %271 = vmatpush.bf16.msra.mxu3 %v2876_v32  ;;  %v2881_v34 = vpack.c.b16 %v2868_v29, %v2866_v28 }
 0x11e   :  { %v214_v41 = vadd.f32 %v210_v38, %v38_v6 }
 0x120   :  { %272 = vmatpush.bf16.msra.mxu3 %v2881_v34 }
 0x121   :  { %v202_v37 = vpop.f32.mrf.mxu1 }
 0x122   :  { %v203_v39 = vadd.f32 %v202_v37, %v178_v33  ;;  %v64_v37 = vand.u32 1, %v48_v31 }
 0x123   :  { %2370 = vmatmul.msk.bf16.vlgmr.msra.gmra.mxu3 %vm146_vm0, %v2807_v8 }
 0x124   :  { %v211_v40 = vmul.f32 %v203_v39, %v43_v36  ;;  %vm2887_vm3 = vcmp.eq.s32.totalorder %v64_v37, %v105_v21  ;;  %v49_v39 = vadd.s32 16, %v47_v18 }
 0x126   :  { %v215_v42 = vadd.f32 %v211_v40, %v39_v7 }
 0x128   :  { %v218_v43 = vpack.c.bf16 %v215_v42, %v214_v41 }
 0x129   :  { %v205_v44 = vpop.f32.mrf.mxu1 }
 0x12a   :  { %2368 = vmatmul.msk.bf16.vlgmr.msra.gmra.mxu2 %vm146_vm0, %v218_v43  ;;  %v206_v45 = vadd.f32 %v205_v44, %v178_v33  ;;  %v71_v43 = vand.u32 1, %v49_v39 }
 0x12c   :  { %v212_v49 = vmul.f32 %v206_v45, %v44_v46  ;;  %vm2896_vm4 = vcmp.eq.s32.totalorder %v71_v43, %v105_v21  ;;  %v50_v45 = vadd.s32 24, %v47_v18 }
 0x12e   :  { %v216_v52 = vadd.f32 %v212_v49, %v40_v9  ;;  %v78_v8 = vand.u32 1, %v50_v45 }
 0x130   :  { %vm2903_vm5 = vcmp.eq.s32.totalorder %v78_v8, %v105_v21 }
 0x131   :  { %v207_v48 = vpop.f32.mrf.mxu1 }
 0x132   :  { %v208_v50 = vadd.f32 %v207_v48, %v178_v33 }
 0x133   :  { %2371 = vmatmul.msk.bf16.gmra.mxu3 %vm146_vm0, %v2818_v11 }
 0x134   :  { %v213_v51 = vmul.f32 %v208_v50, %v45_v47 }
 0x136   :  { %v217_v53 = vadd.f32 %v213_v51, %v41_v10 }
 0x138   :  { %v219_v54 = vpack.c.bf16 %v217_v53, %v216_v52 }
 0x13a   :  { %2369 = vmatmul.msk.bf16.gmra.mxu2 %vm146_vm0, %v219_v54 }
 0x1ad   :  { %v242_v55 = vpop.f32.mrf.mxu2 }
 0x1ae   :  { %v243_v1 = vadd.f32 %v242_v55, %v220_v58 }
 0x1b0   :  { %v252_v6 = vpack.c.bf16 %v243_v1, %v243_v1 }
 0x1b2   :  { %v292_v9 = vunpack.c.l.b16 %v252_v6 }
 0x1b5   :  { %v244_v56 = vpop.f32.mrf.mxu2 }
 0x1b6   :  { %v245_v63 = vadd.f32 %v244_v56, %v220_v58 }
 0x1b8   :  { %v253_v4 = vpack.c.bf16 %v245_v63, %v245_v63 }
 0x1ba   :  { %v293_v7 = vunpack.c.l.b16 %v253_v4 }
 0x1bc   :  { %v2840_v10 = vpack.c.b16 %v293_v7, %v292_v9 }
 0x1bd   :  { %v247_v57 = vpop.f32.mrf.mxu2 }
 0x1be   :  { %v248_v59 = vadd.f32 %v247_v57, %v220_v58 }
 0x1c0   :  { %v254_v61 = vpack.c.bf16 %v248_v59, %v248_v59 }
 0x1c2   :  { %v294_v2 = vunpack.c.l.b16 %v254_v61 }
 0x1c5   :  { %v249_v60 = vpop.f32.mrf.mxu2 }
 0x1c6   :  { %v250_v62 = vadd.f32 %v249_v60, %v220_v58 }
 0x1c8   :  { %v255_v0 = vpack.c.bf16 %v250_v62, %v250_v62 }
 0x1ca   :  { %v295_v3 = vunpack.c.l.b16 %v255_v0 }
 0x1cc   :  { %v2836_v5 = vpack.c.b16 %v295_v3, %v294_v2 }
 0x1ce   :  { %300 = vrot.lane.b32.xlu2 %v2836_v5, %s2742_s11 }
 0x1d6   :  { %298 = vrot.lane.b32.xlu2 %v2840_v10, %s2742_s11 }
 0x228   :  { %v301_v12 = vpop.permute.xlu2 %300 }
 0x229   :  { %v313_v13 = vsel %vm302_vm1, %v301_v12, 0  ;;  %v577_v12 = vpack.c.b16 %v2866_v28, %v2866_v28 }
 0x22a   :  { %321 = vmatpush.bf16.xpose.msrb.mxu0 %v313_v13  ;;  %v274_v13 = vpop.f32.mrf.mxu3 }
 0x22b   :  { %v275_v19 = vadd.f32 %v274_v13, %v256_v17 }
 0x22d   :  { %v284_v23 = vpack.c.bf16 %v275_v19, %v275_v19 }
 0x230   :  { %v299_v15 = vpop.permute.xlu2 %298 }
 0x231   :  { %v310_v16 = vsel %vm302_vm1, %v299_v15, 0 }
 0x232   :  { %322 = vmatpush.bf16.xpose.msrb.mxu0 %v310_v16  ;;  %v276_v15 = vpop.f32.mrf.mxu3 }
 0x233   :  { %v277_v20 = vadd.f32 %v276_v15, %v256_v17 }
 0x235   :  { %v285_v24 = vpack.c.bf16 %v277_v20, %v277_v20 }
 0x239   :  { %2372 = vmatmul.msk.bf16.vlgmr.msrb.gmra.mxu0 %vm302_vm1, %v2840_v10 }
 0x23a   :  { %v279_v16 = vpop.f32.mrf.mxu3 }
 0x23b   :  { %v280_v18 = vadd.f32 %v279_v16, %v256_v17 }
 0x23d   :  { %v286_v21 = vpack.c.bf16 %v280_v18, %v280_v18 }
 0x23f   :  { %v390_v28 = vunpack.c.l.b16 %v286_v21 }
 0x242   :  { %v281_v22 = vpop.f32.mrf.mxu3 }
 0x243   :  { %v282_v27 = vadd.f32 %v281_v22, %v256_v17 }
 0x245   :  { %v287_v31 = vpack.c.bf16 %v282_v27, %v282_v27 }
 0x249   :  { %2373 = vmatmul.msk.bf16.gmra.mxu0 %vm302_vm1, %v2836_v5 }
 0x2b6   :  { %v324_v33 = vpop.f32.mrf.mxu0 }
 0x2b7   :  { %v334_v35 = vsel %vm2870_vm2, %v324_v33, -1e+30  ;;  %v388_v33 = vunpack.c.l.b16 %v284_v23 }
 0x2b8   :  { %v338_v36 = vsel %vm146_vm0, %v334_v35, -inf }
 0x2b9   :  { %339 = vmax.xlane.f32.xlu0 %v338_v36 }
 0x2be   :  { %v326_v40 = vpop.f32.mrf.mxu0 }
 0x2bf   :  { %v335_v41 = vsel %vm2887_vm3, %v326_v40, -1e+30 }
 0x2c0   :  { %v341_v42 = vsel %vm146_vm0, %v335_v41, -inf }
 0x2c1   :  { %342 = vmax.xlane.f32.xlu1 %v341_v42 }
 0x2c6   :  { %v329_v46 = vpop.f32.mrf.mxu0 }
 0x2c7   :  { %v336_v47 = vsel %vm2896_vm4, %v329_v46, -1e+30 }
 0x2c8   :  { %v344_v48 = vsel %vm146_vm0, %v336_v47, -inf }
 0x2c9   :  { %345 = vmax.xlane.f32.xlu2 %v344_v48 }
 0x2ce   :  { %v331_v50 = vpop.f32.mrf.mxu0 }
 0x2cf   :  { %v337_v51 = vsel %vm2903_vm5, %v331_v50, -1e+30 }
 0x2d0   :  { %v347_v52 = vsel %vm146_vm0, %v337_v51, -inf }
 0x2d1   :  { %348 = vmax.xlane.f32.xlu2 %v347_v52 }
 0x32c   :  { %v340_v53 = vpop.xlane.xlu0 %339 }
 0x32d   :  { %v350_v54 = vsub.f32 %v334_v35, %v340_v53  ;;  %v389_v35 = vunpack.c.l.b16 %v285_v24 }
 0x32f   :  { %v354_v55 = vmul.f32 1.442695, %v350_v54  ;;  %v2958_v37 = vpack.c.b16 %v389_v35, %v388_v33 }
 0x331   :  { %2515 = vpow2.f32 %v354_v55 }
 0x334   :  { %v343_v56 = vpop.xlane.xlu1 %342 }
 0x335   :  { %v351_v57 = vsub.f32 %v335_v41, %v343_v56 }
 0x337   :  { %v2912_v58 = vpop.eup %2515  ;;  %v356_v59 = vmul.f32 1.442695, %v351_v57 }
 0x338   :  { %v362_v60 = vsel %vm146_vm0, %v2912_v58, 0.0 }
 0x339   :  { %2517 = vpow2.f32 %v356_v59  ;;  %363 = vadd.xlane.f32.xlu0 %v362_v60 }
 0x33c   :  { %v346_v11 = vpop.xlane.xlu2 %345 }
 0x33d   :  { %v352_v61 = vsub.f32 %v336_v47, %v346_v11 }
 0x33f   :  { %v2916_v62 = vpop.eup %2517  ;;  %v358_v63 = vmul.f32 1.442695, %v352_v61 }
 0x340   :  { %v365_v0 = vsel %vm146_vm0, %v2916_v62, 0.0 }
 0x341   :  { %2519 = vpow2.f32 %v358_v63  ;;  %366 = vadd.xlane.f32.xlu1 %v365_v0 }
 0x344   :  { %v349_v1 = vpop.xlane.xlu2 %348 }
 0x345   :  { %v353_v2 = vsub.f32 %v337_v51, %v349_v1 }
 0x347   :  { %v2920_v3 = vpop.eup %2519  ;;  %v360_v4 = vmul.f32 1.442695, %v353_v2 }
 0x348   :  { %v368_v6 = vsel %vm146_vm0, %v2920_v3, 0.0 }
 0x349   :  { %2521 = vpow2.f32 %v360_v4  ;;  %369 = vadd.xlane.f32.xlu2 %v368_v6 }
 0x34f   :  { %v2924_v7 = vpop.eup %2521 }
 0x350   :  { %v371_v9 = vsel %vm146_vm0, %v2924_v7, 0.0 }
 0x351   :  { %372 = vadd.xlane.f32.xlu0 %v371_v9 }
 0x35a   :  { %429 = vrot.lane.b32.xlu1 %v2836_v5, %s2744_s1 }
 0x361   :  { %427 = vrot.lane.b32.xlu2 %v2840_v10, %s2744_s1 }
 0x362   :  { %423 = vrot.lane.b32.xlu1 %v2840_v10, %s2745_s29 }
 0x365   :  { %578 = vrot.lane.b32.xlu0 %v577_v12, %s2742_s11 }
 0x369   :  { %614 = vrot.lane.b32.xlu2 %v2836_v5, %s2746_s30 }
 0x36a   :  { %771 = vrot.lane.b32.xlu1 %v2836_v5, %s2747_s6 }
 0x36d   :  { %425 = vrot.lane.b32.xlu0 %v2836_v5, %s2745_s29 }
 0x371   :  { %769 = vrot.lane.b32.xlu2 %v2840_v10, %s2747_s6 }
 0x372   :  { %608 = vrot.lane.b32.xlu1 %v2840_v10, %s2748_s7 }
 0x375   :  { %612 = vrot.lane.b32.xlu0 %v2840_v10, %s2746_s30 }
 0x379   :  { %610 = vrot.lane.b32.xlu2 %v2836_v5, %s2748_s7 }
 0x37a   :  { %767 = vrot.lane.b32.xlu1 %v2836_v5, %s2749_s8  ;;  %v391_v5 = vunpack.c.l.b16 %v287_v31 }
 0x37c   :  { %v2956_v36 = vpack.c.b16 %v391_v5, %v390_v28 }
 0x37d   :  { %765 = vrot.lane.b32.xlu0 %v2840_v10, %s2749_s8 }
 0x37e   :  { %408 = vmatpush.bf16.msrb.mxu1 %v2956_v36 }
 0x382   :  { %409 = vmatpush.bf16.msrb.mxu1 %v2958_v37 }
 0x3ac   :  { %v364_v14 = vpop.xlane.xlu0 %363 }
 0x3ad   :  { %2523 = vrcp.f32 %v364_v14 }
 0x3b3   :  { %v2524_v39 = vpop.eup %2523 }
 0x3b4   :  { %v367_v10 = vpop.xlane.xlu1 %366  ;;  %v378_v41 = vmul.f32 %v2524_v39, %v2912_v58 }
 0x3b5   :  { %2525 = vrcp.f32 %v367_v10 }
 0x3bb   :  { %v2526_v40 = vpop.eup %2525 }
 0x3bc   :  { %v379_v42 = vmul.f32 %v2526_v40, %v2916_v62  ;;  %v370_v45 = vpop.xlane.xlu2 %369 }
 0x3bd   :  { %2527 = vrcp.f32 %v370_v45 }
 0x3be   :  { %v382_v43 = vpack.c.bf16 %v379_v42, %v378_v41 }
 0x3c0   :  { %2374 = vmatmul.msk.bf16.vlgmr.msrb.gmra.mxu1 %vm146_vm0, %v382_v43 }
 0x3c3   :  { %v2528_v47 = vpop.eup %2527 }
 0x3c4   :  { %v373_v46 = vpop.xlane.xlu0 %372  ;;  %v428_v48 = vpop.permute.xlu2 %427  ;;  %v380_v51 = vmul.f32 %v2528_v47, %v2920_v3 }
 0x3c5   :  { %2529 = vrcp.f32 %v373_v46  ;;  %v438_v57 = vsel %vm302_vm1, %v428_v48, 0 }
 0x3cb   :  { %v2530_v8 = vpop.eup %2529 }
 0x3cc   :  { %v430_v50 = vpop.permute.xlu1 %429  ;;  %v381_v52 = vmul.f32 %v2530_v8, %v2924_v7  ;;  %v615_v55 = vpop.permute.xlu2 %614 }
 0x3cd   :  { %v441_v53 = vsel %vm302_vm1, %v430_v50, 0  ;;  %v626_v58 = vsel %vm302_vm1, %v615_v55, 0 }
 0x3ce   :  { %449 = vmatpush.bf16.xpose.msrb.mxu2 %v441_v53  ;;  %v383_v54 = vpack.c.bf16 %v381_v52, %v380_v51 }
 0x3d0   :  { %2375 = vmatmul.msk.bf16.gmra.mxu1 %vm146_vm0, %v383_v54 }
 0x3d4   :  { %v424_v56 = vpop.permute.xlu1 %423  ;;  %v770_v63 = vpop.permute.xlu2 %769 }
 0x3d5   :  { %v780_v0 = vsel %vm302_vm1, %v770_v63, 0 }
 0x3d6   :  { %450 = vmatpush.bf16.xpose.msrb.mxu2 %v438_v57 }
 0x3d7   :  { %v579_v59 = vpop.permute.xlu0 %578 }
 0x3d8   :  { %v587_v60 = vsel %vm554_vm6, %v579_v59, 0 }
 0x3d9   :  { %596 = vmatpush.bf16.msra.mxu1 %v587_v60 }
 0x3dc   :  { %v772_v11 = vpop.permute.xlu1 %771  ;;  %v611_v4 = vpop.permute.xlu2 %610 }
 0x3dd   :  { %v783_v61 = vsel %vm302_vm1, %v772_v11, 0  ;;  %2376 = vmatmul.msk.bf16.vlgmr.msrb.gmra.mxu2 %vm302_vm1, %v424_v56 }
 0x3de   :  { %634 = vmatpush.bf16.xpose.msra.mxu2 %v626_v58  ;;  %791 = vmatpush.bf16.xpose.msrb.mxu1 %v783_v61 }
 0x3df   :  { %v426_v62 = vpop.permute.xlu0 %425 }
 0x3e4   :  { %v609_v3 = vpop.permute.xlu1 %608 }
 0x3e6   :  { %792 = vmatpush.bf16.xpose.msrb.mxu1 %v780_v0 }
 0x3e7   :  { %v613_v1 = vpop.permute.xlu0 %612 }
 0x3e8   :  { %v623_v2 = vsel %vm302_vm1, %v613_v1, 0 }
 0x3e9   :  { %635 = vmatpush.bf16.xpose.msra.mxu2 %v623_v2 }
 0x3ec   :  { %v768_v28 = vpop.permute.xlu1 %767 }
 0x3ed   :  { %2377 = vmatmul.msk.bf16.gmra.mxu2 %vm302_vm1, %v426_v62 }
 0x3ef   :  { %v766_v19 = vpop.permute.xlu0 %765 }
 0x3fd   :  { %2384 = vmatmul.msk.bf16.vlgmr.msra.gmra.mxu2 %vm302_vm1, %v609_v3 }
 0x40d   :  { %2385 = vmatmul.msk.bf16.gmra.mxu2 %vm302_vm1, %v611_v4 }
 0x43d   :  { %v411_v6 = vpop.f32.mrf.mxu1 }
 0x445   :  { %v413_v7 = vpop.f32.mrf.mxu1 }
 0x446   :  { %v421_v9 = vpack.c.bf16 %v413_v7, %v411_v6 }
 0x448   :  { %2382 = vmatmul.msk.bf16.vlgmr.msra.gmra.mxu1 %vm302_vm1, %v421_v9 }
 0x44d   :  { %v416_v12 = vpop.f32.mrf.mxu1 }
 0x455   :  { %v418_v13 = vpop.f32.mrf.mxu1 }
 0x456   :  { %v422_v15 = vpack.c.bf16 %v418_v13, %v416_v12 }
 0x458   :  { %2383 = vmatmul.msk.bf16.gmra.mxu1 %vm302_vm1, %v422_v15 }
 0x460   :  { %v452_v16 = vpop.f32.mrf.mxu2 }
 0x461   :  { %v462_v17 = vsel %vm2870_vm2, %v452_v16, -1e+30 }
 0x462   :  { %v466_v18 = vsel %vm146_vm0, %v462_v17, -inf }
 0x463   :  { %467 = vmax.xlane.f32.xlu0 %v466_v18 }
 0x468   :  { %v454_v20 = vpop.f32.mrf.mxu2  ;;  %2390 = vmatmul.msk.bf16.vlgmr.msrb.gmra.mxu1 %vm302_vm1, %v766_v19 }
 0x469   :  { %v463_v21 = vsel %vm2887_vm3, %v454_v20, -1e+30 }
 0x46a   :  { %v469_v22 = vsel %vm146_vm0, %v463_v21, -inf }
 0x46b   :  { %470 = vmax.xlane.f32.xlu2 %v469_v22 }
 0x470   :  { %v457_v23 = vpop.f32.mrf.mxu2 }
 0x471   :  { %v464_v24 = vsel %vm2896_vm4, %v457_v23, -1e+30 }
 0x472   :  { %v472_v27 = vsel %vm146_vm0, %v464_v24, -inf }
 0x473   :  { %473 = vmax.xlane.f32.xlu1 %v472_v27 }
 0x478   :  { %v459_v31 = vpop.f32.mrf.mxu2  ;;  %2391 = vmatmul.msk.bf16.gmra.mxu1 %vm302_vm1, %v768_v28 }
 0x479   :  { %v2994_v33 = vsel %vm2903_vm5, %v459_v31, -1e+30 }
 0x47a   :  { %v475_v35 = vsel %vm146_vm0, %v2994_v33, -inf }
 0x47b   :  { %476 = vmax.xlane.f32.xlu0 %v475_v35 }
 0x480   :  { %v637_v5 = vpop.f32.mrf.mxu2 }
 0x481   :  { %v647_v14 = vsel %vm2870_vm2, %v637_v5, -1e+30 }
 0x482   :  { %v651_v10 = vsel %vm146_vm0, %v647_v14, -inf }
 0x483   :  { %652 = vmax.xlane.f32.xlu0 %v651_v10 }
 0x488   :  { %v639_v39 = vpop.f32.mrf.mxu2 }
 0x489   :  { %v3003_v40 = vsel %vm2887_vm3, %v639_v39, -1e+30 }
 0x48a   :  { %v654_v41 = vsel %vm146_vm0, %v3003_v40, -inf }
 0x48b   :  { %655 = vmax.xlane.f32.xlu2 %v654_v41 }
 0x490   :  { %v642_v42 = vpop.f32.mrf.mxu2 }
 0x491   :  { %v3009_v43 = vsel %vm2896_vm4, %v642_v42, -1e+30 }
 0x492   :  { %v657_v45 = vsel %vm146_vm0, %v3009_v43, -inf }
 0x493   :  { %658 = vmax.xlane.f32.xlu2 %v657_v45 }
 0x498   :  { %v644_v46 = vpop.f32.mrf.mxu2 }
 0x499   :  { %v3015_v47 = vsel %vm2903_vm5, %v644_v46, -1e+30 }
 0x49a   :  { %v660_v48 = vsel %vm146_vm0, %v3015_v47, -inf }
 0x49b   :  { %661 = vmax.xlane.f32.xlu1 %v660_v48 }
 0x4b4   :  { %514 = vrot.lane.b32.xlu1 %v2956_v36, %s2745_s29 }
 0x4c5   :  { %v3021_v8 = vpop.f32.mrf.mxu1 }
 0x4cd   :  { %v3023_v53 = vpop.f32.mrf.mxu1 }
 0x4d5   :  { %v3029_v59 = vpop.f32.mrf.mxu1 }
 0x4d6   :  { %v468_v50 = vpop.xlane.xlu0 %467 }
 0x4d7   :  { %v478_v51 = vsub.f32 %v462_v17, %v468_v50 }
 0x4d9   :  { %v482_v52 = vmul.f32 1.442695, %v478_v51 }
 0x4db   :  { %2531 = vpow2.f32 %v482_v52 }
 0x4dd   :  { %v3035_v0 = vpop.f32.mrf.mxu1 }
 0x4de   :  { %v471_v54 = vpop.xlane.xlu2 %470 }
 0x4df   :  { %v479_v55 = vsub.f32 %v463_v21, %v471_v54 }
 0x4e1   :  { %v3025_v56 = vpop.eup %2531  ;;  %v484_v57 = vmul.f32 1.442695, %v479_v55 }
 0x4e2   :  { %v490_v58 = vsel %vm146_vm0, %v3025_v56, 0.0 }
 0x4e3   :  { %2533 = vpow2.f32 %v484_v57  ;;  %491 = vadd.xlane.f32.xlu0 %v490_v58 }
 0x4e5   :  { %v794_v7 = vpop.f32.mrf.mxu1 }
 0x4e6   :  { %v474_v60 = vpop.xlane.xlu1 %473  ;;  %v804_v42 = vsel %vm2870_vm2, %v794_v7, -1e+30 }
 0x4e7   :  { %v480_v11 = vsub.f32 %v464_v24, %v474_v60 }
 0x4e9   :  { %v3031_v61 = vpop.eup %2533  ;;  %v486_v62 = vmul.f32 1.442695, %v480_v11 }
 0x4ea   :  { %v493_v63 = vsel %vm146_vm0, %v3031_v61, 0.0 }
 0x4eb   :  { %2535 = vpow2.f32 %v486_v62  ;;  %494 = vadd.xlane.f32.xlu2 %v493_v63 }
 0x4ed   :  { %v796_v13 = vpop.f32.mrf.mxu1 }
 0x4ee   :  { %v477_v1 = vpop.xlane.xlu0 %476  ;;  %v805_v16 = vsel %vm2887_vm3, %v796_v13, -1e+30 }
 0x4ef   :  { %v811_v17 = vsel %vm146_vm0, %v805_v16, -inf  ;;  %v481_v27 = vsub.f32 %v2994_v33, %v477_v1 }
 0x4f1   :  { %v3037_v2 = vpop.eup %2535  ;;  %v488_v28 = vmul.f32 1.442695, %v481_v27 }
 0x4f2   :  { %v496_v3 = vsel %vm146_vm0, %v3037_v2, 0.0 }
 0x4f3   :  { %497 = vadd.xlane.f32.xlu2 %v496_v3 }
 0x4f5   :  { %v799_v18 = vpop.f32.mrf.mxu1 }
 0x4f6   :  { %v653_v4 = vpop.xlane.xlu0 %652  ;;  %v3054_v19 = vsel %vm2896_vm4, %v799_v18, -1e+30 }
 0x4f7   :  { %v663_v6 = vsub.f32 %v647_v14, %v653_v4  ;;  %512 = vrot.lane.b32.xlu0 %v2958_v37, %s2745_s29  ;;  %v814_v20 = vsel %vm146_vm0, %v3054_v19, -inf }
 0x4f9   :  { %v667_v9 = vmul.f32 1.442695, %v663_v6 }
 0x4fb   :  { %2537 = vpow2.f32 %v667_v9 }
 0x4fc   :  { %2539 = vpow2.f32 %v488_v28 }
 0x4fd   :  { %v801_v21 = vpop.f32.mrf.mxu1 }
 0x4fe   :  { %v3060_v22 = vsel %vm2903_vm5, %v801_v21, -1e+30  ;;  %v656_v35 = vpop.xlane.xlu2 %655 }
 0x4ff   :  { %v817_v24 = vsel %vm146_vm0, %v3060_v22, -inf  ;;  %v664_v5 = vsub.f32 %v3003_v40, %v656_v35  ;;  %v808_v40 = vsel %vm146_vm0, %v804_v42, -inf }
 0x501   :  { %v3043_v12 = vpop.eup %2537  ;;  %v669_v14 = vmul.f32 1.442695, %v664_v5 }
 0x502   :  { %v675_v15 = vsel %vm146_vm0, %v3043_v12, 0.0  ;;  %v2540_v10 = vpop.eup %2539 }
 0x503   :  { %676 = vadd.xlane.f32.xlu1 %v675_v15  ;;  %2541 = vpow2.f32 %v669_v14  ;;  %v499_v39 = vsel %vm146_vm0, %v2540_v10, 0.0 }
 0x506   :  { %v659_v45 = vpop.xlane.xlu2 %658 }
 0x507   :  { %v665_v46 = vsub.f32 %v3009_v43, %v659_v45 }
 0x509   :  { %v3071_v41 = vpop.eup %2541  ;;  %v671_v48 = vmul.f32 1.442695, %v665_v46 }
 0x50a   :  { %v678_v33 = vsel %vm146_vm0, %v3071_v41, 0.0 }
 0x50b   :  { %812 = vmax.xlane.f32.xlu1 %v811_v17  ;;  %856 = vrot.lane.b32.xlu2 %v2956_v36, %s2749_s8  ;;  %2543 = vpow2.f32 %v671_v48 }
 0x50e   :  { %v3062_v23 = vpop.xlane.xlu1 %661 }
 0x511   :  { %v3079_v50 = vpop.eup %2543 }
 0x512   :  { %v681_v51 = vsel %vm146_vm0, %v3079_v50, 0.0 }
 0x513   :  { %815 = vmax.xlane.f32.xlu1 %v814_v20 }
 0x521   :  { %818 = vmax.xlane.f32.xlu0 %v817_v24 }
 0x526   :  { %v515_v31 = vpop.permute.xlu1 %514 }
 0x527   :  { %530 = vmatpush.bf16.msrb.mxu3 %v515_v31 }
 0x52c   :  { %697 = vrot.lane.b32.xlu1 %v2958_v37, %s2748_s7 }
 0x534   :  { %500 = vadd.xlane.f32.xlu2 %v499_v39  ;;  %v666_v39 = vsub.f32 %v3015_v47, %v3062_v23  ;;  %v887_v47 = vpack.c.b16 %v2861_v26, %v2861_v26  ;;  %v730_v23 = vpack.c.b16 %v2859_v25, %v2859_v25 }
 0x53c   :  { %679 = vadd.xlane.f32.xlu2 %v678_v33  ;;  %v673_v33 = vmul.f32 1.442695, %v666_v39 }
 0x544   :  { %809 = vmax.xlane.f32.xlu2 %v808_v40 }
 0x556   :  { %682 = vadd.xlane.f32.xlu1 %v681_v51  ;;  %v492_v52 = vpop.xlane.xlu0 %491 }
 0x55e   :  { %v495_v54 = vpop.xlane.xlu2 %494 }
 0x55f   :  { %2545 = vrcp.f32 %v495_v54 }
 0x560   :  { %2547 = vrcp.f32 %v492_v52 }
 0x565   :  { %v2546_v55 = vpop.eup %2545 }
 0x566   :  { %v2548_v57 = vpop.eup %2547  ;;  %v498_v58 = vpop.xlane.xlu2 %497  ;;  %v507_v60 = vmul.f32 %v2546_v55, %v3031_v61 }
 0x567   :  { %v506_v43 = vmul.f32 %v2548_v57, %v3025_v56 }
 0x569   :  { %v513_v11 = vpop.permute.xlu0 %512  ;;  %v510_v62 = vpack.c.bf16 %v507_v60, %v506_v43 }
 0x56a   :  { %531 = vmatpush.bf16.msrb.mxu3 %v513_v11 }
 0x56d   :  { %2378 = vmatmul.msk.bf16.vlgmr.msrb.gmra.mxu3 %vm146_vm0, %v510_v62 }
 0x56e   :  { %v857_v63 = vpop.permute.xlu2 %856 }
 0x56f   :  { %872 = vmatpush.bf16.msrb.mxu2 %v857_v63  ;;  %731 = vrot.lane.b32.xlu1 %v730_v23, %s2742_s11 }
 0x576   :  { %v677_v1 = vpop.xlane.xlu1 %676 }
 0x57e   :  { %v813_v3 = vpop.xlane.xlu1 %812 }
 0x57f   :  { %v821_v4 = vsub.f32 %v805_v16, %v813_v3 }
 0x581   :  { %v826_v6 = vmul.f32 1.442695, %v821_v4 }
 0x583   :  { %2549 = vpow2.f32 %v826_v6 }
 0x584   :  { %2551 = vrcp.f32 %v498_v58 }
 0x586   :  { %v816_v14 = vpop.xlane.xlu1 %815 }
 0x589   :  { %v2550_v7 = vpop.eup %2549 }
 0x58a   :  { %v835_v9 = vsel %vm146_vm0, %v2550_v7, 0.0  ;;  %v2552_v61 = vpop.eup %2551 }
 0x58b   :  { %836 = vadd.xlane.f32.xlu0 %v835_v9  ;;  %v508_v17 = vmul.f32 %v2552_v61, %v3037_v2 }
 0x594   :  { %v819_v16 = vpop.xlane.xlu0 %818 }
 0x595   :  { %v823_v21 = vsub.f32 %v3060_v22, %v819_v16  ;;  %v822_v22 = vsub.f32 %v3054_v19, %v816_v14  ;;  %v545_v19 = vpack.c.b16 %v2868_v29, %v2868_v29 }
 0x597   :  { %v830_v31 = vmul.f32 1.442695, %v823_v21 }
 0x59e   :  { %v698_v11 = vpop.permute.xlu1 %697 }
 0x59f   :  { %854 = vrot.lane.b32.xlu0 %v2958_v37, %s2749_s8 }
 0x5a7   :  { %v501_v56 = vpop.xlane.xlu2 %500 }
 0x5a8   :  { %2553 = vrcp.f32 %v501_v56 }
 0x5ae   :  { %v2554_v13 = vpop.eup %2553 }
 0x5af   :  { %v680_v15 = vpop.xlane.xlu2 %679  ;;  %v509_v18 = vmul.f32 %v2554_v13, %v2540_v10  ;;  %v828_v10 = vmul.f32 1.442695, %v822_v22 }
 0x5b1   :  { %v511_v20 = vpack.c.bf16 %v509_v18, %v508_v17 }
 0x5b3   :  { %2379 = vmatmul.msk.bf16.gmra.mxu3 %vm146_vm0, %v511_v20 }
 0x5b7   :  { %v810_v24 = vpop.xlane.xlu2 %809 }
 0x5b8   :  { %v820_v27 = vsub.f32 %v804_v42, %v810_v24 }
 0x5ba   :  { %v824_v28 = vmul.f32 1.442695, %v820_v27 }
 0x5bc   :  { %2555 = vpow2.f32 %v824_v28 }
 0x5bd   :  { %2557 = vpow2.f32 %v830_v31 }
 0x5be   :  { %2559 = vpow2.f32 %v828_v10 }
 0x5bf   :  { %2561 = vpow2.f32 %v673_v33 }
 0x5c2   :  { %v2556_v37 = vpop.eup %2555 }
 0x5c3   :  { %v832_v35 = vsel %vm146_vm0, %v2556_v37, 0.0  ;;  %v2558_v5 = vpop.eup %2557 }
 0x5c4   :  { %833 = vadd.xlane.f32.xlu2 %v832_v35  ;;  %v841_v2 = vsel %vm146_vm0, %v2558_v5, 0.0  ;;  %v2560_v42 = vpop.eup %2559 }
 0x5c5   :  { %v838_v45 = vsel %vm146_vm0, %v2560_v42, 0.0  ;;  %v2562_v40 = vpop.eup %2561 }
 0x5c6   :  { %v684_v48 = vsel %vm146_vm0, %v2562_v40, 0.0 }
 0x5c9   :  { %842 = vadd.xlane.f32.xlu0 %v841_v2  ;;  %v683_v3 = vpop.xlane.xlu1 %682 }
 0x5dc   :  { %699 = vrot.lane.b32.xlu2 %v2956_v36, %s2748_s7 }
 0x5dd   :  { %888 = vrot.lane.b32.xlu0 %v887_v47, %s2742_s11 }
 0x5f0   :  { %v533_v4 = vpop.f32.mrf.mxu3 }
 0x5f8   :  { %v535_v13 = vpop.f32.mrf.mxu3 }
 0x5f9   :  { %v543_v24 = vpack.c.bf16 %v535_v13, %v533_v4 }
 0x5fe   :  { %v837_v46 = vpop.xlane.xlu0 %836 }
 0x5ff   :  { %2563 = vrcp.f32 %v837_v46 }
 0x600   :  { %2565 = vrcp.f32 %v680_v15 }
 0x605   :  { %839 = vadd.xlane.f32.xlu2 %v838_v45  ;;  %v2564_v52 = vpop.eup %2563 }
 0x606   :  { %v2566_v54 = vpop.eup %2565  ;;  %v849_v55 = vmul.f32 %v2564_v52, %v2550_v7 }
 0x607   :  { %v692_v26 = vmul.f32 %v2566_v54, %v3071_v41 }
 0x60d   :  { %685 = vadd.xlane.f32.xlu2 %v684_v48 }
 0x611   :  { %v855_v36 = vpop.permute.xlu0 %854 }
 0x612   :  { %873 = vmatpush.bf16.msrb.mxu2 %v855_v36 }
 0x625   :  { %546 = vrot.lane.b32.xlu2 %v545_v19, %s2742_s11 }
 0x636   :  { %v538_v27 = vpop.f32.mrf.mxu3 }
 0x637   :  { %v834_v51 = vpop.xlane.xlu2 %833 }
 0x638   :  { %2567 = vrcp.f32 %v834_v51 }
 0x639   :  { %2569 = vrcp.f32 %v677_v1 }
 0x63c   :  { %v843_v63 = vpop.xlane.xlu0 %842 }
 0x63d   :  { %2571 = vrcp.f32 %v843_v63 }
 0x63e   :  { %v2568_v29 = vpop.eup %2567  ;;  %v540_v28 = vpop.f32.mrf.mxu3 }
 0x63f   :  { %v848_v57 = vmul.f32 %v2568_v29, %v2556_v37  ;;  %v700_v58 = vpop.permute.xlu2 %699  ;;  %v2570_v60 = vpop.eup %2569  ;;  %v544_v31 = vpack.c.bf16 %v540_v28, %v538_v27  ;;  %v2681_v28 = vld [vmem:[%s3662_s0 + $0x18] sm:$0xff] }
 0x640   :  { %715 = vmatpush.bf16.msra.mxu3 %v700_v58  ;;  %v691_v43 = vmul.f32 %v2570_v60, %v3043_v12 }
 0x641   :  { %v852_v25 = vpack.c.bf16 %v849_v55, %v848_v57  ;;  %v3130_v55 = vld [vmem:[%s3666_s4] sm:$0xff] }
 0x642   :  { %v695_v62 = vpack.c.bf16 %v692_v26, %v691_v43  ;;  %v922_v57 = vperm.slane %v3130_v55, 4  ;;  %v2678_v43 = vld [vmem:[%s3662_s0] sm:$0xff] }
 0x643   :  { %2392 = vmatmul.msk.bf16.vlgmr.msrb.gmra.mxu2 %vm146_vm0, %v852_v25  ;;  %v2572_v6 = vpop.eup %2571 }
 0x644   :  { %716 = vmatpush.bf16.msra.mxu3 %v698_v11  ;;  %v851_v56 = vmul.f32 %v2572_v6, %v2558_v5  ;;  %v2679_v6 = vld [vmem:[%s3662_s0 + $0x8] sm:$0xff] }
 0x647   :  { %2386 = vmatmul.msk.bf16.vlgmr.msra.gmra.mxu3 %vm146_vm0, %v695_v62 }
 0x64f   :  { %v889_v37 = vpop.permute.xlu0 %888 }
 0x650   :  { %v897_v35 = vsel %vm554_vm6, %v889_v37, 0  ;;  %v2750_v37 = vmov 32.0  }
 0x651   :  { %906 = vmatpush.bf16.msrb.mxu3 %v897_v35 }
 0x678   :  { %v840_v1 = vpop.xlane.xlu2 %839 }
 0x679   :  { %2573 = vrcp.f32 %v840_v1 }
 0x67a   :  { %2575 = vrcp.f32 %v683_v3 }
 0x67f   :  { %v2574_v7 = vpop.eup %2573 }
 0x680   :  { %v686_v41 = vpop.xlane.xlu2 %685  ;;  %v850_v9 = vmul.f32 %v2574_v7, %v2560_v42  ;;  %v2576_v61 = vpop.eup %2575 }
 0x681   :  { %2577 = vrcp.f32 %v686_v41  ;;  %v693_v18 = vmul.f32 %v2576_v61, %v3079_v50  ;;  %v732_v50 = vpop.permute.xlu1 %731 }
 0x682   :  { %v853_v12 = vpack.c.bf16 %v851_v56, %v850_v9  ;;  %v740_v5 = vsel %vm554_vm6, %v732_v50, 0  ;;  %2579 = vrcp.f32 %v2750_v37 }
 0x684   :  { %2393 = vmatmul.msk.bf16.gmra.mxu2 %vm146_vm0, %v853_v12 }
 0x687   :  { %v2578_v15 = vpop.eup %2577 }
 0x688   :  { %v547_v17 = vpop.permute.xlu2 %546  ;;  %v694_v20 = vmul.f32 %v2578_v15, %v2562_v40  ;;  %v2580_v35 = vpop.eup %2579 }
 0x689   :  { %v556_v16 = vsel %vm554_vm6, %v547_v17, 0  ;;  %v2680_v17 = vld [vmem:[%s3662_s0 + $0x10] sm:$0xff]  ;;  %v944_v50 = vmul.f32 32.0, %v2580_v35  ;;  %vm948_vm7 = vweird.f32 %v2580_v35 }
 0x68a   :  { %565 = vmatpush.bf16.msra.mxu0 %v556_v16  ;;  %v696_v21 = vpack.c.bf16 %v694_v20, %v693_v18 }
 0x68c   :  { %2387 = vmatmul.msk.bf16.gmra.mxu3 %vm146_vm0, %v696_v21 }
 0x68d   :  { %2380 = vmatmul.msk.bf16.vlgmr.msra.gmra.mxu0 %vm302_vm1, %v543_v24 }
 0x68e   :  { %749 = vmatpush.bf16.msrb.mxu0 %v740_v5  ;;  %v945_v5 = vsub.f32 1.0, %v944_v50 }
 0x69d   :  { %2381 = vmatmul.msk.bf16.gmra.mxu0 %vm302_vm1, %v544_v31 }
 0x6c6   :  { %v875_v2 = vpop.f32.mrf.mxu2 }
 0x6ca   :  { %v718_v14 = vpop.f32.mrf.mxu3 }
 0x6ce   :  { %v877_v22 = vpop.f32.mrf.mxu2 }
 0x6cf   :  { %v885_v10 = vpack.c.bf16 %v877_v22, %v875_v2  ;;  %v946_v2 = vmul.f32 %v2580_v35, %v945_v5 }
 0x6d1   :  { %2394 = vmatmul.msk.bf16.vlgmr.msrb.gmra.mxu3 %vm302_vm1, %v885_v10 }
 0x6d2   :  { %v720_v39 = vpop.f32.mrf.mxu3 }
 0x6d3   :  { %v728_v33 = vpack.c.bf16 %v720_v39, %v718_v14  ;;  %v947_v14 = vadd.f32 %v2580_v35, %v946_v2 }
 0x6d5   :  { %2388 = vmatmul.msk.bf16.vlgmr.msrb.gmra.mxu0 %vm302_vm1, %v728_v33  ;;  %v3154_v22 = vsel %vm948_vm7, %v2580_v35, %v947_v14 }
 0x707   :  { %v880_v42 = vpop.f32.mrf.mxu2 }
 0x70a   :  { %v567_v19 = vpop.f32.mrf.mxu0 }
 0x70b   :  { %v599_v52 = vadd.f32 %v3021_v8, %v567_v19 }
 0x70f   :  { %v723_v45 = vpop.f32.mrf.mxu3  ;;  %v882_v40 = vpop.f32.mrf.mxu2 }
 0x710   :  { %v886_v46 = vpack.c.bf16 %v882_v40, %v880_v42 }
 0x712   :  { %2395 = vmatmul.msk.bf16.gmra.mxu3 %vm302_vm1, %v886_v46  ;;  %v569_v47 = vpop.f32.mrf.mxu0 }
 0x713   :  { %v601_v25 = vadd.f32 %v3023_v53, %v569_v47 }
 0x717   :  { %v725_v48 = vpop.f32.mrf.mxu3 }
 0x718   :  { %v729_v36 = vpack.c.bf16 %v725_v48, %v723_v45 }
 0x71a   :  { %2389 = vmatmul.msk.bf16.gmra.mxu0 %vm302_vm1, %v729_v36  ;;  %v572_v23 = vpop.f32.mrf.mxu0 }
 0x71b   :  { %v604_v41 = vadd.f32 %v3029_v59, %v572_v23 }
 0x722   :  { %v574_v51 = vpop.f32.mrf.mxu0 }
 0x723   :  { %v606_v15 = vadd.f32 %v3035_v0, %v574_v51 }
 0x752   :  { %v751_v54 = vpop.f32.mrf.mxu0 }
 0x753   :  { %v761_v29 = vadd.f32 %v751_v54, %v599_v52 }
 0x754   :  { %v908_v58 = vpop.f32.mrf.mxu3 }
 0x755   :  { %v918_v60 = vadd.f32 %v908_v58, %v761_v29 }
 0x757   :  { %v923_v26 = vadd.f32 %v922_v57, %v918_v60 }
 0x759   :  { %v927_v11 = vadd.f32 %v2678_v43, %v923_v26 }
 0x75a   :  { %v753_v8 = vpop.f32.mrf.mxu0 }
 0x75b   :  { %v762_v62 = vadd.f32 %v753_v8, %v601_v25  ;;  %v931_v63 = vsel %vm146_vm0, %v927_v11, 0.0 }
 0x75c   :  { %v910_v1 = vpop.f32.mrf.mxu3  ;;  %932 = vadd.xlane.f32.xlu2 %v931_v63 }
 0x75d   :  { %v919_v3 = vadd.f32 %v910_v1, %v762_v62 }
 0x75f   :  { %v924_v4 = vadd.f32 %v922_v57, %v919_v3 }
 0x761   :  { %v928_v7 = vadd.f32 %v2679_v6, %v924_v4 }
 0x763   :  { %v934_v53 = vsel %vm146_vm0, %v928_v7, 0.0 }
 0x764   :  { %935 = vadd.xlane.f32.xlu0 %v934_v53 }
 0x795   :  { %v913_v9 = vpop.f32.mrf.mxu3 }
 0x797   :  { %v756_v56 = vpop.f32.mrf.mxu0 }
 0x798   :  { %v763_v12 = vadd.f32 %v756_v56, %v604_v41 }
 0x79a   :  { %v920_v61 = vadd.f32 %v913_v9, %v763_v12 }
 0x79c   :  { %v925_v13 = vadd.f32 %v922_v57, %v920_v61 }
 0x79d   :  { %v915_v24 = vpop.f32.mrf.mxu3 }
 0x79e   :  { %v929_v18 = vadd.f32 %v2680_v17, %v925_v13 }
 0x79f   :  { %v758_v20 = vpop.f32.mrf.mxu0 }
 0x7a0   :  { %v764_v16 = vadd.f32 %v758_v20, %v606_v15  ;;  %v937_v21 = vsel %vm146_vm0, %v929_v18, 0.0 }
 0x7a1   :  { %938 = vadd.xlane.f32.xlu1 %v937_v21 }
 0x7a2   :  { %v921_v27 = vadd.f32 %v915_v24, %v764_v16 }
 0x7a4   :  { %v926_v59 = vadd.f32 %v922_v57, %v921_v27 }
 0x7a6   :  { %v930_v31 = vadd.f32 %v2681_v28, %v926_v59  ;;  %v1026_v59 = vperm.slane %v3130_v55, 7 }
 0x7a8   :  { %v940_v0 = vsel %vm146_vm0, %v930_v31, 0.0 }
 0x7a9   :  { %941 = vadd.xlane.f32.xlu2 %v940_v0  ;;  %v3182_v0 = vld [vmem:[%s3666_s4 + $0x8] sm:$0x7] }
 0x7aa   :  { %v1031_v5 = vperm.slane %v3182_v0, 0 }
 0x7ba   :  { %1041 = vrot.lane.b32.xlu1 %v2876_v32, %s2743_s16 }
 0x7cf   :  { %v933_v10 = vpop.xlane.xlu2 %932 }
 0x7d0   :  { %v950_v39 = vmul.f32 %v3154_v22, %v933_v10 }
 0x7d2   :  { %v954_v33 = vsub.f32 %v927_v11, %v950_v39 }
 0x7d4   :  { %v958_v42 = vmul.f32 %v954_v33, %v954_v33 }
 0x7d6   :  { %v962_v45 = vsel %vm146_vm0, %v958_v42, 0.0 }
 0x7d7   :  { %963 = vadd.xlane.f32.xlu0 %v962_v45  ;;  %v936_v40 = vpop.xlane.xlu0 %935 }
 0x7d8   :  { %v951_v46 = vmul.f32 %v3154_v22, %v936_v40 }
 0x7da   :  { %v955_v48 = vsub.f32 %v928_v7, %v951_v46 }
 0x7dc   :  { %v959_v32 = vmul.f32 %v955_v48, %v955_v48 }
 0x7de   :  { %v965_v36 = vsel %vm146_vm0, %v959_v32, 0.0 }
 0x7df   :  { %966 = vadd.xlane.f32.xlu2 %v965_v36 }
 0x814   :  { %v939_v19 = vpop.xlane.xlu1 %938 }
 0x815   :  { %v952_v47 = vmul.f32 %v3154_v22, %v939_v19 }
 0x817   :  { %v3161_v23 = vsub.f32 %v929_v18, %v952_v47 }
 0x819   :  { %v960_v51 = vmul.f32 %v3161_v23, %v3161_v23 }
 0x81b   :  { %v968_v52 = vsel %vm146_vm0, %v960_v51, 0.0 }
 0x81c   :  { %969 = vadd.xlane.f32.xlu0 %v968_v52  ;;  %v942_v54 = vpop.xlane.xlu2 %941 }
 0x81d   :  { %v953_v29 = vmul.f32 %v3154_v22, %v942_v54 }
 0x81f   :  { %v3167_v57 = vsub.f32 %v930_v31, %v953_v29 }
 0x821   :  { %v961_v58 = vmul.f32 %v3167_v57, %v3167_v57 }
 0x823   :  { %v971_v60 = vsel %vm146_vm0, %v961_v58, 0.0 }
 0x824   :  { %972 = vadd.xlane.f32.xlu2 %v971_v60 }
 0x82c   :  { %v1042_v1 = vpop.permute.xlu1 %1041 }
 0x82d   :  { %1057 = vmatpush.bf16.msra.mxu0 %v1042_v1 }
 0x830   :  { %1039 = vrot.lane.b32.xlu0 %v2881_v34, %s2743_s16 }
 0x84a   :  { %v964_v25 = vpop.xlane.xlu0 %963 }
 0x84b   :  { %v974_v11 = vmul.f32 %v964_v25, %v3154_v22 }
 0x84d   :  { %v978_v62 = vadd.f32 1e-05, %v974_v11  ;;  %v2495_v11 = vld [vmem:[%s3665_s3 + $0x18] sm:$0xff] }
 0x84e   :  { %1112 = vmatpush.bf16.msra.mxu1 %v2495_v11 }
 0x84f   :  { %vm988_vm12 = vweird.f32 %v978_v62 }
 0x852   :  { %v967_v26 = vpop.xlane.xlu2 %966 }
 0x853   :  { %v975_v43 = vmul.f32 %v967_v26, %v3154_v22 }
 0x855   :  { %v979_v8 = vadd.f32 1e-05, %v975_v43 }
 0x857   :  { %2581 = vrsqrt.f32 %v979_v8  ;;  %vm998_vm10 = vweird.f32 %v979_v8 }
 0x858   :  { %2583 = vrsqrt.f32 %v978_v62 }
 0x85d   :  { %v2582_v63 = vpop.eup %2581 }
 0x85e   :  { %v2584_v3 = vpop.eup %2583  ;;  %v993_v4 = vmul.f32 %v2582_v63, %v979_v8  ;;  %vm999_vm8 = vweird.f32 %v2582_v63  ;;  %v2492_v8 = vld [vmem:[%s3665_s3] sm:$0xff] }
 0x85f   :  { %v983_v6 = vmul.f32 %v2584_v3, %v978_v62  ;;  %vm989_vm9 = vweird.f32 %v2584_v3  ;;  %vm1000_vm11 = vmor %vm998_vm10, %vm999_vm8 }
 0x860   :  { %v994_v7 = vmul.f32 %v2582_v63, %v993_v4  ;;  %vm990_vm13 = vmor %vm988_vm12, %vm989_vm9 }
 0x861   :  { %v984_v53 = vmul.f32 %v2584_v3, %v983_v6 }
 0x862   :  { %v995_v41 = vmul.f32 0.5, %v994_v7 }
 0x863   :  { %v985_v34 = vmul.f32 0.5, %v984_v53 }
 0x864   :  { %v996_v9 = vsub.f32 1.5, %v995_v41 }
 0x865   :  { %v986_v56 = vsub.f32 1.5, %v985_v34 }
 0x866   :  { %v997_v13 = vmul.f32 %v2582_v63, %v996_v9 }
 0x867   :  { %v987_v17 = vmul.f32 %v2584_v3, %v986_v56 }
 0x868   :  { %v1001_v18 = vsel %vm1000_vm11, %v2582_v63, %v997_v13  ;;  %v1038_v63 = vperm.slane %v3130_v55, 5  ;;  %vm1101_vm11 = vcmask 523264  }
 0x869   :  { %v991_v20 = vsel %vm990_vm13, %v2584_v3, %v987_v17  ;;  %v1023_v21 = vmul.f32 %v1001_v18, %v955_v48 }
 0x86a   :  { %v1022_v28 = vmul.f32 %v991_v20, %v954_v33 }
 0x86b   :  { %v1028_v35 = vmul.f32 %v1026_v59, %v1023_v21 }
 0x86c   :  { %v1027_v2 = vmul.f32 %v1026_v59, %v1022_v28 }
 0x86d   :  { %v3185_v10 = vadd.f32 %v1031_v5, %v1028_v35 }
 0x86e   :  { %v1032_v45 = vadd.f32 %v1031_v5, %v1027_v2 }
 0x870   :  { %v1036_v48 = vpack.c.bf16 %v3185_v10, %v1032_v45 }
 0x88f   :  { %v970_v12 = vpop.xlane.xlu0 %969 }
 0x890   :  { %v976_v61 = vmul.f32 %v970_v12, %v3154_v22 }
 0x892   :  { %v980_v15 = vadd.f32 1e-05, %v976_v61 }
 0x894   :  { %2585 = vrsqrt.f32 %v980_v15  ;;  %vm1008_vm15 = vweird.f32 %v980_v15 }
 0x897   :  { %v973_v16 = vpop.xlane.xlu2 %972 }
 0x898   :  { %v977_v24 = vmul.f32 %v973_v16, %v3154_v22 }
 0x89a   :  { %v2586_v27 = vpop.eup %2585  ;;  %v981_v31 = vadd.f32 1e-05, %v977_v24 }
 0x89b   :  { %v1003_v37 = vmul.f32 %v2586_v27, %v980_v15  ;;  %vm1009_vm14 = vweird.f32 %v2586_v27  ;;  %v1076_v15 = vperm.slane %v3130_v55, 6 }
 0x89c   :  { %2587 = vrsqrt.f32 %v981_v31  ;;  %vm1010_vm7 = vmor %vm1008_vm15, %vm1009_vm14  ;;  %vm1018_vm9 = vweird.f32 %v981_v31 }
 0x89d   :  { %v1004_v50 = vmul.f32 %v2586_v27, %v1003_v37 }
 0x89f   :  { %v1005_v14 = vmul.f32 0.5, %v1004_v50 }
 0x8a1   :  { %v1006_v39 = vsub.f32 1.5, %v1005_v14 }
 0x8a2   :  { %v2588_v42 = vpop.eup %2587  ;;  %v1040_v33 = vpop.permute.xlu0 %1039 }
 0x8a3   :  { %v1007_v40 = vmul.f32 %v2586_v27, %v1006_v39  ;;  %v1013_v46 = vmul.f32 %v2588_v42, %v981_v31  ;;  %1058 = vmatpush.bf16.msra.mxu0 %v1040_v33  ;;  %vm1019_vm8 = vweird.f32 %v2588_v42 }
 0x8a4   :  { %vm1020_vm10 = vmor %vm1018_vm9, %vm1019_vm8 }
 0x8a5   :  { %v1014_v32 = vmul.f32 %v2588_v42, %v1013_v46  ;;  %v1011_v36 = vsel %vm1010_vm7, %v2586_v27, %v1007_v40 }
 0x8a6   :  { %2396 = vmatmul.msk.bf16.vlgmr.msra.gmra.mxu0 %vm146_vm0, %v1036_v48  ;;  %v1024_v51 = vmul.f32 %v1011_v36, %v3161_v23  ;;  %v2494_v23 = vld [vmem:[%s3665_s3 + $0x10] sm:$0xff] }
 0x8a7   :  { %v1015_v19 = vmul.f32 0.5, %v1014_v32  ;;  %1113 = vmatpush.bf16.msra.mxu1 %v2494_v23 }
 0x8a8   :  { %v1029_v58 = vmul.f32 %v1026_v59, %v1024_v51 }
 0x8a9   :  { %v1016_v47 = vsub.f32 1.5, %v1015_v19 }
 0x8aa   :  { %v1034_v26 = vadd.f32 %v1031_v5, %v1029_v58 }
 0x8ab   :  { %v1017_v52 = vmul.f32 %v2588_v42, %v1016_v47 }
 0x8ad   :  { %v1021_v54 = vsel %vm1020_vm10, %v2588_v42, %v1017_v52 }
 0x8ae   :  { %v1025_v29 = vmul.f32 %v1021_v54, %v3167_v57  ;;  %v2493_v57 = vld [vmem:[%s3665_s3 + $0x8] sm:$0xff] }
 0x8af   :  { %1114 = vmatpush.bf16.msra.mxu1 %v2493_v57  ;;  %v2436_v57 = vld [vmem:[%s3664_s2 + $0x30] sm:$0xf] }
 0x8b0   :  { %v1030_v60 = vmul.f32 %v1026_v59, %v1025_v29 }
 0x8b2   :  { %v1035_v25 = vadd.f32 %v1031_v5, %v1030_v60 }
 0x8b3   :  { %1115 = vmatpush.bf16.msra.mxu1 %v2492_v8  ;;  %v2497_v8 = vld [vmem:[%s3664_s2 + $0x34] sm:$0xf0] }
 0x8b4   :  { %v1037_v43 = vpack.c.bf16 %v1035_v25, %v1034_v26 }
 0x8b6   :  { %2397 = vmatmul.msk.bf16.gmra.mxu0 %vm146_vm0, %v1037_v43  ;;  %v2419_v43 = vld [vmem:[%s3664_s2 + $0x38] sm:$0xff] }
 0x8b7   :  { %v3245_v23 = vunpack.c.h.b16 %v2419_v43 }
 0x923   :  { %v1060_v62 = vpop.f32.mrf.mxu0 }
 0x924   :  { %v1061_v1 = vadd.f32 %v1060_v62, %v1038_v63  ;;  %v2437_v62 = vor.u32 %v2497_v8, %v2436_v57 }
 0x926   :  { %v1070_v6 = vmax.f32 %v1061_v1, 0.0  ;;  %v2416_v1 = vld [vmem:[%s3664_s2 + $0x20] sm:$0xff]  ;;  %1273 = vmatpush.bf16.msra.mxu2 %v2437_v62 }
 0x92b   :  { %v1062_v3 = vpop.f32.mrf.mxu0 }
 0x92c   :  { %v1063_v4 = vadd.f32 %v1062_v3, %v1038_v63  ;;  %v2417_v3 = vld [vmem:[%s3664_s2 + $0x28] sm:$0xff] }
 0x92e   :  { %v1071_v7 = vmax.f32 %v1063_v4, 0.0 }
 0x930   :  { %v1074_v53 = vpack.c.bf16 %v1071_v7, %v1070_v6  ;;  %v3264_v6 = vunpack.c.h.b16 %v2416_v1  ;;  %v3266_v7 = vunpack.c.h.b16 %v2417_v3 }
 0x932   :  { %2414 = vmatmul.msk.bf16.vlgmr.msra.gmra.mxu1 %vm1101_vm11, %v1074_v53 }
 0x933   :  { %v1065_v41 = vpop.f32.mrf.mxu0 }
 0x934   :  { %v1066_v34 = vadd.f32 %v1065_v41, %v1038_v63  ;;  %v2432_v41 = vld [vmem:[%s3664_s2 + $0x20] sm:$0xf] }
 0x936   :  { %v1072_v12 = vmax.f32 %v1066_v34, 0.0  ;;  %v2496_v34 = vld [vmem:[%s3664_s2 + $0x24] sm:$0xf0] }
 0x93b   :  { %v1067_v9 = vpop.f32.mrf.mxu0 }
 0x93c   :  { %v1068_v56 = vadd.f32 %v1067_v9, %v1038_v63  ;;  %v2433_v9 = vor.u32 %v2496_v34, %v2432_v41 }
 0x93e   :  { %v1073_v61 = vmax.f32 %v1068_v56, 0.0  ;;  %v3279_v56 = vpack.c.b16 %v3266_v7, %v3264_v6  ;;  %1274 = vmatpush.bf16.msra.mxu2 %v2433_v9 }
 0x940   :  { %v1075_v13 = vpack.c.bf16 %v1073_v61, %v1072_v12 }
 0x942   :  { %2415 = vmatmul.msk.bf16.gmra.mxu1 %vm1101_vm11, %v1075_v13 }
 0x9af   :  { %v1117_v17 = vpop.f32.mrf.mxu1 }
 0x9b0   :  { %v1118_v18 = vadd.f32 %v1117_v17, %v1076_v15 }
 0x9b2   :  { %v1127_v20 = vadd.f32 %v1118_v18, %v1032_v45 }
 0x9b4   :  { %v1131_v16 = vsel %vm146_vm0, %v1127_v20, 0.0 }
 0x9b5   :  { %1132 = vadd.xlane.f32.xlu2 %v1131_v16 }
 0x9b7   :  { %v1119_v21 = vpop.f32.mrf.mxu1 }
 0x9b8   :  { %v1120_v24 = vadd.f32 %v1119_v21, %v1076_v15 }
 0x9ba   :  { %v1128_v27 = vadd.f32 %v1120_v24, %v3185_v10 }
 0x9bc   :  { %v1134_v59 = vsel %vm146_vm0, %v1128_v27, 0.0 }
 0x9bd   :  { %1135 = vadd.xlane.f32.xlu2 %v1134_v59 }
 0x9bf   :  { %v1122_v28 = vpop.f32.mrf.mxu1 }
 0x9c0   :  { %v1123_v31 = vadd.f32 %v1122_v28, %v1076_v15 }
 0x9c2   :  { %v1129_v37 = vadd.f32 %v1123_v31, %v1034_v26 }
 0x9c4   :  { %v1137_v35 = vsel %vm146_vm0, %v1129_v37, 0.0 }
 0x9c5   :  { %1138 = vadd.xlane.f32.xlu2 %v1137_v35 }
 0x9c7   :  { %v1124_v55 = vpop.f32.mrf.mxu1 }
 0x9c8   :  { %v1125_v50 = vadd.f32 %v1124_v55, %v1076_v15 }
 0x9ca   :  { %v1130_v5 = vadd.f32 %v1125_v50, %v1035_v25  ;;  %v2418_v25 = vld [vmem:[%s3664_s2 + $0x30] sm:$0xff] }
 0x9cb   :  { %v3243_v11 = vunpack.c.h.b16 %v2418_v25 }
 0x9cc   :  { %v1140_v2 = vsel %vm146_vm0, %v1130_v5, 0.0 }
 0x9cd   :  { %1141 = vadd.xlane.f32.xlu0 %v1140_v2  ;;  %v3255_v63 = vpack.c.b16 %v3245_v23, %v3243_v11 }
 0x9cf   :  { %1385 = vmatpush.bf16.msrb.mxu1 %v3255_v63 }
 0x9d3   :  { %1386 = vmatpush.bf16.msrb.mxu1 %v3279_v56 }
 0x9e1   :  { %1293 = vrot.lane.b32.xlu0 %v2433_v9, %s2742_s11 }
 0xa28   :  { %v1133_v14 = vpop.xlane.xlu2 %1132 }
 0xa29   :  { %v1143_v39 = vmul.f32 %v1133_v14, %v3154_v22 }
 0xa2b   :  { %v3214_v42 = vsub.f32 %v1127_v20, %v1143_v39 }
 0xa2d   :  { %v1151_v10 = vmul.f32 %v3214_v42, %v3214_v42 }
 0xa2f   :  { %v1155_v45 = vsel %vm146_vm0, %v1151_v10, 0.0  ;;  %v1219_v10 = vperm.slane %v3182_v0, 1 }
 0xa30   :  { %1156 = vadd.xlane.f32.xlu1 %v1155_v45  ;;  %v1136_v33 = vpop.xlane.xlu2 %1135 }
 0xa31   :  { %v1144_v40 = vmul.f32 %v1136_v33, %v3154_v22 }
 0xa33   :  { %v3220_v46 = vsub.f32 %v1128_v27, %v1144_v40 }
 0xa35   :  { %v1152_v48 = vmul.f32 %v3220_v46, %v3220_v46 }
 0xa37   :  { %v1158_v32 = vsel %vm146_vm0, %v1152_v48, 0.0 }
 0xa38   :  { %1159 = vadd.xlane.f32.xlu2 %v1158_v32  ;;  %v1139_v36 = vpop.xlane.xlu2 %1138 }
 0xa39   :  { %v1145_v19 = vmul.f32 %v1139_v36, %v3154_v22 }
 0xa3b   :  { %v3226_v47 = vsub.f32 %v1129_v37, %v1145_v19  ;;  %v1224_v19 = vperm.slane %v3182_v0, 2 }
 0xa3d   :  { %v1153_v51 = vmul.f32 %v3226_v47, %v3226_v47 }
 0xa3f   :  { %v1161_v52 = vsel %vm146_vm0, %v1153_v51, 0.0 }
 0xa40   :  { %v1142_v54 = vpop.xlane.xlu0 %1141  ;;  %1162 = vadd.xlane.f32.xlu2 %v1161_v52 }
 0xa41   :  { %v1146_v29 = vmul.f32 %v1142_v54, %v3154_v22 }
 0xa43   :  { %v3232_v58 = vsub.f32 %v1130_v5, %v1146_v29 }
 0xa45   :  { %v1154_v60 = vmul.f32 %v3232_v58, %v3232_v58 }
 0xa47   :  { %v1164_v26 = vsel %vm146_vm0, %v1154_v60, 0.0 }
 0xa48   :  { %1165 = vadd.xlane.f32.xlu2 %v1164_v26 }
 0xa49   :  { %1337 = vrot.lane.b32.xlu1 %v2437_v62, %s2743_s16 }
 0xa60   :  { %1295 = vrot.lane.b32.xlu2 %v2437_v62, %s2742_s11 }
 0xa68   :  { %1335 = vrot.lane.b32.xlu2 %v2433_v9, %s2743_s16 }
 0xaa3   :  { %v1157_v4 = vpop.xlane.xlu1 %1156 }
 0xaa4   :  { %v1167_v53 = vmul.f32 %v1157_v4, %v3154_v22 }
 0xaa6   :  { %v1171_v12 = vadd.f32 1e-05, %v1167_v53 }
 0xaa8   :  { %2589 = vrsqrt.f32 %v1171_v12  ;;  %vm1181_vm13 = vweird.f32 %v1171_v12 }
 0xaab   :  { %v1160_v61 = vpop.xlane.xlu2 %1159 }
 0xaac   :  { %v1168_v13 = vmul.f32 %v1160_v61, %v3154_v22 }
 0xaae   :  { %v2590_v15 = vpop.eup %2589  ;;  %v1172_v17 = vadd.f32 1e-05, %v1168_v13 }
 0xaaf   :  { %v1176_v18 = vmul.f32 %v2590_v15, %v1171_v12  ;;  %vm1182_vm12 = vweird.f32 %v2590_v15 }
 0xab0   :  { %2591 = vrsqrt.f32 %v1172_v17  ;;  %vm1183_vm14 = vmor %vm1181_vm13, %vm1182_vm12  ;;  %vm1191_vm7 = vweird.f32 %v1172_v17 }
 0xab1   :  { %v1177_v20 = vmul.f32 %v2590_v15, %v1176_v18 }
 0xab3   :  { %v1178_v16 = vmul.f32 0.5, %v1177_v20  ;;  %v1163_v21 = vpop.xlane.xlu2 %1162 }
 0xab4   :  { %v1169_v24 = vmul.f32 %v1163_v21, %v3154_v22 }
 0xab5   :  { %v1179_v27 = vsub.f32 1.5, %v1178_v16 }
 0xab6   :  { %v2592_v59 = vpop.eup %2591  ;;  %v1173_v28 = vadd.f32 1e-05, %v1169_v24 }
 0xab7   :  { %v1180_v31 = vmul.f32 %v2590_v15, %v1179_v27  ;;  %v1186_v37 = vmul.f32 %v2592_v59, %v1172_v17  ;;  %vm1192_vm15 = vweird.f32 %v2592_v59 }
 0xab8   :  { %2593 = vrsqrt.f32 %v1173_v28  ;;  %vm1193_vm8 = vmor %vm1191_vm7, %vm1192_vm15  ;;  %vm1201_vm10 = vweird.f32 %v1173_v28 }
 0xab9   :  { %v1187_v35 = vmul.f32 %v2592_v59, %v1186_v37  ;;  %v1184_v55 = vsel %vm1183_vm14, %v2590_v15, %v1180_v31  ;;  %v1294_v15 = vpop.permute.xlu0 %1293 }
 0xaba   :  { %v1215_v45 = vmul.f32 %v1184_v55, %v3214_v42 }
 0xabb   :  { %v1188_v50 = vmul.f32 0.5, %v1187_v35  ;;  %v1166_v5 = vpop.xlane.xlu2 %1165 }
 0xabc   :  { %v1170_v2 = vmul.f32 %v1166_v5, %v3154_v22  ;;  %v1220_v51 = vmul.f32 %v1219_v10, %v1215_v45 }
 0xabd   :  { %v1189_v14 = vsub.f32 1.5, %v1188_v50 }
 0xabe   :  { %v2594_v39 = vpop.eup %2593  ;;  %v1174_v33 = vadd.f32 1e-05, %v1170_v2  ;;  %v3291_v25 = vadd.f32 %v1224_v19, %v1220_v51 }
 0xabf   :  { %v1190_v40 = vmul.f32 %v2592_v59, %v1189_v14  ;;  %v1196_v48 = vmul.f32 %v2594_v39, %v1173_v28  ;;  %vm1202_vm9 = vweird.f32 %v2594_v39 }
 0xac0   :  { %2595 = vrsqrt.f32 %v1174_v33  ;;  %vm1203_vm12 = vmor %vm1201_vm10, %vm1202_vm9  ;;  %vm1211_vm14 = vweird.f32 %v1174_v33 }
 0xac1   :  { %v1194_v32 = vsel %vm1193_vm8, %v2592_v59, %v1190_v40  ;;  %v1197_v36 = vmul.f32 %v2594_v39, %v1196_v48 }
 0xac2   :  { %v1216_v52 = vmul.f32 %v1194_v32, %v3220_v46 }
 0xac3   :  { %v1198_v54 = vmul.f32 0.5, %v1197_v36 }
 0xac4   :  { %v1221_v29 = vmul.f32 %v1219_v10, %v1216_v52 }
 0xac5   :  { %v1199_v60 = vsub.f32 1.5, %v1198_v54 }
 0xac6   :  { %v2596_v26 = vpop.eup %2595  ;;  %v3293_v42 = vadd.f32 %v1224_v19, %v1221_v29 }
 0xac7   :  { %v1200_v43 = vmul.f32 %v2594_v39, %v1199_v60  ;;  %v1206_v57 = vmul.f32 %v2596_v26, %v1174_v33  ;;  %vm1212_vm13 = vweird.f32 %v2596_v26 }
 0xac8   :  { %v1246_v8 = vpack.c.bf16 %v3293_v42, %v3291_v25  ;;  %vm1213_vm15 = vmor %vm1211_vm14, %vm1212_vm13 }
 0xac9   :  { %v1207_v62 = vmul.f32 %v2596_v26, %v1206_v57  ;;  %v1204_v0 = vsel %vm1203_vm12, %v2594_v39, %v1200_v43 }
 0xaca   :  { %2438 = vmatmul.msk.bf16.vlgmr.msra.gmra.mxu2 %vm146_vm0, %v1246_v8  ;;  %2444 = vmatmul.msk.bf16.vlgmr.msrb.gmra.mxu1 %vm146_vm0, %v1246_v8  ;;  %v1217_v3 = vmul.f32 %v1204_v0, %v3226_v47  ;;  %v1296_v47 = vpop.permute.xlu2 %1295  ;;  %v1338_v8 = vpop.permute.xlu1 %1337 }
 0xacb   :  { %v1208_v46 = vmul.f32 0.5, %v1207_v62  ;;  %1311 = vmatpush.bf16.msra.mxu3 %v1296_v47  ;;  %1353 = vmatpush.bf16.msrb.mxu0 %v1338_v8 }
 0xacc   :  { %v1222_v34 = vmul.f32 %v1219_v10, %v1217_v3 }
 0xacd   :  { %v1209_v1 = vsub.f32 1.5, %v1208_v46 }
 0xace   :  { %v3301_v12 = vadd.f32 %v1224_v19, %v1222_v34  ;;  %v2683_v34 = vld [vmem:[#allocation2 + $0x8] sm:$0xff] }
 0xacf   :  { %v1210_v4 = vmul.f32 %v2596_v26, %v1209_v1  ;;  %1312 = vmatpush.bf16.msra.mxu3 %v1294_v15 }
 0xad1   :  { %v1214_v53 = vsel %vm1213_vm15, %v2596_v26, %v1210_v4  ;;  %v2682_v4 = vld [vmem:[#allocation2] sm:$0xff] }
 0xad2   :  { %v1218_v41 = vmul.f32 %v1214_v53, %v3232_v58  ;;  %v3312_v58 = vld [vmem:[%s3666_s4 + $0x10] sm:$0xff]  ;;  %v1336_v62 = vpop.permute.xlu2 %1335 }
 0xad3   :  { %v1248_v16 = vperm.slane %v3312_v58, 0  ;;  %v1370_v37 = vperm.slane %v3312_v58, 3  ;;  %1354 = vmatpush.bf16.msrb.mxu0 %v1336_v62  ;;  %v1292_v46 = vperm.slane %v3312_v58, 1 }
 0xad4   :  { %v1223_v9 = vmul.f32 %v1219_v10, %v1218_v41 }
 0xad6   :  { %v3303_v61 = vadd.f32 %v1224_v19, %v1223_v9 }
 0xad8   :  { %v1247_v13 = vpack.c.bf16 %v3303_v61, %v3301_v12 }
 0xada   :  { %2439 = vmatmul.msk.bf16.gmra.mxu2 %vm146_vm0, %v1247_v13  ;;  %2445 = vmatmul.msk.bf16.gmra.mxu1 %vm146_vm0, %v1247_v13 }
 0xb47   :  { %v1388_v17 = vpop.f32.mrf.mxu1 }
 0xb48   :  { %v1389_v10 = vadd.f32 %v1388_v17, %v1370_v37 }
 0xb4a   :  { %v1398_v36 = vpack.c.bf16 %v1389_v10, %v1389_v10 }
 0xb4c   :  { %v1501_v26 = vunpack.c.l.b16 %v1398_v36 }
 0xb4d   :  { %v1276_v18 = vpop.f32.mrf.mxu2 }
 0xb4e   :  { %v1277_v21 = vadd.f32 %v1276_v18, %v1248_v16 }
 0xb4f   :  { %v1390_v20 = vpop.f32.mrf.mxu1 }
 0xb50   :  { %v1286_v28 = vmax.f32 %v1277_v21, 0.0  ;;  %v1391_v5 = vadd.f32 %v1390_v20, %v1370_v37 }
 0xb52   :  { %v1399_v33 = vpack.c.bf16 %v1391_v5, %v1391_v5 }
 0xb54   :  { %v1502_v54 = vunpack.c.l.b16 %v1399_v33 }
 0xb55   :  { %v1278_v24 = vpop.f32.mrf.mxu2 }
 0xb56   :  { %v1279_v27 = vadd.f32 %v1278_v24, %v1248_v16  ;;  %v3320_v57 = vpack.c.b16 %v1502_v54, %v1501_v26 }
 0xb57   :  { %v1393_v59 = vpop.f32.mrf.mxu1 }
 0xb58   :  { %v1287_v31 = vmax.f32 %v1279_v27, 0.0  ;;  %v1394_v55 = vadd.f32 %v1393_v59, %v1370_v37  ;;  %v2685_v27 = vld [vmem:[#allocation2 + $0x18] sm:$0xff] }
 0xb5a   :  { %v1290_v35 = vpack.c.bf16 %v1287_v31, %v1286_v28  ;;  %v1400_v14 = vpack.c.bf16 %v1394_v55, %v1394_v55  ;;  %v1334_v55 = vperm.slane %v3312_v58, 2 }
 0xb5c   :  { %2440 = vmatmul.msk.bf16.vlgmr.msra.gmra.mxu3 %vm146_vm0, %v1290_v35  ;;  %v1503_v40 = vunpack.c.l.b16 %v1400_v14 }
 0xb5d   :  { %v1281_v50 = vpop.f32.mrf.mxu2 }
 0xb5e   :  { %v1282_v48 = vadd.f32 %v1281_v50, %v1248_v16 }
 0xb5f   :  { %v1395_v2 = vpop.f32.mrf.mxu1 }
 0xb60   :  { %v1396_v39 = vadd.f32 %v1395_v2, %v1370_v37  ;;  %v1288_v29 = vmax.f32 %v1282_v48, 0.0 }
 0xb62   :  { %v1401_v45 = vpack.c.bf16 %v1396_v39, %v1396_v39 }
 0xb64   :  { %v1504_v32 = vunpack.c.l.b16 %v1401_v45 }
 0xb65   :  { %v1283_v19 = vpop.f32.mrf.mxu2 }
 0xb66   :  { %v3317_v51 = vpack.c.b16 %v1504_v32, %v1503_v40  ;;  %v1284_v52 = vadd.f32 %v1283_v19, %v1248_v16  ;;  %v2684_v16 = vld [vmem:[#allocation2 + $0x10] sm:$0xff] }
 0xb68   :  { %v1289_v60 = vmax.f32 %v1284_v52, 0.0  ;;  %1521 = vmatpush.bf16.msrb.mxu3 %v3317_v51 }
 0xb6a   :  { %v1291_v43 = vpack.c.bf16 %v1289_v60, %v1288_v29 }
 0xb6c   :  { %2441 = vmatmul.msk.bf16.gmra.mxu3 %vm146_vm0, %v1291_v43 }
 0xb6d   :  { %1522 = vmatpush.bf16.msrb.mxu3 %v3320_v57 }
 0xbdf   :  { %v1314_v0 = vpop.f32.mrf.mxu3 }
 0xbe0   :  { %v1315_v1 = vadd.f32 %v1314_v0, %v1292_v46 }
 0xbe2   :  { %v1324_v53 = vmul.f32 %v2682_v4, %v1315_v1 }
 0xbe4   :  { %v1328_v13 = vadd.f32 %v1324_v53, %v3291_v25 }
 0xbe7   :  { %v1316_v3 = vpop.f32.mrf.mxu3 }
 0xbe8   :  { %v1317_v41 = vadd.f32 %v1316_v3, %v1292_v46 }
 0xbea   :  { %v1325_v9 = vmul.f32 %v2683_v34, %v1317_v41 }
 0xbec   :  { %v1329_v47 = vadd.f32 %v1325_v9, %v3293_v42 }
 0xbee   :  { %v1332_v15 = vpack.c.bf16 %v1329_v47, %v1328_v13 }
 0xbef   :  { %v1319_v17 = vpop.f32.mrf.mxu3 }
 0xbf0   :  { %2442 = vmatmul.msk.bf16.vlgmr.msrb.gmra.mxu0 %vm146_vm0, %v1332_v15  ;;  %v1320_v18 = vadd.f32 %v1319_v17, %v1292_v46 }
 0xbf2   :  { %v1326_v21 = vmul.f32 %v2684_v16, %v1320_v18 }
 0xbf4   :  { %v1330_v28 = vadd.f32 %v1326_v21, %v3301_v12 }
 0xbf7   :  { %v1321_v20 = vpop.f32.mrf.mxu3 }
 0xbf8   :  { %v1322_v24 = vadd.f32 %v1321_v20, %v1292_v46 }
 0xbfa   :  { %v1327_v59 = vmul.f32 %v2685_v27, %v1322_v24 }
 0xbfc   :  { %v1331_v31 = vadd.f32 %v1327_v59, %v3303_v61 }
 0xbfe   :  { %v1333_v37 = vpack.c.bf16 %v1331_v31, %v1330_v28 }
 0xc00   :  { %2443 = vmatmul.msk.bf16.gmra.mxu0 %vm146_vm0, %v1333_v37 }
 0xc6d   :  { %v1356_v35 = vpop.f32.mrf.mxu0 }
 0xc6e   :  { %v1357_v50 = vadd.f32 %v1356_v35, %v1334_v55 }
 0xc70   :  { %v1366_v2 = vpack.c.bf16 %v1357_v50, %v1357_v50 }
 0xc72   :  { %v1406_v10 = vunpack.c.l.b16 %v1366_v2 }
 0xc75   :  { %v1358_v5 = vpop.f32.mrf.mxu0 }
 0xc76   :  { %v1359_v14 = vadd.f32 %v1358_v5, %v1334_v55 }
 0xc78   :  { %v1367_v39 = vpack.c.bf16 %v1359_v14, %v1359_v14 }
 0xc7a   :  { %v1407_v45 = vunpack.c.l.b16 %v1367_v39 }
 0xc7c   :  { %v3332_v33 = vpack.c.b16 %v1407_v45, %v1406_v10 }
 0xc7d   :  { %v1361_v40 = vpop.f32.mrf.mxu0 }
 0xc7e   :  { %1412 = vrot.lane.b32.xlu2 %v3332_v33, %s2742_s11  ;;  %v1362_v48 = vadd.f32 %v1361_v40, %v1334_v55  ;;  %v1689_v40 = vpack.c.b16 %v3264_v6, %v3264_v6 }
 0xc80   :  { %v1368_v36 = vpack.c.bf16 %v1362_v48, %v1362_v48 }
 0xc82   :  { %v1408_v54 = vunpack.c.l.b16 %v1368_v36 }
 0xc85   :  { %v1363_v32 = vpop.f32.mrf.mxu0 }
 0xc86   :  { %v1364_v19 = vadd.f32 %v1363_v32, %v1334_v55 }
 0xc88   :  { %v1369_v52 = vpack.c.bf16 %v1364_v19, %v1364_v19 }
 0xc8a   :  { %v1409_v29 = vunpack.c.l.b16 %v1369_v52 }
 0xc8c   :  { %v3336_v60 = vpack.c.b16 %v1409_v29, %v1408_v54 }
 0xc8e   :  { %1414 = vrot.lane.b32.xlu0 %v3336_v60, %s2742_s11 }
 0xcd8   :  { %v1413_v8 = vpop.permute.xlu2 %1412 }
 0xcd9   :  { %v1423_v62 = vsel %vm302_vm1, %v1413_v8, 0 }
 0xd00   :  { %v1415_v26 = vpop.permute.xlu0 %1414 }
 0xd01   :  { %v1426_v43 = vsel %vm302_vm1, %v1415_v26, 0 }
 0xd02   :  { %1434 = vmatpush.bf16.xpose.msrb.mxu2 %v1426_v43 }
 0xd0a   :  { %1435 = vmatpush.bf16.xpose.msrb.mxu2 %v1423_v62 }
 0xd11   :  { %2446 = vmatmul.msk.bf16.vlgmr.msrb.gmra.mxu2 %vm302_vm1, %v3332_v33 }
 0xd21   :  { %2447 = vmatmul.msk.bf16.gmra.mxu2 %vm302_vm1, %v3336_v60 }
 0xd94   :  { %v1437_v0 = vpop.f32.mrf.mxu2 }
 0xd95   :  { %v1447_v46 = vsel %vm2870_vm2, %v1437_v0, -1e+30 }
 0xd96   :  { %v1451_v1 = vsel %vm146_vm0, %v1447_v46, -inf }
 0xd97   :  { %1452 = vmax.xlane.f32.xlu1 %v1451_v1 }
 0xd9c   :  { %v1439_v3 = vpop.f32.mrf.mxu2 }
 0xd9d   :  { %v1448_v4 = vsel %vm2887_vm3, %v1439_v3, -1e+30 }
 0xd9e   :  { %v1454_v53 = vsel %vm146_vm0, %v1448_v4, -inf }
 0xd9f   :  { %1455 = vmax.xlane.f32.xlu0 %v1454_v53 }
 0xda4   :  { %v1442_v41 = vpop.f32.mrf.mxu2 }
 0xda5   :  { %v1449_v34 = vsel %vm2896_vm4, %v1442_v41, -1e+30 }
 0xda6   :  { %v1457_v9 = vsel %vm146_vm0, %v1449_v34, -inf }
 0xda7   :  { %1458 = vmax.xlane.f32.xlu2 %v1457_v9 }
 0xdac   :  { %v1444_v13 = vpop.f32.mrf.mxu2 }
 0xdad   :  { %v1450_v47 = vsel %vm2903_vm5, %v1444_v13, -1e+30 }
 0xdae   :  { %v1460_v15 = vsel %vm146_vm0, %v1450_v47, -inf }
 0xdaf   :  { %1461 = vmax.xlane.f32.xlu1 %v1460_v15 }
 0xe0a   :  { %v1453_v17 = vpop.xlane.xlu1 %1452 }
 0xe0b   :  { %v1463_v18 = vsub.f32 %v1447_v46, %v1453_v17 }
 0xe0d   :  { %v1467_v20 = vmul.f32 1.442695, %v1463_v18 }
 0xe0f   :  { %2597 = vpow2.f32 %v1467_v20 }
 0xe12   :  { %v1456_v16 = vpop.xlane.xlu0 %1455 }
 0xe13   :  { %v1464_v21 = vsub.f32 %v1448_v4, %v1456_v16 }
 0xe15   :  { %v2598_v24 = vpop.eup %2597  ;;  %v1469_v27 = vmul.f32 1.442695, %v1464_v21 }
 0xe16   :  { %v1475_v59 = vsel %vm146_vm0, %v2598_v24, 0.0 }
 0xe17   :  { %2599 = vpow2.f32 %v1469_v27  ;;  %1476 = vadd.xlane.f32.xlu2 %v1475_v59 }
 0xe1a   :  { %v1459_v28 = vpop.xlane.xlu2 %1458 }
 0xe1b   :  { %v1465_v31 = vsub.f32 %v1449_v34, %v1459_v28 }
 0xe1d   :  { %v2600_v37 = vpop.eup %2599  ;;  %v1471_v35 = vmul.f32 1.442695, %v1465_v31 }
 0xe1e   :  { %v1478_v55 = vsel %vm146_vm0, %v2600_v37, 0.0 }
 0xe1f   :  { %2601 = vpow2.f32 %v1471_v35  ;;  %1479 = vadd.xlane.f32.xlu0 %v1478_v55 }
 0xe22   :  { %v1462_v50 = vpop.xlane.xlu1 %1461 }
 0xe23   :  { %v1466_v5 = vsub.f32 %v1450_v47, %v1462_v50 }
 0xe25   :  { %v2602_v2 = vpop.eup %2601  ;;  %v1473_v14 = vmul.f32 1.442695, %v1466_v5 }
 0xe26   :  { %v1481_v39 = vsel %vm146_vm0, %v2602_v2, 0.0 }
 0xe27   :  { %2603 = vpow2.f32 %v1473_v14  ;;  %1482 = vadd.xlane.f32.xlu1 %v1481_v39 }
 0xe2d   :  { %v2604_v10 = vpop.eup %2603 }
 0xe2e   :  { %v1484_v45 = vsel %vm146_vm0, %v2604_v10, 0.0 }
 0xe2f   :  { %1485 = vadd.xlane.f32.xlu2 %v1484_v45 }
 0xe33   :  { %1542 = vrot.lane.b32.xlu0 %v3336_v60, %s2744_s1 }
 0xe3b   :  { %1536 = vrot.lane.b32.xlu0 %v3332_v33, %s2745_s29 }
 0xe40   :  { %1540 = vrot.lane.b32.xlu1 %v3332_v33, %s2744_s1 }
 0xe43   :  { %1538 = vrot.lane.b32.xlu0 %v3336_v60, %s2745_s29 }
 0xe47   :  { %1690 = vrot.lane.b32.xlu2 %v1689_v40, %s2742_s11 }
 0xe48   :  { %1726 = vrot.lane.b32.xlu1 %v3336_v60, %s2746_s30 }
 0xe4b   :  { %1724 = vrot.lane.b32.xlu0 %v3332_v33, %s2746_s30 }
 0xe4f   :  { %1883 = vrot.lane.b32.xlu2 %v3336_v60, %s2747_s6 }
 0xe50   :  { %1881 = vrot.lane.b32.xlu1 %v3332_v33, %s2747_s6 }
 0xe53   :  { %1877 = vrot.lane.b32.xlu0 %v3332_v33, %s2749_s8 }
 0xe57   :  { %1720 = vrot.lane.b32.xlu2 %v3332_v33, %s2748_s7 }
 0xe58   :  { %1722 = vrot.lane.b32.xlu1 %v3336_v60, %s2748_s7 }
 0xe5f   :  { %1879 = vrot.lane.b32.xlu2 %v3336_v60, %s2749_s8 }
 0xe8a   :  { %v1477_v6 = vpop.xlane.xlu2 %1476 }
 0xe8b   :  { %2605 = vrcp.f32 %v1477_v6 }
 0xe91   :  { %v2606_v32 = vpop.eup %2605 }
 0xe92   :  { %v1480_v48 = vpop.xlane.xlu0 %1479  ;;  %v1491_v19 = vmul.f32 %v2606_v32, %v2598_v24 }
 0xe93   :  { %2607 = vrcp.f32 %v1480_v48 }
 0xe99   :  { %v2608_v36 = vpop.eup %2607 }
 0xe9a   :  { %v1492_v52 = vmul.f32 %v2608_v36, %v2600_v37  ;;  %v1483_v29 = vpop.xlane.xlu1 %1482 }
 0xe9b   :  { %2609 = vrcp.f32 %v1483_v29 }
 0xe9c   :  { %v1495_v54 = vpack.c.bf16 %v1492_v52, %v1491_v19 }
 0xe9e   :  { %2448 = vmatmul.msk.bf16.vlgmr.msrb.gmra.mxu3 %vm146_vm0, %v1495_v54 }
 0xea1   :  { %v2610_v8 = vpop.eup %2609 }
 0xea2   :  { %v1486_v33 = vpop.xlane.xlu2 %1485  ;;  %v1493_v0 = vmul.f32 %v2610_v8, %v2602_v2 }
 0xea3   :  { %2611 = vrcp.f32 %v1486_v33 }
 0xea5   :  { %v1543_v26 = vpop.permute.xlu0 %1542 }
 0xea6   :  { %v1554_v43 = vsel %vm302_vm1, %v1543_v26, 0 }
 0xea7   :  { %1562 = vmatpush.bf16.xpose.msra.mxu0 %v1554_v43 }
 0xea9   :  { %v2612_v60 = vpop.eup %2611 }
 0xeaa   :  { %v1691_v62 = vpop.permute.xlu2 %1690  ;;  %v1494_v46 = vmul.f32 %v2612_v60, %v2604_v10 }
 0xeab   :  { %v1699_v1 = vsel %vm554_vm6, %v1691_v62, 0 }
 0xeac   :  { %v1496_v3 = vpack.c.bf16 %v1494_v46, %v1493_v0  ;;  %1708 = vmatpush.bf16.msra.mxu3 %v1699_v1 }
 0xead   :  { %v1537_v4 = vpop.permute.xlu0 %1536 }
 0xeae   :  { %2449 = vmatmul.msk.bf16.gmra.mxu3 %vm146_vm0, %v1496_v3 }
 0xeb2   :  { %v1884_v53 = vpop.permute.xlu2 %1883  ;;  %v1541_v41 = vpop.permute.xlu1 %1540 }
 0xeb3   :  { %v1895_v34 = vsel %vm302_vm1, %v1884_v53, 0  ;;  %v1551_v9 = vsel %vm302_vm1, %v1541_v41, 0 }
 0xeb4   :  { %1563 = vmatpush.bf16.xpose.msra.mxu0 %v1551_v9  ;;  %1903 = vmatpush.bf16.xpose.msrb.mxu3 %v1895_v34 }
 0xeb5   :  { %v1539_v13 = vpop.permute.xlu0 %1538 }
 0xeba   :  { %v1727_v47 = vpop.permute.xlu1 %1726  ;;  %v1721_v21 = vpop.permute.xlu2 %1720 }
 0xebb   :  { %v1738_v15 = vsel %vm302_vm1, %v1727_v47, 0  ;;  %2450 = vmatmul.msk.bf16.vlgmr.msra.gmra.mxu0 %vm302_vm1, %v1537_v4 }
 0xebc   :  { %1746 = vmatpush.bf16.xpose.msrb.mxu0 %v1738_v15 }
 0xebd   :  { %v1725_v17 = vpop.permute.xlu0 %1724 }
 0xebe   :  { %v1735_v20 = vsel %vm302_vm1, %v1725_v17, 0 }
 0xec2   :  { %v1882_v18 = vpop.permute.xlu1 %1881  ;;  %v1880_v29 = vpop.permute.xlu2 %1879 }
 0xec3   :  { %v1892_v16 = vsel %vm302_vm1, %v1882_v18, 0 }
 0xec4   :  { %1747 = vmatpush.bf16.xpose.msrb.mxu0 %v1735_v20  ;;  %1904 = vmatpush.bf16.xpose.msrb.mxu3 %v1892_v16 }
 0xec5   :  { %v1878_v6 = vpop.permute.xlu0 %1877 }
 0xeca   :  { %v1723_v24 = vpop.permute.xlu1 %1722 }
 0xecb   :  { %2451 = vmatmul.msk.bf16.gmra.mxu0 %vm302_vm1, %v1539_v13 }
 0xedb   :  { %2458 = vmatmul.msk.bf16.vlgmr.msrb.gmra.mxu0 %vm302_vm1, %v1721_v21 }
 0xeeb   :  { %2459 = vmatmul.msk.bf16.gmra.mxu0 %vm302_vm1, %v1723_v24 }
 0xf21   :  { %v1524_v27 = vpop.f32.mrf.mxu3 }
 0xf29   :  { %v1526_v59 = vpop.f32.mrf.mxu3 }
 0xf2a   :  { %v1534_v28 = vpack.c.bf16 %v1526_v59, %v1524_v27 }
 0xf2c   :  { %2456 = vmatmul.msk.bf16.vlgmr.msra.gmra.mxu3 %vm302_vm1, %v1534_v28 }
 0xf31   :  { %v1529_v31 = vpop.f32.mrf.mxu3 }
 0xf38   :  { %v1565_v37 = vpop.f32.mrf.mxu0 }
 0xf39   :  { %v1575_v35 = vsel %vm2870_vm2, %v1565_v37, -1e+30  ;;  %v1531_v55 = vpop.f32.mrf.mxu3 }
 0xf3a   :  { %v1535_v50 = vpack.c.bf16 %v1531_v55, %v1529_v31  ;;  %v1579_v5 = vsel %vm146_vm0, %v1575_v35, -inf }
 0xf3b   :  { %1580 = vmax.xlane.f32.xlu0 %v1579_v5 }
 0xf3c   :  { %2457 = vmatmul.msk.bf16.gmra.mxu3 %vm302_vm1, %v1535_v50 }
 0xf40   :  { %v1567_v2 = vpop.f32.mrf.mxu0 }
 0xf41   :  { %v1576_v14 = vsel %vm2887_vm3, %v1567_v2, -1e+30 }
 0xf42   :  { %v1582_v39 = vsel %vm146_vm0, %v1576_v14, -inf }
 0xf43   :  { %1583 = vmax.xlane.f32.xlu1 %v1582_v39 }
 0xf48   :  { %v1570_v10 = vpop.f32.mrf.mxu0 }
 0xf49   :  { %v1577_v45 = vsel %vm2896_vm4, %v1570_v10, -1e+30 }
 0xf4a   :  { %v1585_v40 = vsel %vm146_vm0, %v1577_v45, -inf }
 0xf4b   :  { %1586 = vmax.xlane.f32.xlu2 %v1585_v40 }
 0xf4c   :  { %2464 = vmatmul.msk.bf16.vlgmr.msrb.gmra.mxu3 %vm302_vm1, %v1878_v6 }
 0xf50   :  { %v1572_v48 = vpop.f32.mrf.mxu0 }
 0xf51   :  { %v1578_v32 = vsel %vm2903_vm5, %v1572_v48, -1e+30 }
 0xf52   :  { %v1588_v36 = vsel %vm146_vm0, %v1578_v32, -inf }
 0xf53   :  { %1589 = vmax.xlane.f32.xlu0 %v1588_v36 }
 0xf58   :  { %v1749_v19 = vpop.f32.mrf.mxu0 }
 0xf59   :  { %v1759_v52 = vsel %vm2870_vm2, %v1749_v19, -1e+30 }
 0xf5a   :  { %v1763_v54 = vsel %vm146_vm0, %v1759_v52, -inf }
 0xf5b   :  { %1764 = vmax.xlane.f32.xlu2 %v1763_v54 }
 0xf5c   :  { %2465 = vmatmul.msk.bf16.gmra.mxu3 %vm302_vm1, %v1880_v29 }
 0xf60   :  { %v1751_v33 = vpop.f32.mrf.mxu0 }
 0xf61   :  { %v1760_v26 = vsel %vm2887_vm3, %v1751_v33, -1e+30 }
 0xf62   :  { %v1766_v43 = vsel %vm146_vm0, %v1760_v26, -inf }
 0xf63   :  { %1767 = vmax.xlane.f32.xlu1 %v1766_v43 }
 0xf68   :  { %v1754_v8 = vpop.f32.mrf.mxu0 }
 0xf69   :  { %v3426_v60 = vsel %vm2896_vm4, %v1754_v8, -1e+30 }
 0xf6a   :  { %v1769_v62 = vsel %vm146_vm0, %v3426_v60, -inf }
 0xf6b   :  { %1770 = vmax.xlane.f32.xlu1 %v1769_v62 }
 0xf70   :  { %v1756_v0 = vpop.f32.mrf.mxu0 }
 0xf71   :  { %v3432_v46 = vsel %vm2903_vm5, %v1756_v0, -1e+30 }
 0xf72   :  { %v1772_v1 = vsel %vm146_vm0, %v3432_v46, -inf }
 0xf73   :  { %1773 = vmax.xlane.f32.xlu0 %v1772_v1 }
 0xf87   :  { %1625 = vrot.lane.b32.xlu0 %v3320_v57, %s2745_s29 }
 0xfae   :  { %v1581_v3 = vpop.xlane.xlu0 %1580 }
 0xfaf   :  { %v1591_v4 = vsub.f32 %v1575_v35, %v1581_v3  ;;  %v3438_v53 = vpop.f32.mrf.mxu3 }
 0xfb1   :  { %v1595_v41 = vmul.f32 1.442695, %v1591_v4 }
 0xfb3   :  { %2613 = vpow2.f32 %v1595_v41 }
 0xfb6   :  { %v1584_v34 = vpop.xlane.xlu1 %1583 }
 0xfb7   :  { %v1592_v9 = vsub.f32 %v1576_v14, %v1584_v34  ;;  %v3440_v13 = vpop.f32.mrf.mxu3 }
 0xfb9   :  { %v3442_v47 = vpop.eup %2613  ;;  %v1597_v15 = vmul.f32 1.442695, %v1592_v9 }
 0xfba   :  { %v1603_v17 = vsel %vm146_vm0, %v3442_v47, 0.0 }
 0xfbb   :  { %2615 = vpow2.f32 %v1597_v15  ;;  %1604 = vadd.xlane.f32.xlu2 %v1603_v17 }
 0xfbe   :  { %v1587_v18 = vpop.xlane.xlu2 %1586 }
 0xfbf   :  { %v1593_v20 = vsub.f32 %v1577_v45, %v1587_v18  ;;  %v3446_v16 = vpop.f32.mrf.mxu3 }
 0xfc1   :  { %v3448_v21 = vpop.eup %2615  ;;  %v1599_v24 = vmul.f32 1.442695, %v1593_v20 }
 0xfc2   :  { %v1606_v27 = vsel %vm146_vm0, %v3448_v21, 0.0 }
 0xfc3   :  { %2617 = vpow2.f32 %v1599_v24  ;;  %1607 = vadd.xlane.f32.xlu1 %v1606_v27 }
 0xfc6   :  { %v1590_v59 = vpop.xlane.xlu0 %1589 }
 0xfc7   :  { %v1594_v28 = vsub.f32 %v1578_v32, %v1590_v59  ;;  %v3452_v31 = vpop.f32.mrf.mxu3 }
 0xfc9   :  { %v3454_v37 = vpop.eup %2617  ;;  %v1601_v35 = vmul.f32 1.442695, %v1594_v28 }
 0xfca   :  { %v1609_v55 = vsel %vm146_vm0, %v3454_v37, 0.0 }
 0xfcb   :  { %2619 = vpow2.f32 %v1601_v35  ;;  %1610 = vadd.xlane.f32.xlu2 %v1609_v55 }
 0xfce   :  { %v1765_v50 = vpop.xlane.xlu2 %1764 }
 0xfcf   :  { %v1775_v5 = vsub.f32 %v1759_v52, %v1765_v50  ;;  %v1906_v2 = vpop.f32.mrf.mxu3 }
 0xfd0   :  { %v1916_v14 = vsel %vm2870_vm2, %v1906_v2, -1e+30 }
 0xfd1   :  { %v3460_v39 = vpop.eup %2619  ;;  %v1779_v10 = vmul.f32 1.442695, %v1775_v5  ;;  %v1920_v45 = vsel %vm146_vm0, %v1916_v14, -inf }
 0xfd2   :  { %1921 = vmax.xlane.f32.xlu0 %v1920_v45  ;;  %v1612_v40 = vsel %vm146_vm0, %v3460_v39, 0.0 }
 0xfd3   :  { %2621 = vpow2.f32 %v1779_v10  ;;  %1613 = vadd.xlane.f32.xlu2 %v1612_v40 }
 0xfd6   :  { %v1768_v6 = vpop.xlane.xlu1 %1767 }
 0xfd7   :  { %v1776_v48 = vsub.f32 %v1760_v26, %v1768_v6  ;;  %v1908_v19 = vpop.f32.mrf.mxu3 }
 0xfd8   :  { %v3494_v44 = vsel %vm2887_vm3, %v1908_v19, -1e+30 }
 0xfd9   :  { %v3465_v32 = vpop.eup %2621  ;;  %v1781_v36 = vmul.f32 1.442695, %v1776_v48  ;;  %v1923_v1 = vsel %vm146_vm0, %v3494_v44, -inf }
 0xfda   :  { %v1787_v30 = vsel %vm146_vm0, %v3465_v32, 0.0 }
 0xfdb   :  { %2623 = vpow2.f32 %v1781_v36  ;;  %1788 = vadd.xlane.f32.xlu2 %v1787_v30 }
 0xfdc   :  { %1627 = vrot.lane.b32.xlu1 %v3317_v51, %s2745_s29 }
 0xfde   :  { %v1771_v52 = vpop.xlane.xlu1 %1770 }
 0xfdf   :  { %v1777_v29 = vsub.f32 %v3426_v60, %v1771_v52  ;;  %v1911_v26 = vpop.f32.mrf.mxu3 }
 0xfe0   :  { %v3480_v8 = vsel %vm2896_vm4, %v1911_v26, -1e+30 }
 0xfe1   :  { %v3471_v54 = vpop.eup %2623  ;;  %v1783_v43 = vmul.f32 1.442695, %v1777_v29  ;;  %v1926_v62 = vsel %vm146_vm0, %v3480_v8, -inf }
 0xfe2   :  { %v1790_v33 = vsel %vm146_vm0, %v3471_v54, 0.0 }
 0xfe3   :  { %1791 = vadd.xlane.f32.xlu0 %v1790_v33  ;;  %2625 = vpow2.f32 %v1783_v43 }
 0xfe4   :  { %1811 = vrot.lane.b32.xlu1 %v3317_v51, %s2748_s7 }
 0xfe7   :  { %v1913_v3 = vpop.f32.mrf.mxu3 }
 0xfe8   :  { %v3500_v4 = vsel %vm2903_vm5, %v1913_v3, -1e+30 }
 0xfe9   :  { %v3484_v0 = vpop.eup %2625  ;;  %v1929_v41 = vsel %vm146_vm0, %v3500_v4, -inf }
 0xfea   :  { %v1793_v60 = vsel %vm146_vm0, %v3484_v0, 0.0 }
 0xfeb   :  { %1927 = vmax.xlane.f32.xlu0 %v1926_v62 }
 0xff3   :  { %1809 = vrot.lane.b32.xlu2 %v3320_v57, %s2748_s7  ;;  %1794 = vadd.xlane.f32.xlu0 %v1793_v60 }
0x1007   :  { %1966 = vrot.lane.b32.xlu0 %v3320_v57, %s2749_s8  ;;  %v1774_v57 = vpop.xlane.xlu0 %1773 }
0x1008   :  { %v1778_v5 = vsub.f32 %v3432_v46, %v1774_v57 }
0x100a   :  { %v1785_v45 = vmul.f32 1.442695, %v1778_v5 }
0x100f   :  { %v1626_v17 = vpop.permute.xlu0 %1625 }
0x101c   :  { %1924 = vmax.xlane.f32.xlu2 %v1923_v1 }
0x1024   :  { %1930 = vmax.xlane.f32.xlu2 %v1929_v41 }
0x102e   :  { %v1605_v34 = vpop.xlane.xlu2 %1604 }
0x1036   :  { %v1608_v9 = vpop.xlane.xlu1 %1607 }
0x1037   :  { %2627 = vrcp.f32 %v1608_v9 }
0x1038   :  { %2629 = vrcp.f32 %v1605_v34 }
0x103c   :  { %1968 = vrot.lane.b32.xlu2 %v3317_v51, %s2749_s8 }
0x103d   :  { %v2628_v18 = vpop.eup %2627 }
0x103e   :  { %v1611_v38 = vpop.xlane.xlu2 %1610  ;;  %v2630_v49 = vpop.eup %2629  ;;  %v1620_v24 = vmul.f32 %v2628_v18, %v3448_v21  ;;  %v1842_v18 = vpack.c.b16 %v3243_v11, %v3243_v11 }
0x103f   :  { %v1619_v28 = vmul.f32 %v2630_v49, %v3442_v47 }
0x1040   :  { %1843 = vrot.lane.b32.xlu0 %v1842_v18, %s2742_s11 }
0x1041   :  { %v1623_v51 = vpack.c.bf16 %v1620_v24, %v1619_v28 }
0x1045   :  { %v1922_v27 = vpop.xlane.xlu0 %1921 }
0x1046   :  { %v1614_v15 = vpop.xlane.xlu2 %1613  ;;  %v1932_v35 = vsub.f32 %v1916_v14, %v1922_v27 }
0x1047   :  { %2631 = vrcp.f32 %v1614_v15 }
0x1048   :  { %v1936_v55 = vmul.f32 1.442695, %v1932_v35  ;;  %2633 = vrcp.f32 %v1611_v38 }
0x104a   :  { %2635 = vpow2.f32 %v1936_v55 }
0x104b   :  { %2637 = vpow2.f32 %v1785_v45 }
0x104d   :  { %v2632_v21 = vpop.eup %2631 }
0x104e   :  { %v1628_v20 = vpop.permute.xlu1 %1627  ;;  %v1789_v59 = vpop.xlane.xlu2 %1788  ;;  %v1622_v47 = vmul.f32 %v2632_v21, %v3460_v39 }
0x104f   :  { %1643 = vmatpush.bf16.msra.mxu1 %v1628_v20  ;;  %v2634_v10 = vpop.eup %2633 }
0x1050   :  { %v3511_v14 = vpop.eup %2635  ;;  %v1621_v40 = vmul.f32 %v2634_v10, %v3454_v37 }
0x1051   :  { %v1944_v48 = vsel %vm146_vm0, %v3511_v14, 0.0  ;;  %v2638_v46 = vpop.eup %2637 }
0x1052   :  { %v1624_v36 = vpack.c.bf16 %v1622_v47, %v1621_v40  ;;  %v1796_v19 = vsel %vm146_vm0, %v2638_v46, 0.0 }
0x1053   :  { %1644 = vmatpush.bf16.msra.mxu1 %v1626_v17 }
0x1056   :  { %2452 = vmatmul.msk.bf16.vlgmr.msra.gmra.mxu1 %vm146_vm0, %v1623_v51  ;;  %v1812_v50 = vpop.permute.xlu1 %1811  ;;  %v1810_v2 = vpop.permute.xlu2 %1809 }
0x1057   :  { %1827 = vmatpush.bf16.msrb.mxu1 %v1812_v50  ;;  %v1792_v6 = vpop.xlane.xlu0 %1791 }
0x1058   :  { %2639 = vrcp.f32 %v1792_v6 }
0x1059   :  { %2641 = vrcp.f32 %v1789_v59 }
0x105b   :  { %1828 = vmatpush.bf16.msrb.mxu1 %v1810_v2 }
0x105e   :  { %v2640_v30 = vpop.eup %2639 }
0x105f   :  { %v2642_v39 = vpop.eup %2641  ;;  %v1804_v52 = vmul.f32 %v2640_v30, %v3471_v54  ;;  %v1928_v33 = vpop.xlane.xlu0 %1927 }
0x1060   :  { %v1803_v37 = vmul.f32 %v2642_v39, %v3465_v32  ;;  %v1934_v62 = vsub.f32 %v3480_v8, %v1928_v33 }
0x1062   :  { %v1807_v29 = vpack.c.bf16 %v1804_v52, %v1803_v37  ;;  %v1940_v1 = vmul.f32 1.442695, %v1934_v62 }
0x1065   :  { %1945 = vadd.xlane.f32.xlu2 %v1944_v48 }
0x1066   :  { %2453 = vmatmul.msk.bf16.gmra.mxu1 %vm146_vm0, %v1624_v36 }
0x1067   :  { %v1795_v54 = vpop.xlane.xlu0 %1794 }
0x106d   :  { %1797 = vadd.xlane.f32.xlu2 %v1796_v19 }
0x1076   :  { %2460 = vmatmul.msk.bf16.vlgmr.msrb.gmra.mxu1 %vm146_vm0, %v1807_v29 }
0x108f   :  { %v1925_v26 = vpop.xlane.xlu2 %1924 }
0x1090   :  { %v1933_v43 = vsub.f32 %v3494_v44, %v1925_v26  ;;  %v1967_v44 = vpop.permute.xlu0 %1966 }
0x1092   :  { %v1938_v60 = vmul.f32 1.442695, %v1933_v43 }
0x1094   :  { %2643 = vpow2.f32 %v1938_v60 }
0x1095   :  { %2645 = vpow2.f32 %v1940_v1 }
0x1097   :  { %v1931_v3 = vpop.xlane.xlu2 %1930 }
0x1098   :  { %v1935_v34 = vsub.f32 %v3500_v4, %v1931_v3  ;;  %v1658_v4 = vpack.c.b16 %v3266_v7, %v3266_v7  ;;  %v1999_v7 = vpack.c.b16 %v3245_v23, %v3245_v23 }
0x109a   :  { %v2644_v41 = vpop.eup %2643  ;;  %v1942_v38 = vmul.f32 1.442695, %v1935_v34  ;;  %2000 = vrot.lane.b32.xlu0 %v1999_v7, %s2742_s11 }
0x109b   :  { %v1947_v32 = vsel %vm146_vm0, %v2644_v41, 0.0  ;;  %v2646_v9 = vpop.eup %2645 }
0x109c   :  { %1948 = vadd.xlane.f32.xlu1 %v1947_v32  ;;  %2647 = vpow2.f32 %v1942_v38  ;;  %v1950_v8 = vsel %vm146_vm0, %v2646_v9, 0.0 }
0x109d   :  { %2649 = vrcp.f32 %v1795_v54 }
0x109f   :  { %v1969_v57 = vpop.permute.xlu2 %1968 }
0x10a0   :  { %1984 = vmatpush.bf16.msra.mxu0 %v1969_v57 }
0x10a2   :  { %v2648_v15 = vpop.eup %2647 }
0x10a3   :  { %v1953_v17 = vsel %vm146_vm0, %v2648_v15, 0.0  ;;  %v2650_v24 = vpop.eup %2649 }
0x10a4   :  { %1951 = vadd.xlane.f32.xlu1 %v1950_v8  ;;  %1985 = vmatpush.bf16.msra.mxu0 %v1967_v44  ;;  %v1805_v59 = vmul.f32 %v2650_v24, %v3484_v0 }
0x10ac   :  { %1954 = vadd.xlane.f32.xlu1 %v1953_v17 }
0x10c5   :  { %1659 = vrot.lane.b32.xlu1 %v1658_v4, %s2742_s11 }
0x10d3   :  { %v1646_v45 = vpop.f32.mrf.mxu1 }
0x10d8   :  { %v1946_v20 = vpop.xlane.xlu2 %1945 }
0x10db   :  { %v1648_v48 = vpop.f32.mrf.mxu1 }
0x10dc   :  { %v1656_v39 = vpack.c.bf16 %v1648_v48, %v1646_v45 }
0x10e0   :  { %v1798_v49 = vpop.xlane.xlu2 %1797 }
0x10e1   :  { %2651 = vrcp.f32 %v1798_v49 }
0x10e2   :  { %2653 = vrcp.f32 %v1946_v20  ;;  %v2034_v20 = vperm.slane %v3312_v58, 4 }
0x10e3   :  { %v1651_v19 = vpop.f32.mrf.mxu1 }
0x10e7   :  { %v2652_v27 = vpop.eup %2651 }
0x10e8   :  { %v1806_v28 = vmul.f32 %v2652_v27, %v2638_v46  ;;  %v2654_v51 = vpop.eup %2653  ;;  %v1844_v46 = vpop.permute.xlu0 %1843 }
0x10e9   :  { %v1960_v50 = vmul.f32 %v2654_v51, %v3511_v14  ;;  %v1852_v30 = vsel %vm554_vm6, %v1844_v46, 0 }
0x10ea   :  { %v1808_v35 = vpack.c.bf16 %v1806_v28, %v1805_v59 }
0x10eb   :  { %v1653_v52 = vpop.f32.mrf.mxu1 }
0x10ec   :  { %2461 = vmatmul.msk.bf16.gmra.mxu1 %vm146_vm0, %v1808_v35  ;;  %v1657_v37 = vpack.c.bf16 %v1653_v52, %v1651_v19 }
0x10f3   :  { %v1830_v29 = vpop.f32.mrf.mxu1 }
0x10fb   :  { %v1832_v33 = vpop.f32.mrf.mxu1 }
0x10fc   :  { %v1840_v26 = vpack.c.bf16 %v1832_v33, %v1830_v29 }
0x110c   :  { %v2001_v1 = vpop.permute.xlu0 %2000 }
0x110d   :  { %v2009_v3 = vsel %vm554_vm6, %v2001_v1, 0 }
0x110e   :  { %2018 = vmatpush.bf16.msra.mxu1 %v2009_v3 }
0x110f   :  { %v1949_v11 = vpop.xlane.xlu1 %1948 }
0x1110   :  { %2655 = vrcp.f32 %v1949_v11 }
0x1116   :  { %v2656_v55 = vpop.eup %2655 }
0x1117   :  { %v1961_v5 = vmul.f32 %v2656_v55, %v2644_v41  ;;  %v1952_v2 = vpop.xlane.xlu1 %1951 }
0x1118   :  { %2657 = vrcp.f32 %v1952_v2 }
0x1119   :  { %v1964_v21 = vpack.c.bf16 %v1961_v5, %v1960_v50 }
0x111b   :  { %2466 = vmatmul.msk.bf16.vlgmr.msra.gmra.mxu0 %vm146_vm0, %v1964_v21 }
0x111e   :  { %v2658_v10 = vpop.eup %2657 }
0x111f   :  { %v1955_v0 = vpop.xlane.xlu1 %1954  ;;  %v1962_v47 = vmul.f32 %v2658_v10, %v2646_v9 }
0x1120   :  { %2659 = vrcp.f32 %v1955_v0 }
0x1126   :  { %v2660_v23 = vpop.eup %2659 }
0x1127   :  { %v1963_v40 = vmul.f32 %v2660_v23, %v2648_v15 }
0x1129   :  { %v1965_v6 = vpack.c.bf16 %v1963_v40, %v1962_v47 }
0x112b   :  { %2467 = vmatmul.msk.bf16.gmra.mxu0 %vm146_vm0, %v1965_v6 }
0x1137   :  { %v1660_v36 = vpop.permute.xlu1 %1659 }
0x1138   :  { %v1668_v14 = vsel %vm554_vm6, %v1660_v36, 0 }
0x1139   :  { %1677 = vmatpush.bf16.msra.mxu2 %v1668_v14 }
0x113c   :  { %2454 = vmatmul.msk.bf16.vlgmr.msra.gmra.mxu2 %vm302_vm1, %v1656_v39 }
0x113d   :  { %1861 = vmatpush.bf16.msrb.mxu2 %v1852_v30 }
0x114c   :  { %2455 = vmatmul.msk.bf16.gmra.mxu2 %vm302_vm1, %v1657_v37 }
0x115c   :  { %2462 = vmatmul.msk.bf16.vlgmr.msrb.gmra.mxu2 %vm302_vm1, %v1840_v26 }
0x1169   :  { %v1835_v43 = vpop.f32.mrf.mxu1 }
0x1171   :  { %v1837_v62 = vpop.f32.mrf.mxu1 }
0x1172   :  { %v1841_v60 = vpack.c.bf16 %v1837_v62, %v1835_v43 }
0x1174   :  { %2463 = vmatmul.msk.bf16.gmra.mxu2 %vm302_vm1, %v1841_v60 }
0x1198   :  { %v1987_v41 = vpop.f32.mrf.mxu0 }
0x11a0   :  { %v1989_v34 = vpop.f32.mrf.mxu0 }
0x11a1   :  { %v1997_v54 = vpack.c.bf16 %v1989_v34, %v1987_v41 }
0x11a3   :  { %2468 = vmatmul.msk.bf16.vlgmr.msra.gmra.mxu1 %vm302_vm1, %v1997_v54 }
0x11a8   :  { %v1992_v32 = vpop.f32.mrf.mxu0 }
0x11b0   :  { %v1994_v38 = vpop.f32.mrf.mxu0 }
0x11b1   :  { %v1998_v57 = vpack.c.bf16 %v1994_v38, %v1992_v32 }
0x11b3   :  { %2469 = vmatmul.msk.bf16.gmra.mxu1 %vm302_vm1, %v1998_v57 }
0x11bf   :  { %v1679_v9 = vpop.f32.mrf.mxu2 }
0x11c0   :  { %v1711_v4 = vadd.f32 %v3438_v53, %v1679_v9 }
0x11c7   :  { %v1681_v44 = vpop.f32.mrf.mxu2 }
0x11c8   :  { %v1713_v28 = vadd.f32 %v3440_v13, %v1681_v44 }
0x11cf   :  { %v1684_v8 = vpop.f32.mrf.mxu2 }
0x11d0   :  { %v1716_v53 = vadd.f32 %v3446_v16, %v1684_v8 }
0x11d7   :  { %v1686_v15 = vpop.f32.mrf.mxu2 }
0x11d8   :  { %v1718_v45 = vadd.f32 %v3452_v31, %v1686_v15 }
0x11df   :  { %v1863_v17 = vpop.f32.mrf.mxu2 }
0x11e0   :  { %v1873_v18 = vadd.f32 %v1863_v17, %v1711_v4 }
0x11e7   :  { %v1865_v27 = vpop.f32.mrf.mxu2 }
0x11e8   :  { %v1874_v7 = vadd.f32 %v1865_v27, %v1713_v28 }
0x11f7   :  { %v1868_v50 = vpop.f32.mrf.mxu2 }
0x11f8   :  { %v1875_v2 = vadd.f32 %v1868_v50, %v1716_v53  ;;  %v3594_v53 = vld [vmem:[%s3666_s4 + $0x10] sm:$0xff] }
0x1220   :  { %v2020_v49 = vpop.f32.mrf.mxu1 }
0x1221   :  { %v2030_v24 = vadd.f32 %v2020_v49, %v1873_v18 }
0x1223   :  { %v2035_v59 = vadd.f32 %v2034_v20, %v2030_v24 }
0x1225   :  { %v2039_v35 = vadd.f32 %v2035_v59, %v3291_v25  ;;  %v1870_v25 = vpop.f32.mrf.mxu2 }
0x1226   :  { %v1876_v47 = vadd.f32 %v1870_v25, %v1718_v45 }
0x1227   :  { %v2043_v11 = vsel %vm146_vm0, %v2039_v35, 0.0 }
0x1228   :  { %v2022_v51 = vpop.f32.mrf.mxu1  ;;  %2044 = vadd.xlane.f32.xlu0 %v2043_v11 }
0x1229   :  { %v2031_v55 = vadd.f32 %v2022_v51, %v1874_v7 }
0x122b   :  { %v2036_v5 = vadd.f32 %v2034_v20, %v2031_v55 }
0x122d   :  { %v2040_v58 = vadd.f32 %v2036_v5, %v3293_v42 }
0x122f   :  { %v2046_v21 = vsel %vm146_vm0, %v2040_v58, 0.0 }
0x1230   :  { %v2025_v0 = vpop.f32.mrf.mxu1  ;;  %2047 = vadd.xlane.f32.xlu2 %v2046_v21 }
0x1231   :  { %v2032_v13 = vadd.f32 %v2025_v0, %v1875_v2  ;;  %v3600_v0 = vld [vmem:[%s3666_s4 + $0x18] sm:$0x7] }
0x1233   :  { %v2037_v10 = vadd.f32 %v2034_v20, %v2032_v13 }
0x1235   :  { %v2041_v23 = vadd.f32 %v2037_v10, %v3301_v12 }
0x1237   :  { %v2049_v40 = vsel %vm146_vm0, %v2041_v23, 0.0 }
0x1238   :  { %v2027_v6 = vpop.f32.mrf.mxu1  ;;  %2050 = vadd.xlane.f32.xlu1 %v2049_v40 }
0x1239   :  { %v2033_v16 = vadd.f32 %v2027_v6, %v1876_v47 }
0x123b   :  { %v2038_v48 = vadd.f32 %v2034_v20, %v2033_v16 }
0x123c   :  { %2146 = vrot.lane.b32.xlu0 %v3255_v63, %s2743_s16 }
0x123d   :  { %v2042_v42 = vadd.f32 %v2038_v48, %v3303_v61 }
0x123f   :  { %v2052_v36 = vsel %vm146_vm0, %v2042_v42, 0.0 }
0x1240   :  { %2053 = vadd.xlane.f32.xlu2 %v2052_v36 }
0x1251   :  { %2144 = vrot.lane.b32.xlu1 %v3279_v56, %s2743_s16 }
0x129b   :  { %v2045_v31 = vpop.xlane.xlu0 %2044 }
0x129c   :  { %v2055_v12 = vmul.f32 %v2045_v31, %v3154_v22 }
0x129e   :  { %v2059_v14 = vsub.f32 %v2039_v35, %v2055_v12 }
0x12a0   :  { %v2063_v46 = vmul.f32 %v2059_v14, %v2059_v14 }
0x12a2   :  { %v2067_v19 = vsel %vm146_vm0, %v2063_v46, 0.0 }
0x12a3   :  { %v2048_v30 = vpop.xlane.xlu2 %2047  ;;  %2068 = vadd.xlane.f32.xlu2 %v2067_v19 }
0x12a4   :  { %v2056_v39 = vmul.f32 %v2048_v30, %v3154_v22 }
0x12a6   :  { %v3570_v63 = vsub.f32 %v2040_v58, %v2056_v39  ;;  %v2131_v58 = vperm.slane %v3594_v53, 7 }
0x12a8   :  { %v2064_v61 = vmul.f32 %v3570_v63, %v3570_v63 }
0x12aa   :  { %v2070_v52 = vsel %vm146_vm0, %v2064_v61, 0.0 }
0x12ab   :  { %v2051_v37 = vpop.xlane.xlu1 %2050  ;;  %2071 = vadd.xlane.f32.xlu2 %v2070_v52 }
0x12ac   :  { %v2057_v56 = vmul.f32 %v2051_v37, %v3154_v22 }
0x12ae   :  { %v3576_v29 = vsub.f32 %v2041_v23, %v2057_v56  ;;  %v2147_v34 = vpop.permute.xlu0 %2146  ;;  %v2136_v23 = vperm.slane %v3600_v0, 0 }
0x12af   :  { %2162 = vmatpush.bf16.msra.mxu2 %v2147_v34 }
0x12b0   :  { %v2065_v33 = vmul.f32 %v3576_v29, %v3576_v29 }
0x12b2   :  { %v2073_v26 = vsel %vm146_vm0, %v2065_v33, 0.0 }
0x12b3   :  { %2074 = vadd.xlane.f32.xlu2 %v2073_v26  ;;  %v2054_v43 = vpop.xlane.xlu2 %2053 }
0x12b4   :  { %v2058_v62 = vmul.f32 %v2054_v43, %v3154_v22 }
0x12b6   :  { %v3582_v60 = vsub.f32 %v2042_v42, %v2058_v62 }
0x12b8   :  { %v2066_v1 = vmul.f32 %v3582_v60, %v3582_v60 }
0x12ba   :  { %v2076_v3 = vsel %vm146_vm0, %v2066_v1, 0.0 }
0x12bb   :  { %2077 = vadd.xlane.f32.xlu2 %v2076_v3  ;;  %v2501_v3 = vld [vmem:[%s3665_s3 + $0x38] sm:$0xff] }
0x12bc   :  { %2216 = vmatpush.bf16.msra.mxu3 %v2501_v3 }
0x12c3   :  { %v2145_v38 = vpop.permute.xlu1 %2144 }
0x12c4   :  { %2163 = vmatpush.bf16.msra.mxu2 %v2145_v38 }
0x1316   :  { %v2069_v41 = vpop.xlane.xlu2 %2068 }
0x1317   :  { %v2079_v54 = vmul.f32 %v2069_v41, %v3154_v22  ;;  %v2498_v41 = vld [vmem:[%s3665_s3 + $0x20] sm:$0xff] }
0x1319   :  { %v2083_v32 = vadd.f32 1e-05, %v2079_v54  ;;  %v2143_v54 = vperm.slane %v3594_v53, 5 }
0x131b   :  { %2661 = vrsqrt.f32 %v2083_v32  ;;  %vm2093_vm2 = vweird.f32 %v2083_v32 }
0x131e   :  { %v2072_v57 = vpop.xlane.xlu2 %2071 }
0x131f   :  { %v2080_v9 = vmul.f32 %v2072_v57, %v3154_v22 }
0x1321   :  { %v2662_v44 = vpop.eup %2661  ;;  %v2084_v8 = vadd.f32 1e-05, %v2080_v9 }
0x1322   :  { %v2088_v15 = vmul.f32 %v2662_v44, %v2083_v32  ;;  %vm2094_vm1 = vweird.f32 %v2662_v44 }
0x1323   :  { %2663 = vrsqrt.f32 %v2084_v8  ;;  %vm2095_vm3 = vmor %vm2093_vm2, %vm2094_vm1  ;;  %vm2103_vm5 = vweird.f32 %v2084_v8 }
0x1324   :  { %v2089_v17 = vmul.f32 %v2662_v44, %v2088_v15 }
0x1326   :  { %v2090_v4 = vmul.f32 0.5, %v2089_v17  ;;  %v2075_v18 = vpop.xlane.xlu2 %2074 }
0x1327   :  { %v2081_v20 = vmul.f32 %v2075_v18, %v3154_v22 }
0x1328   :  { %v2091_v49 = vsub.f32 1.5, %v2090_v4 }
0x1329   :  { %v2664_v24 = vpop.eup %2663  ;;  %v2085_v27 = vadd.f32 1e-05, %v2081_v20 }
0x132a   :  { %v2092_v59 = vmul.f32 %v2662_v44, %v2091_v49  ;;  %v2098_v28 = vmul.f32 %v2664_v24, %v2084_v8  ;;  %vm2104_vm4 = vweird.f32 %v2664_v24 }
0x132b   :  { %2665 = vrsqrt.f32 %v2085_v27  ;;  %vm2105_vm6 = vmor %vm2103_vm5, %vm2104_vm4  ;;  %vm2113_vm8 = vweird.f32 %v2085_v27 }
0x132c   :  { %v2099_v35 = vmul.f32 %v2664_v24, %v2098_v28  ;;  %v2096_v7 = vsel %vm2095_vm3, %v2662_v44, %v2092_v59 }
0x132d   :  { %v2127_v2 = vmul.f32 %v2096_v7, %v2059_v14 }
0x132e   :  { %v2100_v11 = vmul.f32 0.5, %v2099_v35  ;;  %v2078_v51 = vpop.xlane.xlu2 %2077 }
0x132f   :  { %v2082_v55 = vmul.f32 %v2078_v51, %v3154_v22  ;;  %v2132_v47 = vmul.f32 %v2131_v58, %v2127_v2 }
0x1330   :  { %v2101_v50 = vsub.f32 1.5, %v2100_v11 }
0x1331   :  { %v2666_v5 = vpop.eup %2665  ;;  %v2086_v21 = vadd.f32 1e-05, %v2082_v55  ;;  %v2137_v36 = vadd.f32 %v2136_v23, %v2132_v47 }
0x1332   :  { %v2102_v13 = vmul.f32 %v2664_v24, %v2101_v50  ;;  %v2108_v10 = vmul.f32 %v2666_v5, %v2085_v27  ;;  %vm2114_vm7 = vweird.f32 %v2666_v5  ;;  %v2181_v27 = vperm.slane %v3594_v53, 6 }
0x1333   :  { %2667 = vrsqrt.f32 %v2086_v21  ;;  %vm2115_vm9 = vmor %vm2113_vm8, %vm2114_vm7  ;;  %vm2123_vm12 = vweird.f32 %v2086_v21 }
0x1334   :  { %v2106_v25 = vsel %vm2105_vm6, %v2664_v24, %v2102_v13  ;;  %v2109_v45 = vmul.f32 %v2666_v5, %v2108_v10 }
0x1335   :  { %v2128_v40 = vmul.f32 %v2106_v25, %v3570_v63 }
0x1336   :  { %v2110_v6 = vmul.f32 0.5, %v2109_v45 }
0x1337   :  { %v2133_v16 = vmul.f32 %v2131_v58, %v2128_v40 }
0x1338   :  { %v2111_v48 = vsub.f32 1.5, %v2110_v6 }
0x1339   :  { %v2668_v42 = vpop.eup %2667  ;;  %v2138_v31 = vadd.f32 %v2136_v23, %v2133_v16 }
0x133a   :  { %v2112_v12 = vmul.f32 %v2666_v5, %v2111_v48  ;;  %v2118_v14 = vmul.f32 %v2668_v42, %v2086_v21  ;;  %vm2124_vm10 = vweird.f32 %v2668_v42 }
0x133b   :  { %v2141_v46 = vpack.c.bf16 %v2138_v31, %v2137_v36  ;;  %vm2125_vm13 = vmor %vm2123_vm12, %vm2124_vm10 }
0x133c   :  { %v2119_v19 = vmul.f32 %v2668_v42, %v2118_v14  ;;  %v2116_v30 = vsel %vm2115_vm9, %v2666_v5, %v2112_v12 }
0x133d   :  { %2470 = vmatmul.msk.bf16.vlgmr.msra.gmra.mxu2 %vm146_vm0, %v2141_v46  ;;  %v2129_v63 = vmul.f32 %v2116_v30, %v3576_v29  ;;  %v2500_v29 = vld [vmem:[%s3665_s3 + $0x30] sm:$0xff] }
0x133e   :  { %v2120_v39 = vmul.f32 0.5, %v2119_v19  ;;  %2217 = vmatpush.bf16.msra.mxu3 %v2500_v29 }
0x133f   :  { %v2134_v33 = vmul.f32 %v2131_v58, %v2129_v63 }
0x1340   :  { %v2121_v61 = vsub.f32 1.5, %v2120_v39 }
0x1341   :  { %v2139_v43 = vadd.f32 %v2136_v23, %v2134_v33 }
0x1342   :  { %v2122_v52 = vmul.f32 %v2668_v42, %v2121_v61 }
0x1344   :  { %v2126_v37 = vsel %vm2125_vm13, %v2668_v42, %v2122_v52 }
0x1345   :  { %v2130_v56 = vmul.f32 %v2126_v37, %v3582_v60  ;;  %v2499_v60 = vld [vmem:[%s3665_s3 + $0x28] sm:$0xff]  ;;  %s2751_s3 = smov [#allocation5]  }
0x1346   :  { %2218 = vmatpush.bf16.msra.mxu3 %v2499_v60  ;;  %s2341_s17 = sshll.u32 %s2751_s3, 4  ;;  %s2342_s17 = int_to_ptr.vmem [resolvable:$true] %s2341_s17 }
0x1347   :  { %v2135_v26 = vmul.f32 %v2131_v58, %v2130_v56 }
0x1349   :  { %v2140_v62 = vadd.f32 %v2136_v23, %v2135_v26 }
0x134a   :  { %2219 = vmatpush.bf16.msra.mxu3 %v2498_v41 }
0x134b   :  { %v2142_v1 = vpack.c.bf16 %v2140_v62, %v2139_v43 }
0x134d   :  { %2471 = vmatmul.msk.bf16.gmra.mxu2 %vm146_vm0, %v2142_v1 }
0x13c0   :  { %v2165_v34 = vpop.f32.mrf.mxu2 }
0x13c1   :  { %v2166_v32 = vadd.f32 %v2165_v34, %v2143_v54 }
0x13c3   :  { %v2175_v9 = vmax.f32 %v2166_v32, 0.0 }
0x13c8   :  { %v2167_v38 = vpop.f32.mrf.mxu2 }
0x13c9   :  { %v2168_v57 = vadd.f32 %v2167_v38, %v2143_v54 }
0x13cb   :  { %v2176_v44 = vmax.f32 %v2168_v57, 0.0 }
0x13cd   :  { %v2179_v8 = vpack.c.bf16 %v2176_v44, %v2175_v9 }
0x13cf   :  { %2488 = vmatmul.msk.bf16.vlgmr.msra.gmra.mxu3 %vm1101_vm11, %v2179_v8  ;;  %v2323_v8 = vperm.slane %v3600_v0, 1 }
0x13d0   :  { %v2170_v15 = vpop.f32.mrf.mxu2 }
0x13d1   :  { %v2171_v17 = vadd.f32 %v2170_v15, %v2143_v54 }
0x13d3   :  { %v2177_v20 = vmax.f32 %v2171_v17, 0.0 }
0x13d8   :  { %v2172_v4 = vpop.f32.mrf.mxu2 }
0x13d9   :  { %v2173_v18 = vadd.f32 %v2172_v4, %v2143_v54  ;;  %v2328_v4 = vperm.slane %v3600_v0, 2 }
0x13db   :  { %v2178_v49 = vmax.f32 %v2173_v18, 0.0 }
0x13dd   :  { %v2180_v24 = vpack.c.bf16 %v2178_v49, %v2177_v20 }
0x13df   :  { %2489 = vmatmul.msk.bf16.gmra.mxu3 %vm1101_vm11, %v2180_v24 }
0x1452   :  { %v2221_v59 = vpop.f32.mrf.mxu3 }
0x1453   :  { %v2222_v28 = vadd.f32 %v2221_v59, %v2181_v27 }
0x1455   :  { %v2231_v35 = vadd.f32 %v2222_v28, %v2137_v36 }
0x1457   :  { %v2235_v7 = vsel %vm146_vm0, %v2231_v35, 0.0 }
0x1458   :  { %2236 = vadd.xlane.f32.xlu2 %v2235_v7 }
0x145a   :  { %v2223_v11 = vpop.f32.mrf.mxu3 }
0x145b   :  { %v2224_v51 = vadd.f32 %v2223_v11, %v2181_v27 }
0x145d   :  { %v2232_v55 = vadd.f32 %v2224_v51, %v2138_v31 }
0x145f   :  { %v2238_v50 = vsel %vm146_vm0, %v2232_v55, 0.0 }
0x1460   :  { %2239 = vadd.xlane.f32.xlu2 %v2238_v50 }
0x1462   :  { %v2226_v5 = vpop.f32.mrf.mxu3 }
0x1463   :  { %v2227_v58 = vadd.f32 %v2226_v5, %v2181_v27 }
0x1465   :  { %v2233_v2 = vadd.f32 %v2227_v58, %v2139_v43 }
0x1467   :  { %v2241_v21 = vsel %vm146_vm0, %v2233_v2, 0.0 }
0x1468   :  { %2242 = vadd.xlane.f32.xlu0 %v2241_v21 }
0x146a   :  { %v2228_v13 = vpop.f32.mrf.mxu3 }
0x146b   :  { %v2229_v53 = vadd.f32 %v2228_v13, %v2181_v27 }
0x146d   :  { %v2234_v10 = vadd.f32 %v2229_v53, %v2140_v62 }
0x146f   :  { %v2244_v25 = vsel %vm146_vm0, %v2234_v10, 0.0 }
0x1470   :  { %2245 = vadd.xlane.f32.xlu2 %v2244_v25 }
0x14cb   :  { %v2237_v45 = vpop.xlane.xlu2 %2236 }
0x14cc   :  { %v2247_v23 = vmul.f32 %v2237_v45, %v3154_v22 }
0x14ce   :  { %v2251_v47 = vsub.f32 %v2231_v35, %v2247_v23 }
0x14d0   :  { %v2255_v40 = vmul.f32 %v2251_v47, %v2251_v47 }
0x14d2   :  { %v2259_v6 = vsel %vm146_vm0, %v2255_v40, 0.0 }
0x14d3   :  { %2260 = vadd.xlane.f32.xlu1 %v2259_v6  ;;  %v2240_v16 = vpop.xlane.xlu2 %2239 }
0x14d4   :  { %v2248_v48 = vmul.f32 %v2240_v16, %v3154_v22 }
0x14d6   :  { %v2252_v42 = vsub.f32 %v2232_v55, %v2248_v48 }
0x14d8   :  { %v2256_v36 = vmul.f32 %v2252_v42, %v2252_v42 }
0x14da   :  { %v2262_v31 = vsel %vm146_vm0, %v2256_v36, 0.0 }
0x14db   :  { %v2243_v12 = vpop.xlane.xlu0 %2242  ;;  %2263 = vadd.xlane.f32.xlu2 %v2262_v31 }
0x14dc   :  { %v2249_v14 = vmul.f32 %v2243_v12, %v3154_v22 }
0x14de   :  { %v3633_v46 = vsub.f32 %v2233_v2, %v2249_v14 }
0x14e0   :  { %v2257_v19 = vmul.f32 %v3633_v46, %v3633_v46 }
0x14e2   :  { %v2265_v30 = vsel %vm146_vm0, %v2257_v19, 0.0 }
0x14e3   :  { %2266 = vadd.xlane.f32.xlu2 %v2265_v30  ;;  %v2246_v39 = vpop.xlane.xlu2 %2245 }
0x14e4   :  { %v2250_v61 = vmul.f32 %v2246_v39, %v3154_v22 }
0x14e6   :  { %v3639_v63 = vsub.f32 %v2234_v10, %v2250_v61 }
0x14e8   :  { %v2258_v52 = vmul.f32 %v3639_v63, %v3639_v63 }
0x14ea   :  { %v2268_v37 = vsel %vm146_vm0, %v2258_v52, 0.0 }
0x14eb   :  { %2269 = vadd.xlane.f32.xlu2 %v2268_v37 }
0x1546   :  { %v2261_v56 = vpop.xlane.xlu1 %2260 }
0x1547   :  { %v2271_v33 = vmul.f32 %v2261_v56, %v3154_v22 }
0x1549   :  { %v2275_v26 = vadd.f32 1e-05, %v2271_v33 }
0x154b   :  { %2669 = vrsqrt.f32 %v2275_v26  ;;  %vm2285_vm14 = vweird.f32 %v2275_v26 }
0x154e   :  { %v2264_v43 = vpop.xlane.xlu2 %2263 }
0x154f   :  { %v2272_v62 = vmul.f32 %v2264_v43, %v3154_v22 }
0x1551   :  { %v2670_v1 = vpop.eup %2669  ;;  %v2276_v3 = vadd.f32 1e-05, %v2272_v62 }
0x1552   :  { %v2280_v29 = vmul.f32 %v2670_v1, %v2275_v26  ;;  %vm2286_vm11 = vweird.f32 %v2670_v1 }
0x1553   :  { %2671 = vrsqrt.f32 %v2276_v3  ;;  %vm2287_vm15 = vmor %vm2285_vm14, %vm2286_vm11  ;;  %vm2295_vm2 = vweird.f32 %v2276_v3 }
0x1554   :  { %v2281_v60 = vmul.f32 %v2670_v1, %v2280_v29 }
0x1556   :  { %v2282_v41 = vmul.f32 0.5, %v2281_v60  ;;  %v2267_v34 = vpop.xlane.xlu2 %2266 }
0x1557   :  { %v2273_v54 = vmul.f32 %v2267_v34, %v3154_v22 }
0x1558   :  { %v2283_v32 = vsub.f32 1.5, %v2282_v41 }
0x1559   :  { %v2672_v38 = vpop.eup %2671  ;;  %v2277_v57 = vadd.f32 1e-05, %v2273_v54 }
0x155a   :  { %v2284_v9 = vmul.f32 %v2670_v1, %v2283_v32  ;;  %v2290_v44 = vmul.f32 %v2672_v38, %v2276_v3  ;;  %vm2296_vm1 = vweird.f32 %v2672_v38 }
0x155b   :  { %2673 = vrsqrt.f32 %v2277_v57  ;;  %vm2297_vm3 = vmor %vm2295_vm2, %vm2296_vm1  ;;  %vm2305_vm5 = vweird.f32 %v2277_v57 }
0x155c   :  { %v2288_v15 = vsel %vm2287_vm15, %v2670_v1, %v2284_v9  ;;  %v2291_v17 = vmul.f32 %v2672_v38, %v2290_v44 }
0x155d   :  { %v2319_v18 = vmul.f32 %v2288_v15, %v2251_v47 }
0x155e   :  { %v2292_v20 = vmul.f32 0.5, %v2291_v17  ;;  %v2270_v49 = vpop.xlane.xlu2 %2269 }
0x155f   :  { %v2324_v24 = vmul.f32 %v2323_v8, %v2319_v18  ;;  %v2274_v27 = vmul.f32 %v2270_v49, %v3154_v22 }
0x1560   :  { %v2293_v59 = vsub.f32 1.5, %v2292_v20 }
0x1561   :  { %v2674_v28 = vpop.eup %2673  ;;  %v2329_v35 = vadd.f32 %v2328_v4, %v2324_v24  ;;  %v2278_v7 = vadd.f32 1e-05, %v2274_v27 }
0x1562   :  { %v2294_v11 = vmul.f32 %v2672_v38, %v2293_v59  ;;  %v2300_v51 = vmul.f32 %v2674_v28, %v2277_v57  ;;  %vm2306_vm4 = vweird.f32 %v2674_v28 }
0x1563   :  { %2333 = vst.msk [vmem:[#allocation5] sm:$0xff] %vm146_vm0, %v2329_v35  ;;  %2675 = vrsqrt.f32 %v2278_v7  ;;  %vm2307_vm6 = vmor %vm2305_vm5, %vm2306_vm4  ;;  %vm2315_vm8 = vweird.f32 %v2278_v7 }
0x1564   :  { %v2298_v55 = vsel %vm2297_vm3, %v2672_v38, %v2294_v11  ;;  %v2301_v0 = vmul.f32 %v2674_v28, %v2300_v51 }
0x1565   :  { %v2320_v50 = vmul.f32 %v2298_v55, %v2252_v42 }
0x1566   :  { %v2302_v5 = vmul.f32 0.5, %v2301_v0 }
0x1567   :  { %v2325_v58 = vmul.f32 %v2323_v8, %v2320_v50 }
0x1568   :  { %v2303_v2 = vsub.f32 1.5, %v2302_v5 }
0x1569   :  { %v2676_v22 = vpop.eup %2675  ;;  %v2330_v21 = vadd.f32 %v2328_v4, %v2325_v58 }
0x156a   :  { %v2304_v13 = vmul.f32 %v2674_v28, %v2303_v2  ;;  %v2310_v53 = vmul.f32 %v2676_v22, %v2278_v7  ;;  %vm2316_vm7 = vweird.f32 %v2676_v22 }
0x156b   :  { %2334 = vst.msk [vmem:[#allocation5 + $0x8] sm:$0xff] %vm146_vm0, %v2330_v21  ;;  %vm2317_vm9 = vmor %vm2315_vm8, %vm2316_vm7 }
0x156c   :  { %v2308_v10 = vsel %vm2307_vm6, %v2674_v28, %v2304_v13  ;;  %v2311_v25 = vmul.f32 %v2676_v22, %v2310_v53 }
0x156d   :  { %v2321_v45 = vmul.f32 %v2308_v10, %v3633_v46 }
0x156e   :  { %v2312_v23 = vmul.f32 0.5, %v2311_v25 }
0x156f   :  { %v2326_v47 = vmul.f32 %v2323_v8, %v2321_v45 }
0x1570   :  { %v2313_v40 = vsub.f32 1.5, %v2312_v23 }
0x1571   :  { %v2331_v6 = vadd.f32 %v2328_v4, %v2326_v47 }
0x1572   :  { %v2314_v16 = vmul.f32 %v2676_v22, %v2313_v40 }
0x1573   :  { %2335 = vst.msk [vmem:[#allocation5 + $0x10] sm:$0xff] %vm146_vm0, %v2331_v6 }
0x1574   :  { %v2318_v48 = vsel %vm2317_vm9, %v2676_v22, %v2314_v16 }
0x1575   :  { %v2322_v42 = vmul.f32 %v2318_v48, %v3639_v63 }
0x1577   :  { %v2327_v36 = vmul.f32 %v2323_v8, %v2322_v42 }
0x1579   :  { %v2332_v31 = vadd.f32 %v2328_v4, %v2327_v36 }
0x157b   :  { %2336 = vst.msk [vmem:[#allocation5 + $0x18] sm:$0xff] %vm146_vm0, %v2332_v31 }
0x157c   :  { %2349 = dma.vmem_to_hbm [thread:$0]  %s2342_s17, 512, %s2344_s20, [#allocation4], %s2740_s23, %s2740_s23, %s2741_s24  }
0x157d   :  { %2737 = dma.done.wait [#allocation4], 512  }
0x157e   :  { %2738 = vsyncadd [#allocation4], 4294966784 }
0x157f   :  { %2354 = vsyncpa [#allocation3], 1 }
0x1580   :  { %2355 = vsyncpa [#allocation4], 1 }

</bundles_post_ra>
